<compile_context>
chip_gen: v6e
topology: v6e:2x2x1
jax: 0.10.0
libtpu: 0.0.40
codegen_flags: <defaults>
</compile_context>

<pallas_src>
import functools

import jax
import jax.numpy as jnp
import numpy as np
from jax import lax
from jax.experimental import pallas as pl
from jax.experimental.pallas import tpu as pltpu

_LANES = 128


def _round_up(x, m):
    return (x + m - 1) // m * m


def _pick_row_tile(h):
    """Largest convenient row-tile that divides H and yields >=2 tiles."""
    for th in (32, 16, 8):
        if h % th == 0 and h // th >= 2:
            return th
    return h


def _residual_block_kernel(xt_ref, xr_ref, w1_ref, b1_ref, w2_ref, b2_ref,
                           out_ref, *, H, W, TH, compute_dtype):
    """One (batch, row-tile) block of the fused residual block.

    xt_ref : (1, TH+4, W+4, Cp)  spatially 2-padded input tile (halo included),
                                 compute_dtype (bf16)
    xr_ref : (1, TH, W, Cp)      unpadded input tile for the residual add (f32)
    w1_ref : (9*Cp, Cp)          conv1 weights, taps folded into K (bf16)
    b1_ref : (1, Cp)             conv1 bias (f32)
    w2_ref : (9*Cp, Cp)          conv2 weights (bf16)
    b2_ref : (1, Cp)             conv2 bias (f32)
    out_ref: (1, TH, W, Cp)      output tile
    """
    Cp = out_ref.shape[-1]
    t = pl.program_id(1)

    xt = xt_ref[0]                                     # (TH+4, W+4, Cp) bf16

    # ---- conv1: one deep-K MXU contraction (im2col over the 3x3 taps) ----
    # Activation is computed on a (TH+2, W+2) halo ring so conv2 can be fused
    # without a re-padded scratch buffer.
    p1 = jnp.concatenate(
        [xt[kh:kh + TH + 2, kw:kw + W + 2, :]
         for kh in range(3) for kw in range(3)], axis=-1)
    p1 = p1.reshape((TH + 2) * (W + 2), 9 * Cp)
    h1 = jnp.dot(p1, w1_ref[...], preferred_element_type=jnp.float32)
    h1 = h1 + b1_ref[...]
    h1 = jnp.where(h1 > 0, h1, 0.2 * h1)               # LeakyReLU(0.2), f32
    a = h1.reshape(TH + 2, W + 2, Cp)

    # Zero the halo positions that correspond to conv2's SAME padding
    # (outside the image) — this replaces the zero-bordered scratch.
    rows = lax.broadcasted_iota(jnp.int32, (TH + 2, W + 2, 1), 0) + (t * TH - 1)
    cols = lax.broadcasted_iota(jnp.int32, (TH + 2, W + 2, 1), 1) - 1
    valid = (rows >= 0) & (rows < H) & (cols >= 0) & (cols < W)
    a = jnp.where(valid, a, 0.0)

    # ---- conv2: second deep-K contraction ----
    p2 = jnp.concatenate(
        [a[kh:kh + TH, kw:kw + W, :]
         for kh in range(3) for kw in range(3)], axis=-1)
    p2 = p2.reshape(TH * W, 9 * Cp).astype(compute_dtype)
    h2 = jnp.dot(p2, w2_ref[...], preferred_element_type=jnp.float32)
    h2 = h2 + b2_ref[...]

    # ---- residual add (aligned, lane-dense read of the original input) ----
    out3 = h2.reshape(TH, W, Cp) + xr_ref[0].astype(jnp.float32)
    out_ref[0] = out3.astype(out_ref.dtype)


@functools.partial(jax.jit, static_argnames=("compute_dtype", "vmem_limit_bytes"))
def residual_block(x_nchw, w1, b1, w2, b2, *,
                   compute_dtype=jnp.bfloat16,
                   vmem_limit_bytes=32 * 1024 * 1024):
    """x_nchw: (N, C, H, W); w*: (3, 3, C, C) HWIO; b*: (C,)."""
    N, C, H, W = x_nchw.shape
    Cp = _round_up(C, _LANES)                 # lane-dense channel axis
    pad_c = Cp - C
    TH = _pick_row_tile(H)
    n_tiles = H // TH

    x_nhwc = jnp.transpose(x_nchw, (0, 2, 3, 1))                   # NCHW -> NHWC
    x_nhwc_p = jnp.pad(x_nhwc, ((0, 0), (0, 0), (0, 0), (0, pad_c)))

    # Conv input: spatial halo of 2 (two stacked 3x3 convs), bf16, pre-sliced
    # into overlapping row tiles so each grid step gets one aligned block.
    x_sp = jnp.pad(x_nhwc_p, ((0, 0), (2, 2), (2, 2), (0, 0))).astype(compute_dtype)
    x_tiles = jnp.stack(
        [x_sp[:, t * TH: t * TH + TH + 4] for t in range(n_tiles)], axis=1)
    x_tiles = x_tiles.reshape(N * n_tiles, TH + 4, W + 4, Cp)

    # Weights: HWIO -> (9*Cp, Cp) so each conv is a single deep-K matmul.
    def prep_w(w):
        wp = jnp.pad(w, ((0, 0), (0, 0), (0, pad_c), (0, pad_c)))
        return wp.reshape(9 * Cp, Cp).astype(compute_dtype)

    w1r, w2r = prep_w(w1), prep_w(w2)
    b1r = jnp.pad(b1, (0, pad_c)).reshape(1, Cp).astype(jnp.float32)
    b2r = jnp.pad(b2, (0, pad_c)).reshape(1, Cp).astype(jnp.float32)

    kernel = functools.partial(_residual_block_kernel, H=H, W=W, TH=TH,
                               compute_dtype=compute_dtype)

    itemsize = jnp.dtype(x_nchw.dtype).itemsize
    flops = 2 * 2 * 9 * N * H * W * Cp * Cp
    bytes_accessed = (x_tiles.size * x_tiles.dtype.itemsize       # conv input
                      + x_nhwc_p.size * itemsize                  # residual
                      + N * H * W * Cp * itemsize                 # output
                      + 2 * w1r.size * w1r.dtype.itemsize         # weights
                      + 2 * Cp * 4)                               # biases

    out_nhwc = pl.pallas_call(
        kernel,
        out_shape=jax.ShapeDtypeStruct((N, H, W, Cp), x_nchw.dtype),
        grid_spec=pltpu.PrefetchScalarGridSpec(
            num_scalar_prefetch=0,
            grid=(N, n_tiles),
            in_specs=[
                pl.BlockSpec((1, TH + 4, W + 4, Cp),
                             lambda n, t: (n * n_tiles + t, 0, 0, 0)),
                pl.BlockSpec((1, TH, W, Cp), lambda n, t: (n, t, 0, 0)),
                pl.BlockSpec((9 * Cp, Cp), lambda n, t: (0, 0)),
                pl.BlockSpec((1, Cp), lambda n, t: (0, 0)),
                pl.BlockSpec((9 * Cp, Cp), lambda n, t: (0, 0)),
                pl.BlockSpec((1, Cp), lambda n, t: (0, 0)),
            ],
            out_specs=pl.BlockSpec((1, TH, W, Cp), lambda n, t: (n, t, 0, 0)),
        ),
        compiler_params=pltpu.CompilerParams(
            dimension_semantics=("parallel", "parallel"),
            vmem_limit_bytes=vmem_limit_bytes,
        ),
        cost_estimate=pl.CostEstimate(flops=flops, transcendentals=0,
                                      bytes_accessed=bytes_accessed),
    )(x_tiles, x_nhwc_p, w1r, b1r, w2r, b2r)

    out = out_nhwc[..., :C]                                        # drop padded C
    return jnp.transpose(out, (0, 3, 1, 2))                        # NHWC -> NCHW


def _reference(x_nchw, w1, b1, w2, b2, compute_dtype=jnp.bfloat16):
    """Pure-JAX reference matching the PyTorch module semantics (same matmul dtype)."""
    x = jnp.transpose(x_nchw, (0, 2, 3, 1))
    dn = ("NHWC", "HWIO", "NHWC")
    h = lax.conv_general_dilated(x.astype(compute_dtype), w1.astype(compute_dtype),
                                 (1, 1), "SAME", dimension_numbers=dn,
                                 preferred_element_type=jnp.float32) + b1
    h = jnp.where(h > 0, h, 0.2 * h)
    h = lax.conv_general_dilated(h.astype(compute_dtype), w2.astype(compute_dtype),
                                 (1, 1), "SAME", dimension_numbers=dn,
                                 preferred_element_type=jnp.float32) + b2
    out = h + x
    return jnp.transpose(out, (0, 3, 1, 2))


def _init_conv_params(key, channels):
    """Deterministic init mimicking PyTorch Conv2d defaults (uniform +-1/sqrt(fan_in))."""
    fan_in = channels * 3 * 3
    bound = 1.0 / np.sqrt(fan_in)
    kw, kb = jax.random.split(key)
    w = jax.random.uniform(kw, (3, 3, channels, channels), jnp.float32, -bound, bound)
    b = jax.random.uniform(kb, (channels,), jnp.float32, -bound, bound)
    return w, b


if __name__ == "__main__":
    key = jax.random.PRNGKey(0)
    k_x, k_c1, k_c2 = jax.random.split(key, 3)

    N, C, H, W = 2, 4, 16, 16
    x = jax.random.normal(k_x, (N, C, H, W), jnp.float32)
    w1, b1 = _init_conv_params(k_c1, C)
    w2, b2 = _init_conv_params(k_c2, C)

    out = residual_block(x, w1, b1, w2, b2)
    out = jax.block_until_ready(out)

    ref = jax.block_until_ready(_reference(x, w1, b1, w2, b2))
    assert out.shape == (N, C, H, W)
    assert np.allclose(np.asarray(out), np.asarray(ref), atol=2e-3, rtol=2e-3), (
        f"max abs err {np.max(np.abs(np.asarray(out) - np.asarray(ref)))}")

    print("KERNEL_OK")
</pallas_src>

<mosaic_0001>
module attributes {stable_mosaic.version = 11 : i64} {
  func.func @_residual_block_kernel(%arg0: i32, %arg1: i32, %arg2: memref<1x12x20x128xbf16, #tpu.memory_space<vmem>>, %arg3: memref<1x8x16x128xf32, #tpu.memory_space<vmem>>, %arg4: memref<1152x128xbf16, #tpu.memory_space<vmem>>, %arg5: memref<1x128xf32, #tpu.memory_space<vmem>>, %arg6: memref<1152x128xbf16, #tpu.memory_space<vmem>>, %arg7: memref<1x128xf32, #tpu.memory_space<vmem>>, %arg8: memref<1x8x16x128xf32, #tpu.memory_space<vmem>>) attributes {dimension_semantics = [#tpu.dimension_semantics<parallel>, #tpu.dimension_semantics<parallel>], iteration_bounds = array<i64: 2, 2>, scalar_prefetch = 0 : i64, scratch_operands = 0 : i64, tpu.core_type = #tpu.core_type<tc>, window_params = [{transform_indices = @transform_0, window_bounds = array<i64: 1, 12, 20, 128>}, {transform_indices = @transform_1, window_bounds = array<i64: 1, 8, 16, 128>}, {pipeline_mode = #tpu.pipeline_mode<synchronous>, transform_indices = @transform_2, window_bounds = array<i64: 1152, 128>}, {pipeline_mode = #tpu.pipeline_mode<synchronous>, transform_indices = @transform_3, window_bounds = array<i64: 1, 128>}, {pipeline_mode = #tpu.pipeline_mode<synchronous>, transform_indices = @transform_4, window_bounds = array<i64: 1152, 128>}, {pipeline_mode = #tpu.pipeline_mode<synchronous>, transform_indices = @transform_5, window_bounds = array<i64: 1, 128>}, {transform_indices = @transform_6, window_bounds = array<i64: 1, 8, 16, 128>}]} {
    %c0 = arith.constant 0 : index
    %c0_0 = arith.constant 0 : index
    %c0_1 = arith.constant 0 : index
    %c0_2 = arith.constant 0 : index
    %0 = vector.load %arg2[%c0, %c0_0, %c0_1, %c0_2] : memref<1x12x20x128xbf16, #tpu.memory_space<vmem>>, vector<1x12x20x128xbf16>
    %1 = vector.shape_cast %0 : vector<1x12x20x128xbf16> to vector<12x20x128xbf16>
    %2 = vector.extract_strided_slice %1 {offsets = [0, 0, 0], sizes = [10, 18, 128], strides = [1, 1, 1]} : vector<12x20x128xbf16> to vector<10x18x128xbf16>
    %3 = vector.extract_strided_slice %1 {offsets = [0, 1, 0], sizes = [10, 18, 128], strides = [1, 1, 1]} : vector<12x20x128xbf16> to vector<10x18x128xbf16>
    %4 = vector.extract_strided_slice %1 {offsets = [0, 2, 0], sizes = [10, 18, 128], strides = [1, 1, 1]} : vector<12x20x128xbf16> to vector<10x18x128xbf16>
    %5 = vector.extract_strided_slice %1 {offsets = [1, 0, 0], sizes = [10, 18, 128], strides = [1, 1, 1]} : vector<12x20x128xbf16> to vector<10x18x128xbf16>
    %6 = vector.extract_strided_slice %1 {offsets = [1, 1, 0], sizes = [10, 18, 128], strides = [1, 1, 1]} : vector<12x20x128xbf16> to vector<10x18x128xbf16>
    %7 = vector.extract_strided_slice %1 {offsets = [1, 2, 0], sizes = [10, 18, 128], strides = [1, 1, 1]} : vector<12x20x128xbf16> to vector<10x18x128xbf16>
    %8 = vector.extract_strided_slice %1 {offsets = [2, 0, 0], sizes = [10, 18, 128], strides = [1, 1, 1]} : vector<12x20x128xbf16> to vector<10x18x128xbf16>
    %9 = vector.extract_strided_slice %1 {offsets = [2, 1, 0], sizes = [10, 18, 128], strides = [1, 1, 1]} : vector<12x20x128xbf16> to vector<10x18x128xbf16>
    %10 = vector.extract_strided_slice %1 {offsets = [2, 2, 0], sizes = [10, 18, 128], strides = [1, 1, 1]} : vector<12x20x128xbf16> to vector<10x18x128xbf16>
    %11 = tpu.concatenate %2, %3, %4, %5, %6, %7, %8, %9, %10 in 2 : vector<10x18x128xbf16>, vector<10x18x128xbf16>, vector<10x18x128xbf16>, vector<10x18x128xbf16>, vector<10x18x128xbf16>, vector<10x18x128xbf16>, vector<10x18x128xbf16>, vector<10x18x128xbf16>, vector<10x18x128xbf16> -> vector<10x18x1152xbf16>
    %12 = vector.shape_cast %11 : vector<10x18x1152xbf16> to vector<180x1152xbf16>
    %c0_3 = arith.constant 0 : index
    %c0_4 = arith.constant 0 : index
    %13 = vector.load %arg4[%c0_3, %c0_4] : memref<1152x128xbf16, #tpu.memory_space<vmem>>, vector<1152x128xbf16>
    %cst = arith.constant dense<0.000000e+00> : vector<180x128xf32>
    %14 = tpu.matmul %12, %13, %cst {dimension_numbers = #tpu.dot_dimension_numbers<[1], [0], [0], [1], [0, 0, 1, 1], [], []>} : vector<180x1152xbf16>, vector<1152x128xbf16>, vector<180x128xf32> -> vector<180x128xf32>
    %c0_5 = arith.constant 0 : index
    %c0_6 = arith.constant 0 : index
    %15 = vector.load %arg5[%c0_5, %c0_6] : memref<1x128xf32, #tpu.memory_space<vmem>>, vector<1x128xf32>
    %16 = vector.broadcast %15 : vector<1x128xf32> to vector<180x128xf32>
    %17 = arith.addf %14, %16 : vector<180x128xf32>
    %cst_7 = arith.constant 0.000000e+00 : f32
    %18 = vector.broadcast %cst_7 : f32 to vector<180x128xf32>
    %19 = arith.cmpf ogt, %17, %18 : vector<180x128xf32>
    %cst_8 = arith.constant 2.000000e-01 : f32
    %20 = vector.broadcast %cst_8 : f32 to vector<180x128xf32>
    %21 = arith.mulf %20, %17 : vector<180x128xf32>
    %22 = arith.select %19, %17, %21 : vector<180x128xi1>, vector<180x128xf32>
    %23 = vector.shape_cast %22 : vector<180x128xf32> to vector<10x18x128xf32>
    %24 = tpu.iota {dimensions = array<i32: 0>} : vector<10x18x1xi32>
    %c8_i32 = arith.constant 8 : i32
    %25 = arith.muli %arg1, %c8_i32 : i32
    %c1_i32 = arith.constant 1 : i32
    %26 = arith.subi %25, %c1_i32 : i32
    %27 = vector.broadcast %26 : i32 to vector<10x18x1xi32>
    %28 = arith.addi %24, %27 : vector<10x18x1xi32>
    %29 = tpu.iota {dimensions = array<i32: 1>} : vector<10x18x1xi32>
    %c1_i32_9 = arith.constant 1 : i32
    %30 = vector.broadcast %c1_i32_9 : i32 to vector<10x18x1xi32>
    %31 = arith.subi %29, %30 : vector<10x18x1xi32>
    %c0_i32 = arith.constant 0 : i32
    %32 = vector.broadcast %c0_i32 : i32 to vector<10x18x1xi32>
    %33 = arith.cmpi sge, %28, %32 : vector<10x18x1xi32>
    %c16_i32 = arith.constant 16 : i32
    %34 = vector.broadcast %c16_i32 : i32 to vector<10x18x1xi32>
    %35 = arith.cmpi slt, %28, %34 : vector<10x18x1xi32>
    %36 = arith.andi %33, %35 : vector<10x18x1xi1>
    %c0_i32_10 = arith.constant 0 : i32
    %37 = vector.broadcast %c0_i32_10 : i32 to vector<10x18x1xi32>
    %38 = arith.cmpi sge, %31, %37 : vector<10x18x1xi32>
    %39 = arith.andi %36, %38 : vector<10x18x1xi1>
    %c16_i32_11 = arith.constant 16 : i32
    %40 = vector.broadcast %c16_i32_11 : i32 to vector<10x18x1xi32>
    %41 = arith.cmpi slt, %31, %40 : vector<10x18x1xi32>
    %42 = arith.andi %39, %41 : vector<10x18x1xi1>
    %cst_12 = arith.constant 0.000000e+00 : f32
    %43 = vector.shape_cast %42 : vector<10x18x1xi1> to vector<10x18x1xi1>
    %44 = vector.broadcast %43 : vector<10x18x1xi1> to vector<10x18x128xi1>
    %45 = vector.broadcast %cst_12 : f32 to vector<10x18x128xf32>
    %46 = arith.select %44, %23, %45 : vector<10x18x128xi1>, vector<10x18x128xf32>
    %47 = vector.extract_strided_slice %46 {offsets = [0, 0, 0], sizes = [8, 16, 128], strides = [1, 1, 1]} : vector<10x18x128xf32> to vector<8x16x128xf32>
    %48 = vector.extract_strided_slice %46 {offsets = [0, 1, 0], sizes = [8, 16, 128], strides = [1, 1, 1]} : vector<10x18x128xf32> to vector<8x16x128xf32>
    %49 = vector.extract_strided_slice %46 {offsets = [0, 2, 0], sizes = [8, 16, 128], strides = [1, 1, 1]} : vector<10x18x128xf32> to vector<8x16x128xf32>
    %50 = vector.extract_strided_slice %46 {offsets = [1, 0, 0], sizes = [8, 16, 128], strides = [1, 1, 1]} : vector<10x18x128xf32> to vector<8x16x128xf32>
    %51 = vector.extract_strided_slice %46 {offsets = [1, 1, 0], sizes = [8, 16, 128], strides = [1, 1, 1]} : vector<10x18x128xf32> to vector<8x16x128xf32>
    %52 = vector.extract_strided_slice %46 {offsets = [1, 2, 0], sizes = [8, 16, 128], strides = [1, 1, 1]} : vector<10x18x128xf32> to vector<8x16x128xf32>
    %53 = vector.extract_strided_slice %46 {offsets = [2, 0, 0], sizes = [8, 16, 128], strides = [1, 1, 1]} : vector<10x18x128xf32> to vector<8x16x128xf32>
    %54 = vector.extract_strided_slice %46 {offsets = [2, 1, 0], sizes = [8, 16, 128], strides = [1, 1, 1]} : vector<10x18x128xf32> to vector<8x16x128xf32>
    %55 = vector.extract_strided_slice %46 {offsets = [2, 2, 0], sizes = [8, 16, 128], strides = [1, 1, 1]} : vector<10x18x128xf32> to vector<8x16x128xf32>
    %56 = tpu.concatenate %47, %48, %49, %50, %51, %52, %53, %54, %55 in 2 : vector<8x16x128xf32>, vector<8x16x128xf32>, vector<8x16x128xf32>, vector<8x16x128xf32>, vector<8x16x128xf32>, vector<8x16x128xf32>, vector<8x16x128xf32>, vector<8x16x128xf32>, vector<8x16x128xf32> -> vector<8x16x1152xf32>
    %57 = vector.shape_cast %56 : vector<8x16x1152xf32> to vector<128x1152xf32>
    %58 = arith.truncf %57 : vector<128x1152xf32> to vector<128x1152xbf16>
    %c0_13 = arith.constant 0 : index
    %c0_14 = arith.constant 0 : index
    %59 = vector.load %arg6[%c0_13, %c0_14] : memref<1152x128xbf16, #tpu.memory_space<vmem>>, vector<1152x128xbf16>
    %cst_15 = arith.constant dense<0.000000e+00> : vector<128x128xf32>
    %60 = tpu.matmul %58, %59, %cst_15 {dimension_numbers = #tpu.dot_dimension_numbers<[1], [0], [0], [1], [0, 0, 1, 1], [], []>} : vector<128x1152xbf16>, vector<1152x128xbf16>, vector<128x128xf32> -> vector<128x128xf32>
    %c0_16 = arith.constant 0 : index
    %c0_17 = arith.constant 0 : index
    %61 = vector.load %arg7[%c0_16, %c0_17] : memref<1x128xf32, #tpu.memory_space<vmem>>, vector<1x128xf32>
    %62 = vector.broadcast %61 : vector<1x128xf32> to vector<128x128xf32>
    %63 = arith.addf %60, %62 : vector<128x128xf32>
    %64 = vector.shape_cast %63 : vector<128x128xf32> to vector<8x16x128xf32>
    %c0_18 = arith.constant 0 : index
    %c0_19 = arith.constant 0 : index
    %c0_20 = arith.constant 0 : index
    %c0_21 = arith.constant 0 : index
    %65 = vector.load %arg3[%c0_18, %c0_19, %c0_20, %c0_21] : memref<1x8x16x128xf32, #tpu.memory_space<vmem>>, vector<1x8x16x128xf32>
    %66 = vector.shape_cast %65 : vector<1x8x16x128xf32> to vector<8x16x128xf32>
    %67 = arith.addf %64, %66 : vector<8x16x128xf32>
    %c0_22 = arith.constant 0 : index
    %c0_23 = arith.constant 0 : index
    %c0_24 = arith.constant 0 : index
    %c0_25 = arith.constant 0 : index
    %68 = vector.load %arg8[%c0_22, %c0_23, %c0_24, %c0_25] : memref<1x8x16x128xf32, #tpu.memory_space<vmem>>, vector<1x8x16x128xf32>
    %69 = vector.shape_cast %68 : vector<1x8x16x128xf32> to vector<8x16x128xf32>
    %70 = vector.shape_cast %67 : vector<8x16x128xf32> to vector<1x8x16x128xf32>
    tpu.vector_store %arg8[%c0_22, %c0_23, %c0_24, %c0_25], %70 {strides = array<i32>} : memref<1x8x16x128xf32, #tpu.memory_space<vmem>>, vector<1x8x16x128xf32>,
    return
  }
  func.func @transform_0(%arg0: i32, %arg1: i32) -> (i32, i32, i32, i32) {
    %c2_i32 = arith.constant 2 : i32
    %0 = arith.muli %arg0, %c2_i32 : i32
    %1 = arith.addi %0, %arg1 : i32
    %c0_i32 = arith.constant 0 : i32
    %c0_i32_0 = arith.constant 0 : i32
    %c0_i32_1 = arith.constant 0 : i32
    %c0_i32_2 = arith.constant 0 : i32
    return %1, %c0_i32, %c0_i32_0, %c0_i32_1 : i32, i32, i32, i32
  }
  func.func @transform_1(%arg0: i32, %arg1: i32) -> (i32, i32, i32, i32) {
    %c0_i32 = arith.constant 0 : i32
    %c0_i32_0 = arith.constant 0 : i32
    %c0_i32_1 = arith.constant 0 : i32
    return %arg0, %arg1, %c0_i32, %c0_i32_0 : i32, i32, i32, i32
  }
  func.func @transform_2(%arg0: i32, %arg1: i32) -> (i32, i32) {
    %c0_i32 = arith.constant 0 : i32
    %c0_i32_0 = arith.constant 0 : i32
    %c0_i32_1 = arith.constant 0 : i32
    return %c0_i32, %c0_i32_0 : i32, i32
  }
  func.func @transform_3(%arg0: i32, %arg1: i32) -> (i32, i32) {
    %c0_i32 = arith.constant 0 : i32
    %c0_i32_0 = arith.constant 0 : i32
    %c0_i32_1 = arith.constant 0 : i32
    return %c0_i32, %c0_i32_0 : i32, i32
  }
  func.func @transform_4(%arg0: i32, %arg1: i32) -> (i32, i32) {
    %c0_i32 = arith.constant 0 : i32
    %c0_i32_0 = arith.constant 0 : i32
    %c0_i32_1 = arith.constant 0 : i32
    return %c0_i32, %c0_i32_0 : i32, i32
  }
  func.func @transform_5(%arg0: i32, %arg1: i32) -> (i32, i32) {
    %c0_i32 = arith.constant 0 : i32
    %c0_i32_0 = arith.constant 0 : i32
    %c0_i32_1 = arith.constant 0 : i32
    return %c0_i32, %c0_i32_0 : i32, i32
  }
  func.func @transform_6(%arg0: i32, %arg1: i32) -> (i32, i32, i32, i32) {
    %c0_i32 = arith.constant 0 : i32
    %c0_i32_0 = arith.constant 0 : i32
    %c0_i32_1 = arith.constant 0 : i32
    return %arg0, %arg1, %c0_i32, %c0_i32_0 : i32, i32, i32, i32
  }
}

</mosaic_0001>

<bundles_post_ra>
// kernel: residual_block.1
= control target key start
LH: loop header
LB: loop body
LE: loop exit
PB: predicated region body
PF: predicated region fallthrough
CT: control target
= control target key end

     0   :  { %s10364_s21 = smov 0   ;;  %s10366_s22 = smov 0   ;;  %s13970_s0 = inlined_call_operand.vmem [shape: bf16[4,12,20,128], index: 0, kind: input, shape index: {}]   ;;  %s13971_s1 = inlined_call_operand.vmem [shape: f32[2,16,16,128], index: 1, kind: input, shape index: {}]   ;;  %s13972_s2 = inlined_call_operand.vmem [shape: bf16[1152,128], index: 2, kind: input, shape index: {}]   ;;  %s13973_s3 = inlined_call_operand.vmem [shape: f32[1,128], index: 3, kind: input, shape index: {}]   ;;  %s13974_s4 = inlined_call_operand.vmem [shape: bf16[1152,128], index: 4, kind: input, shape index: {}]   ;;  %s13975_s5 = inlined_call_operand.vmem [shape: f32[1,128], index: 5, kind: input, shape index: {}]   ;;  %s13976_s6 = inlined_call_operand.vmem [shape: f32[2,16,16,128], index: 6, kind: output, shape index: {}]  }
   0x1   :  { %s10368_s23 = smov 0   ;;  %s10370_s24 = smov 0  }
   0x2   :  { %s10372_s25 = smov 0  }
   0x3 LB: > { %s25_s26 = sadd.s32 1, %s10317_s23  ;;  %s28_s27 = sadd.s32 1, %s10321_s24  ;;  %s10325_s25 = sphi %s10372_s25, %s16_s25   ;;  %s10321_s24 = sphi %s10370_s24, %s14346_s24   ;;  %s10317_s23 = sphi %s10368_s23, %s14345_s23   ;;  %s10313_s22 = sphi %s10366_s22, %s14344_s22   ;;  %s10309_s21 = sphi %s10364_s21, %s14343_s21  }
   0x4   : > { %p26_p0 = scmp.ge.s32.totalorder %s25_s26, 2  ;;  %p8954_p1 = scmp.ge.s32.totalorder %s10325_s25, 1 }
   0x5   : > { %p252_p2 = scmp.lt.s32.totalorder %s10325_s25, 5 }
   0x6   : > { %s14348_s26 = smov (%p26_p0, %s25_s26), 0  ;;  %s14350_s27 = smov (!%p26_p0, %s28_s27), %s10321_s24 }
   0x7   : > { %p253_p3 = pnand %p8954_p1, %p252_p2  ;;  %p30_p4 = scmp.ge.s32.totalorder %s14350_s27, 2 }
   0x9   : > { %s14352_s27 = smov (%p30_p4, %s14350_s27), 0  ;;  %256 = sbr.rel (%p253_p3) target bundleno = 948 (0x3b4), region = 44 }
   0xe   : > { %v10117_v0 = vld [vmem:[%s13972_s2 + $0x78] sm:$0xff]   ;;  %v10120_v3 = vld [vmem:[%s13972_s2 + $0x70] sm:$0xff]   ;;  %v10124_v7 = vld [vmem:[%s13972_s2 + $0x68] sm:$0xff]   ;;  %s8955_s9 = sshll.u32 %s10313_s22, 1  ;;  %vm14073_vm0 = vcmask 1046528   ;;  %v692_v34 = vlaneseq  ;;  %s12575_s10 = sshll.u32 %s10309_s21, 3 }
   0xf   : > { %v10118_v1 = vld [vmem:[%s13972_s2 + $0x38] sm:$0xff]   ;;  %9358 = vmatprep.subr.bf16.mxu0 %v10117_v0  ;;  %v10122_v5 = vld [vmem:[%s13972_s2 + $0x30] sm:$0xff]   ;;  %v10126_v9 = vld [vmem:[%s13972_s2 + $0x28] sm:$0xff]   ;;  %s300_s16 = sadd.s32 %s10309_s21, %s8955_s9  ;;  %vm447_vm1 = vsmask.f32 7424  ;;  %s9207_s11 = sadd.s32 4294967295, %s12575_s10 }
  0x10   : > { %v10119_v2 = vld [vmem:[%s13972_s2 + $0xf8] sm:$0xff]   ;;  %9359 = vmatpush3.bf16.msra.mxu0 %v10118_v1  ;;  %v10123_v6 = vld [vmem:[%s13972_s2 + $0xf0] sm:$0xff]   ;;  %v10127_v10 = vld [vmem:[%s13972_s2 + $0xe8] sm:$0xff]   ;;  %p301_p5 = scmp.lt.s32.totalorder %s300_s16, 3  ;;  %v10327_v47 = vmov 1966171168  }
  0x11   : > { %9446 = vmatprep.subr.bf16.mxu1 %v10119_v2  ;;  %v10121_v4 = vld [vmem:[%s13972_s2 + $0xb8] sm:$0xff]   ;;  %9360 = vmatprep.subr.bf16.mxu0 %v10120_v3  ;;  %v10125_v8 = vld [vmem:[%s13972_s2 + $0xb0] sm:$0xff]   ;;  %v10128_v11 = vld [vmem:[%s13972_s2 + $0x60] sm:$0xff]   ;;  %v690_v48 = vunpack.c.l.s4 %v10327_v47  ;;  %v10522_v49 = vshrl.u32 %v692_v34, 7  ;;  %p309_p6 = scmp.lt.s32.totalorder %s10313_s22, 1  ;;  %p311_p7 = scmp.lt.s32.totalorder %s12575_s10, 15 }
  0x12   : > { %9447 = vmatpush3.bf16.msra.mxu1 %v10121_v4  ;;  %v10129_v12 = vld [vmem:[%s13972_s2 + $0xa8] sm:$0xff]   ;;  %v10130_v13 = vld [vmem:[%s13972_s2 + $0x20] sm:$0xff]   ;;  %v10132_v15 = vld [vmem:[%s13972_s2 + $0x58] sm:$0xff]   ;;  %s14354_s16 = smov (!%p301_p5, %s300_s16), 3 }
  0x13   : > { %9448 = vmatprep.subr.bf16.mxu1 %v10123_v6  ;;  %v10131_v14 = vld [vmem:[%s13972_s2 + $0xe0] sm:$0xff]   ;;  %v10134_v17 = vld [vmem:[%s13972_s2 + $0x18] sm:$0xff]   ;;  %v10136_v19 = vld [vmem:[%s13972_s2 + $0x50] sm:$0xff]   ;;  %s10074_s30 = smul.u32 144, %s14354_s16  ;;  %14074 = vst [vmem:[#allocation2_spill] sm:$0xff] %v10522_v49  ;;  %v691_v53 = vunpack.c.0.s8 %v690_v48  ;;  %s14356_s22 = smov (!%p309_p6, %s10313_s22), 1 }
  0x14   : > { %9361 = vmatpush3.bf16.msra.mxu0 %v10122_v5  ;;  %v10133_v16 = vld [vmem:[%s13972_s2 + $0xa0] sm:$0xff]   ;;  %v10135_v18 = vld [vmem:[%s13972_s2 + $0xd8] sm:$0xff]   ;;  %v10138_v21 = vld [vmem:[%s13972_s2 + $0x10] sm:$0xff]   ;;  %s14358_s10 = smov (!%p311_p7, %s12575_s10), 15 }
  0x15   : > { %9362 = vmatprep.subr.bf16.mxu0 %v10124_v7  ;;  %v10137_v20 = vld [vmem:[%s13972_s2 + $0x98] sm:$0xff]   ;;  %v10139_v22 = vld [vmem:[%s13972_s2 + $0xd0] sm:$0xff]   ;;  %v10140_v23 = vld [vmem:[%s13972_s2 + $0x48] sm:$0xff]   ;;  %s10490_s17 = scalar_lea.vmem %s13970_s0, %s10074_s30  ;;  %v10548_v0 = vsub.s32 %v691_v53, %v10522_v49  ;;  %s8958_s29 = sshll.u32 %s14358_s10, 1 }
  0x16   : > { %9449 = vmatpush3.bf16.msra.mxu1 %v10125_v8  ;;  %v10141_v24 = vld [vmem:[%s13972_s2 + $0x90] sm:$0xff]   ;;  %v10142_v25 = vld [vmem:[%s13972_s2 + $0x8] sm:$0xff]   ;;  %v10144_v27 = vld [vmem:[%s13972_s2 + $0x40] sm:$0xff]   ;;  %s8959_s30 = sshll.u32 %s14356_s22, 5 }
  0x17   : > { %9450 = vmatprep.subr.bf16.mxu1 %v10127_v10  ;;  %v10143_v26 = vld [vmem:[%s13972_s2 + $0xc8] sm:$0xff]   ;;  %v10146_v29 = vld [vmem:[%s13972_s2] sm:$0xff]   ;;  %v335_v36 = vld [vmem:[%s10490_s17 + $0x10] sm:$0xf]  ;;  %s315_s7 = sadd.s32 %s8959_s30, %s8958_s29 }
  0x18   : > { %9363 = vmatpush3.bf16.msra.mxu0 %v10126_v9  ;;  %v10145_v28 = vld [vmem:[%s13972_s2 + $0x88] sm:$0xff]   ;;  %v10147_v30 = vld [vmem:[%s13972_s2 + $0xc0] sm:$0xff]   ;;  %v10152_v45 = vld [vmem:[%s13972_s2 + $0x178] sm:$0xff]   ;;  %s8960_s8 = sshll.u32 %s315_s7, 3 }
  0x19   : > { %9364 = vmatprep.subr.bf16.mxu0 %v10128_v11  ;;  %v331_v31 = vld [vmem:[%s10490_s17] sm:$0xf]  ;;  %v332_v32 = vld [vmem:[%s10490_s17 + $0x4] sm:$0xf]  ;;  %v10501_v33 = vld [vmem:[%s10490_s17 + $0x8] sm:$0x3]  ;;  %s13860_s21 = scalar_lea.vmem %s13976_s6, %s8960_s8 }
  0x1a   : > { %9451 = vmatpush3.bf16.msra.mxu1 %v10129_v12  ;;  %v10504_v35 = vld [vmem:[%s10490_s17 + $0xc] sm:$0xf]  ;;  %v8965_v37 = vcombine.low %v331_v31, %v332_v32  ;;  %v10509_v38 = vcombine.low %v10501_v33, %v10501_v33  ;;  %v10151_v44 = vld [vmem:[%s13972_s2 + $0x80] sm:$0xff]   ;;  %v10528_v54 = vld [vmem:[%s10490_s17 + $0x14] sm:$0x3] }
  0x1b   : > { %9452 = vmatprep.subr.bf16.mxu1 %v10131_v14  ;;  %v10512_v39 = vcombine.low %v10504_v35, %v335_v36  ;;  %v10531_v55 = vld [vmem:[%s10490_s17 + $0x18] sm:$0xf]  ;;  %v338_v56 = vld [vmem:[%s10490_s17 + $0x1c] sm:$0xf]  ;;  %v10537_v60 = vld [vmem:[%s10490_s17 + $0x20] sm:$0x3]  ;;  %v10545_v63 = vcombine.low %v10528_v54, %v10528_v54 }
  0x1c   : > { %9365 = vmatpush3.bf16.msra.mxu0 %v10130_v13  ;;  %v449_v40 = vshrl.u32 %v8965_v37, 16  ;;  %v451_v41 = vshll.u32 %v8965_v37, 16  ;;  %v456_v42 = vshll.u32 %v10509_v38, 16  ;;  %v599_v43 = vrot.slane %v8965_v37, 1  ;;  %v10540_v61 = vld [vmem:[%s10490_s17 + $0x24] sm:$0xf] }
  0x1d   : > { %9366 = vmatprep.subr.bf16.mxu0 %v10132_v15  ;;  %v600_v46 = vrot.slane %v10509_v38, 1  ;;  %v341_v62 = vld [vmem:[%s10490_s17 + $0x28] sm:$0xf]  ;;  %v10551_v1 = vld [vmem:[%s10490_s17 + $0x2c] sm:$0x3]  ;;  %v10554_v2 = vcombine.low %v10531_v55, %v338_v56  ;;  %v10558_v3 = vcombine.low %v10537_v60, %v10537_v60  ;;  %v460_v7 = vshrl.u32 %v10509_v38, 16 }
  0x1e   : > { %9453 = vmatpush3.bf16.msra.mxu1 %v10133_v16  ;;  %v453_v50 = vrot.slane %v451_v41, 1  ;;  %v458_v51 = vrot.slane %v456_v42, 1  ;;  %v10561_v4 = vcombine.low %v10540_v61, %v341_v62  ;;  %v10566_v6 = vcombine.low %v10551_v1, %v10551_v1 }
  0x1f   : > { %9454 = vmatprep.subr.bf16.mxu1 %v10135_v18  ;;  %v601_v52 = vsel %vm14073_vm0, %v599_v43, %v600_v46  ;;  %v464_v8 = vshrl.u32 %v10512_v39, 16  ;;  %v466_v14 = vshll.u32 %v10512_v39, 16  ;;  %v471_v15 = vshll.u32 %v10545_v63, 16 }
  0x20   : > { %9367 = vmatpush3.bf16.msra.mxu0 %v10134_v17  ;;  %v454_v57 = vor.u32 %v453_v50, %v449_v40  ;;  %v8990_v58 = vcombine.low %v601_v52, %v10504_v35  ;;  %v684_v59 = vcombine.high %v601_v52, %v10512_v39  ;;  %v462_v13 = vor.u32 %v460_v7, %v458_v51 }
  0x21   : > { %9368 = vmatprep.subr.bf16.mxu0 %v10136_v19  ;;  %v479_v16 = vshrl.u32 %v10554_v2, 16  ;;  %v481_v19 = vshll.u32 %v10554_v2, 16  ;;  %v602_v53 = vrot.slane %v10512_v39, 1  ;;  %v10602_v56 = vrot.slane %v10545_v63, 1 }
  0x22   : > { %9455 = vmatpush3.bf16.msra.mxu1 %v10137_v20  ;;  %v459_v5 = vsel %vm447_vm1, %v454_v57, %v458_v51  ;;  %v709_v11 = vrot.slane %v8990_v58, %v10548_v0  ;;  %v716_v12 = vrot.slane %v684_v59, %v10548_v0  ;;  %v486_v20 = vshll.u32 %v10558_v3, 16 }
  0x23   : > { %9456 = vmatprep.subr.bf16.mxu1 %v10139_v22  ;;  %v8989_v9 = vcombine.low %v331_v31, %v459_v5  ;;  %v682_v10 = vcombine.high %v8965_v37, %v459_v5  ;;  %v10579_v22 = vrot.slane %v471_v15, 1  ;;  %v10614_v7 = vsel %vm14073_vm0, %v602_v53, %v10602_v56 }
  0x24   : > { %9369 = vmatpush3.bf16.msra.mxu0 %v10138_v21  ;;  %v468_v21 = vrot.slane %v466_v14, 1  ;;  %v10583_v31 = vrot.slane %v486_v20, 1 }
  0x25   : > { %9370 = vmatprep.subr.bf16.mxu0 %v10140_v23  ;;  %v695_v17 = vrot.slane %v8989_v9, %v10548_v0  ;;  %v702_v18 = vrot.slane %v682_v10, %v10548_v0  ;;  %v494_v23 = vshrl.u32 %v10561_v4, 16  ;;  %v10618_v9 = vrot.slane %v10558_v3, 1 }
  0x26   : > { %9457 = vmatpush3.bf16.msra.mxu1 %v10141_v24  ;;  %v496_v24 = vshll.u32 %v10561_v4, 16 }
  0x27   : > { %9458 = vmatprep.subr.bf16.mxu1 %v10143_v26  ;;  %v746_v26 = vcombine.high %v695_v17, %v709_v11 }
  0x28   : > { %9371 = vmatpush3.bf16.msra.mxu0 %v10142_v25  ;;  %v745_v25 = vcombine.low %v695_v17, %v709_v11  ;;  %v498_v32 = vrot.slane %v496_v24, 1  ;;  %v8992_v17 = vcombine.low %v10501_v33, %v462_v13  ;;  %v10153_v13 = vld [vmem:[%s13972_s2 + $0x138] sm:$0xff]  }
  0x29   : > { %9372 = vmatprep.subr.bf16.mxu0 %v10144_v27  ;;  %v747_v27 = vcombine.low %v702_v18, %v716_v12  ;;  %v773_v37 = vrot.slane %v746_v26, %v10548_v0 }
  0x2a   : > { %9459 = vmatpush3.bf16.msra.mxu1 %v10145_v28  ;;  %v748_v28 = vcombine.high %v702_v18, %v716_v12  ;;  %v759_v34 = vrot.slane %v745_v25, %v10548_v0  ;;  %v499_v43 = vor.u32 %v498_v32, %v494_v23  ;;  %v8993_v18 = vcombine.low %v600_v46, %v10528_v54 }
  0x2b   : > { %9460 = vmatprep.subr.bf16.mxu1 %v10147_v30  ;;  %v483_v30 = vrot.slane %v481_v19, 1  ;;  %v766_v36 = vrot.slane %v747_v27, %v10548_v0  ;;  %v876_v24 = vrot.slane %v8992_v17, %v10548_v0  ;;  %v932_v32 = vcombine.high %v10614_v7, %v10554_v2 }
  0x2c   : > { %9373 = vmatpush3.bf16.msra.mxu0 %v10146_v29  ;;  %v469_v29 = vor.u32 %v468_v21, %v464_v8  ;;  %v780_v40 = vrot.slane %v748_v28, %v10548_v0  ;;  %v9036_v47 = vcombine.high %v759_v34, %v773_v37  ;;  %v605_v8 = vrot.slane %v10554_v2, 1 }
  0x2d   : > { %9534 = vmatprep.subr.bf16.mxu0 %v10152_v45  ;;  %v484_v42 = vor.u32 %v483_v30, %v479_v16  ;;  %v9034_v45 = vcombine.low %v759_v34, %v773_v37  ;;  %v883_v25 = vrot.slane %v8993_v18, %v10548_v0  ;;  %v8996_v30 = vcombine.low %v10614_v7, %v10531_v55  ;;  %v10160_v37 = vld [vmem:[%s13972_s2 + $0x130] sm:$0xff]  }
  0x2e   : > { %9461 = vmatpush3.bf16.msra.mxu1 %v10151_v44  ;;  %v10591_v41 = vsel %vm447_vm1, %v469_v29, %v10579_v22  ;;  %v501_v44 = vshll.u32 %v10566_v6, 16  ;;  %v9038_v48 = vcombine.low %v766_v36, %v780_v40  ;;  %v9040_v50 = vcombine.high %v766_v36, %v780_v40 }
  0x2f   : > { %v10596_v51 = vsel %vm447_vm1, %v484_v42, %v10583_v31  ;;  %v3134_v57 = vrot.slane %v9034_v45, %v10548_v0  ;;  %v3148_v58 = vrot.slane %v9036_v47, %v10548_v0  ;;  %v10622_v15 = vsel %vm14073_vm0, %v605_v8, %v10618_v9  ;;  %v10181_v42 = vld [vmem:[%s13972_s2 + $0x1f8] sm:$0xff]  }
  0x30   : > { %v10598_v52 = vrot.slane %v501_v44, 1  ;;  %v3162_v59 = vrot.slane %v9038_v48, %v10548_v0  ;;  %v3176_v62 = vrot.slane %v9040_v50, %v10548_v0  ;;  %14075 = vst [vmem:[#allocation3_spill] sm:$0xff] %v10622_v15  ;;  %v8991_v16 = vcombine.low %v10531_v55, %v10596_v51  ;;  %v10182_v48 = vld [vmem:[%s13972_s2 + $0x1b8] sm:$0xff]   ;;  %9622 = vmatprep.subr.bf16.mxu1 %v10181_v42 }
  0x31   : > { %v3185_v10 = vcombine.high %v3134_v57, %v3148_v58  ;;  %v3184_v12 = vcombine.low %v3134_v57, %v3148_v58  ;;  %v8995_v26 = vcombine.low %v10504_v35, %v10591_v41  ;;  %v930_v33 = vcombine.high %v10512_v39, %v10591_v41  ;;  %v10159_v39 = vld [vmem:[%s13972_s2 + $0x170] sm:$0xff]   ;;  %v10173_v42 = vld [vmem:[%s13972_s2 + $0x158] sm:$0xff]  }
  0x32   : > { %v10610_v5 = vsel %vm447_vm1, %v499_v43, %v10598_v52  ;;  %v3189_v11 = vcombine.high %v3162_v59, %v3176_v62  ;;  %v3188_v14 = vcombine.low %v3162_v59, %v3176_v62  ;;  %v898_v29 = vcombine.low %v876_v24, %v883_v25 }
  0x33   : > { %v3212_v19 = vrot.slane %v3185_v10, %v10548_v0  ;;  %v3198_v21 = vrot.slane %v3184_v12, %v10548_v0  ;;  %v933_v35 = vcombine.low %v10596_v51, %v10622_v15  ;;  %v934_v34 = vcombine.high %v10596_v51, %v10622_v15  ;;  %v10165_v10 = vld [vmem:[%s13972_s2 + $0x168] sm:$0xff]  }
  0x34   : > { %v3240_v20 = vrot.slane %v3189_v11, %v10548_v0  ;;  %v3226_v23 = vrot.slane %v3188_v14, %v10548_v0  ;;  %v8997_v36 = vcombine.low %v10540_v61, %v10610_v5  ;;  %v936_v55 = vcombine.high %v10561_v4, %v10610_v5  ;;  %v10183_v11 = vld [vmem:[%s13972_s2 + $0x1f0] sm:$0xff]  }
  0x35   : > { %v475_v40 = vshrl.u32 %v10545_v63, 16  ;;  %v906_v43 = vrot.slane %v898_v29, %v10548_v0  ;;  %v943_v44 = vrot.slane %v8995_v26, %v10548_v0  ;;  %v950_v45 = vrot.slane %v930_v33, %v10548_v0 }
  0x36   : > { %v3252_v38 = vcombine.low %v3212_v19, %v3240_v20  ;;  %v3248_v46 = vcombine.low %v3198_v21, %v3226_v23  ;;  %v3253_v27 = vcombine.high %v3212_v19, %v3240_v20  ;;  %v3249_v28 = vcombine.high %v3198_v21, %v3226_v23  ;;  %v10185_v20 = vld [vmem:[%s13972_s2 + $0x1b0] sm:$0xff]  }
  0x37   : > { %v490_v47 = vshrl.u32 %v10558_v3, 16  ;;  %v957_v63 = vrot.slane %v8996_v30, %v10548_v0  ;;  %v964_v50 = vrot.slane %v932_v32, %v10548_v0  ;;  %v971_v53 = vrot.slane %v933_v35, %v10548_v0  ;;  %v344_v35 = vld [vmem:[%s10490_s17 + $0x34] sm:$0xf] }
  0x38   : > { %5792 = vmatprep.mubr.bf16.mxu0 %v3252_v38  ;;  %5920 = vmatprep.mubr.bf16.mxu1 %v3253_v27  ;;  %v978_v57 = vrot.slane %v934_v34, %v10548_v0  ;;  %v10677_v58 = vrot.slane %v8997_v36, %v10548_v0  ;;  %v10680_v59 = vrot.slane %v936_v55, %v10548_v0  ;;  %v10167_v27 = vld [vmem:[%s13972_s2 + $0x160] sm:$0xff]   ;;  %v10187_v34 = vld [vmem:[%s13972_s2 + $0x1e8] sm:$0xff]  }
  0x39   : > { %5793 = vmatmul.mubr.bf16.vlgmr.msra.gmra.mxu0 %v3248_v46  ;;  %5921 = vmatmul.mubr.bf16.vlgmr.msra.gmra.mxu1 %v3249_v28  ;;  %v10683_v62 = vor.u32 %v475_v40, %v10579_v22  ;;  %v688_v8 = vcombine.high %v10554_v2, %v10596_v51  ;;  %v993_v12 = vcombine.low %v943_v44, %v957_v63  ;;  %v10753_v40 = vld [vmem:[%s10490_s17 + $0x38] sm:$0x3] }
  0x3a   : > { %9535 = vmatpush3.bf16.msra.mxu0 %v10153_v13  ;;  %v994_v14 = vcombine.high %v943_v44, %v957_v63  ;;  %v995_v17 = vcombine.low %v950_v45, %v964_v50  ;;  %v996_v18 = vcombine.high %v950_v45, %v964_v50  ;;  %v997_v19 = vcombine.low %v971_v53, %v10677_v58  ;;  %v10728_v13 = vld [vmem:[%s10490_s17 + $0x30] sm:$0xf]  ;;  %v10189_v63 = vld [vmem:[%s13972_s2 + $0x1e0] sm:$0xff]  }
  0x3b   : > { %9536 = vmatprep.subr.bf16.mxu0 %v10159_v39  ;;  %v998_v22 = vcombine.high %v971_v53, %v10677_v58  ;;  %v999_v2 = vcombine.low %v978_v57, %v10680_v59  ;;  %v10697_v51 = vrot.slane %v8991_v16, %v10548_v0  ;;  %9623 = vmatpush3.bf16.msra.mxu1 %v10182_v48  ;;  %v10166_v16 = vld [vmem:[%s13972_s2 + $0x128] sm:$0xff]   ;;  %v10168_v39 = vld [vmem:[%s13972_s2 + $0x120] sm:$0xff]  }
  0x3c   : > { %v1007_v21 = vrot.slane %v993_v12, %v10548_v0  ;;  %v10704_v23 = vrot.slane %v995_v17, %v10548_v0  ;;  %v10707_v24 = vrot.slane %v994_v14, %v10548_v0  ;;  %v10710_v25 = vrot.slane %v996_v18, %v10548_v0  ;;  %9624 = vmatprep.subr.bf16.mxu1 %v10183_v11  ;;  %v10174_v17 = vld [vmem:[%s13972_s2 + $0x118] sm:$0xff]  }
  0x3d   : > { %v10716_v26 = vrot.slane %v997_v19, %v10548_v0  ;;  %v10719_v33 = vrot.slane %v999_v2, %v10548_v0  ;;  %v10722_v38 = vrot.slane %v998_v22, %v10548_v0  ;;  %v10725_v46 = vrot.slane %v688_v8, %v10548_v0 }
  0x3e   : > { %9537 = vmatpush3.bf16.msra.mxu0 %v10160_v37  ;;  %v9044_v28 = vcombine.low %v906_v43, %v1007_v21  ;;  %v1000_v29 = vcombine.high %v978_v57, %v10680_v59  ;;  %v8998_v30 = vcombine.low %v10528_v54, %v10683_v62  ;;  %v8999_v32 = vcombine.low %v10602_v56, %v10537_v60  ;;  %v10188_v43 = vld [vmem:[%s13972_s2 + $0x1a8] sm:$0xff]  }
  0x3f   : > { %9538 = vmatprep.subr.bf16.mxu0 %v10165_v10  ;;  %v1058_v36 = vcombine.high %v1007_v21, %v10716_v26  ;;  %v1060_v55 = vcombine.high %v10704_v23, %v10719_v33  ;;  %v1062_v54 = vcombine.high %v10707_v24, %v10722_v38  ;;  %v9001_v37 = vcombine.low %v10622_v15, %v10540_v61 }
  0x40   : > { %9625 = vmatpush3.bf16.msra.mxu1 %v10185_v20  ;;  %v3319_v44 = vrot.slane %v9044_v28, %v10548_v0  ;;  %v10763_v45 = vrot.slane %v1000_v29, %v10548_v0  ;;  %v1124_v48 = vrot.slane %v8998_v30, %v10548_v0  ;;  %v1131_v61 = vrot.slane %v8999_v32, %v10548_v0  ;;  %v10176_v20 = vld [vmem:[%s13972_s2 + $0x150] sm:$0xff]  }
  0x41   : > { %v9046_v50 = vcombine.low %v10707_v24, %v1058_v36  ;;  %v9048_v53 = vcombine.low %v1062_v54, %v10704_v23  ;;  %v9050_v57 = vcombine.low %v10710_v25, %v1060_v55  ;;  %v1178_v8 = vcombine.high %v10622_v15, %v10561_v4  ;;  %9626 = vmatprep.subr.bf16.mxu1 %v10187_v34 }
  0x42   : > { %9539 = vmatpush3.bf16.msra.mxu0 %v10166_v16  ;;  %v1064_v10 = vcombine.high %v10710_v25, %v10763_v45  ;;  %v1146_v11 = vcombine.low %v1124_v48, %v1131_v61  ;;  %v1189_v12 = vrot.slane %v9001_v37, %v10548_v0  ;;  %v10779_v14 = vcombine.low %v10728_v13, %v344_v35  ;;  %v10805_v37 = vld [vmem:[%s10490_s17 + $0x3c] sm:$0xf]  ;;  %v10809_v48 = vld [vmem:[%s10490_s17 + $0x44] sm:$0x3] }
  0x43   : > { %9540 = vmatprep.subr.bf16.mxu0 %v10167_v27  ;;  %v3333_v18 = vrot.slane %v9046_v50, %v10548_v0  ;;  %v3347_v19 = vrot.slane %v9048_v53, %v10548_v0  ;;  %v3361_v22 = vrot.slane %v9050_v57, %v10548_v0  ;;  %v1196_v2 = vrot.slane %v1178_v8, %v10548_v0  ;;  %v10177_v50 = vld [vmem:[%s13972_s2 + $0x110] sm:$0xff]  }
  0x44   : > { %9627 = vmatpush3.bf16.msra.mxu1 %v10188_v43  ;;  %v10792_v21 = vrot.slane %v1146_v11, %v10548_v0  ;;  %v1225_v16 = vcombine.low %v10697_v51, %v1189_v12  ;;  %v1226_v27 = vcombine.high %v10697_v51, %v1189_v12  ;;  %v10798_v28 = vcombine.low %v10753_v40, %v10753_v40  ;;  %v347_v43 = vld [vmem:[%s10490_s17 + $0x40] sm:$0xf]  ;;  %v10184_v11 = vld [vmem:[%s13972_s2 + $0x148] sm:$0xff]  }
  0x45   : > { %v3370_v29 = vcombine.high %v3319_v44, %v3333_v18  ;;  %v3374_v30 = vcombine.high %v3347_v19, %v3361_v22  ;;  %v3369_v32 = vcombine.low %v3319_v44, %v3333_v18  ;;  %v3373_v35 = vcombine.low %v3347_v19, %v3361_v22  ;;  %9628 = vmatprep.subr.bf16.mxu1 %v10189_v63 }
  0x46   : > { %14076 = vst [vmem:[#allocation4_spill] sm:$0xff] %v10792_v21  ;;  %9541 = vmatpush3.bf16.msra.mxu0 %v10168_v39  ;;  %v1227_v34 = vcombine.low %v10725_v46, %v1196_v2  ;;  %v1228_v36 = vcombine.high %v10725_v46, %v1196_v2  ;;  %v1239_v55 = vrot.slane %v1225_v16, %v10548_v0 }
  0x47   : > { %9542 = vmatprep.subr.bf16.mxu0 %v10173_v42  ;;  %v1253_v54 = vrot.slane %v1226_v27, %v10548_v0  ;;  %v3397_v39 = vrot.slane %v3370_v29, %v10548_v0  ;;  %v3425_v44 = vrot.slane %v3374_v30, %v10548_v0  ;;  %v3383_v42 = vrot.slane %v3369_v32, %v10548_v0 }
  0x48   : > { %v3411_v61 = vrot.slane %v3373_v35, %v10548_v0  ;;  %v10819_v53 = vrot.slane %v1227_v34, %v10548_v0  ;;  %v10822_v57 = vrot.slane %v1228_v36, %v10548_v0  ;;  %v9052_v63 = vcombine.low %v1064_v10, %v10792_v21 }
  0x49   : > { %v9054_v8 = vcombine.low %v1239_v55, %v1253_v54  ;;  %v3437_v12 = vcombine.low %v3397_v39, %v3425_v44  ;;  %v3438_v19 = vcombine.high %v3397_v39, %v3425_v44  ;;  %v9056_v2 = vcombine.high %v1239_v55, %v1253_v54 }
  0x4a   : > { %9543 = vmatpush3.bf16.msra.mxu0 %v10174_v17  ;;  %v3433_v18 = vcombine.low %v3383_v42, %v3411_v61  ;;  %v3434_v22 = vcombine.high %v3383_v42, %v3411_v61  ;;  %v9058_v16 = vcombine.low %v10819_v53, %v10822_v57  ;;  %v3504_v27 = vrot.slane %v9052_v63, %v10548_v0 }
  0x4b   : > { %9544 = vmatprep.subr.bf16.mxu0 %v10176_v20  ;;  %v3518_v29 = vrot.slane %v9054_v8, %v10548_v0  ;;  %5800 = vmatprep.mubr.bf16.mxu0 %v3437_v12  ;;  %v10833_v10 = vcombine.low %v10805_v37, %v347_v43  ;;  %v10837_v17 = vcombine.low %v10809_v48, %v10809_v48  ;;  %v509_v30 = vshrl.u32 %v10779_v14, 16 }
  0x4c   : > { %5928 = vmatprep.mubr.bf16.mxu1 %v3438_v19  ;;  %v10842_v20 = vor.u32 %v490_v47, %v10583_v31  ;;  %5801 = vmatmul.mubr.bf16.gmra.mxu0 %v3433_v18  ;;  %v3532_v32 = vrot.slane %v9056_v2, %v10548_v0  ;;  %v3546_v35 = vrot.slane %v9058_v16, %v10548_v0  ;;  %v511_v36 = vshll.u32 %v10779_v14, 16  ;;  %v10186_v31 = vld [vmem:[%s13972_s2 + $0x108] sm:$0xff]  }
  0x4d   : > { %5929 = vmatmul.mubr.bf16.gmra.mxu1 %v3434_v22  ;;  %v3555_v34 = vcombine.high %v3504_v27, %v3518_v29  ;;  %v3554_v55 = vcombine.low %v3504_v27, %v3518_v29  ;;  %v516_v54 = vshll.u32 %v10798_v28, 16  ;;  %v524_v43 = vshrl.u32 %v10833_v10, 16 }
  0x4e   : > { %v526_v3 = vshll.u32 %v10833_v10, 16  ;;  %9545 = vmatpush3.bf16.msra.mxu0 %v10177_v50  ;;  %v3559_v47 = vcombine.high %v3532_v32, %v3546_v35  ;;  %v3558_v44 = vcombine.low %v3532_v32, %v3546_v35  ;;  %v513_v42 = vrot.slane %v511_v36, 1  ;;  %v10194_v50 = vld [vmem:[%s13972_s2 + $0x1a0] sm:$0xff]  }
  0x4f   : > { %v3582_v39 = vrot.slane %v3555_v34, %v10548_v0  ;;  %9546 = vmatprep.subr.bf16.mxu0 %v10184_v11  ;;  %v3568_v61 = vrot.slane %v3554_v55, %v10548_v0  ;;  %v10856_v63 = vrot.slane %v516_v54, 1  ;;  %v531_v12 = vshll.u32 %v10837_v17, 16  ;;  %9629 = vmatpush3.bf16.msra.mxu1 %v10194_v50 }
  0x50   : > { %v528_v8 = vrot.slane %v526_v3, 1  ;;  %v3610_v18 = vrot.slane %v3559_v47, %v10548_v0  ;;  %v3596_v19 = vrot.slane %v3558_v44, %v10548_v0  ;;  %v514_v22 = vor.u32 %v513_v42, %v509_v30  ;;  %v10195_v30 = vld [vmem:[%s13972_s2 + $0x1d8] sm:$0xff]   ;;  %v10196_v3 = vld [vmem:[%s13972_s2 + $0x140] sm:$0xff]  }
  0x51   : > { %v608_v2 = vrot.slane %v10561_v4, 1  ;;  %v10865_v11 = vrot.slane %v531_v12, 1  ;;  %v10868_v27 = vrot.slane %v10566_v6, 1  ;;  %v611_v29 = vrot.slane %v10779_v14, 1  ;;  %9630 = vmatprep.subr.bf16.mxu1 %v10195_v30 }
  0x52   : > { %v529_v16 = vor.u32 %v528_v8, %v524_v43  ;;  %9547 = vmatpush3.bf16.msra.mxu0 %v10186_v31  ;;  %v3622_v32 = vcombine.low %v3582_v39, %v3610_v18  ;;  %v3618_v35 = vcombine.low %v3568_v61, %v3596_v19  ;;  %v3623_v34 = vcombine.high %v3582_v39, %v3610_v18  ;;  %v10197_v31 = vld [vmem:[%s13972_s2 + $0x198] sm:$0xff]  }
  0x53   : > { %v3619_v36 = vcombine.high %v3568_v61, %v3596_v19  ;;  %v10876_v4 = vsel %vm447_vm1, %v514_v22, %v10856_v63  ;;  %v10884_v54 = vsel %vm14073_vm0, %v608_v2, %v10868_v27  ;;  %v10887_v43 = vrot.slane %v10798_v28, 1  ;;  %v10198_v61 = vld [vmem:[%s13972_s2 + $0x100] sm:$0xff]   ;;  %v10200_v2 = vld [vmem:[%s13972_s2 + $0x190] sm:$0xff]   ;;  %9548 = vmatprep.subr.bf16.mxu0 %v10196_v3  ;;  %9631 = vmatpush3.bf16.msra.mxu1 %v10197_v31  ;;  %v350_v31 = vld [vmem:[%s10490_s17 + $0x4c] sm:$0xf] }
  0x54   : > { %v10880_v55 = vsel %vm447_vm1, %v529_v16, %v10865_v11  ;;  %5808 = vmatprep.mubr.bf16.mxu0 %v3622_v32  ;;  %5936 = vmatprep.mubr.bf16.mxu1 %v3623_v34  ;;  %v8994_v47 = vcombine.low %v10537_v60, %v10842_v20  ;;  %v9002_v39 = vcombine.low %v10728_v13, %v10876_v4  ;;  %v505_v42 = vshrl.u32 %v10566_v6, 16  ;;  %v10199_v6 = vld [vmem:[%s13972_s2 + $0x1d0] sm:$0xff]  }
  0x55   : > { %14077 = vst [vmem:[#allocation5_spill] sm:$0xff] %v10880_v55  ;;  %v9003_v44 = vcombine.low %v10618_v9, %v10551_v1  ;;  %5809 = vmatmul.mubr.bf16.gmra.mxu0 %v3618_v35  ;;  %5937 = vmatmul.mubr.bf16.gmra.mxu1 %v3619_v36  ;;  %v10907_v8 = vsel %vm14073_vm0, %v611_v29, %v10887_v43 }
  0x56   : > { %14078 = vst [vmem:[#allocation6_spill] sm:$0xff] %v10907_v8  ;;  %v9005_v60 = vcombine.low %v10884_v54, %v10728_v13  ;;  %v1402_v12 = vcombine.high %v10884_v54, %v10779_v14  ;;  %v10918_v18 = vrot.slane %v8994_v47, %v10548_v0  ;;  %v1403_v22 = vcombine.low %v10876_v4, %v10907_v8 }
  0x57   : > { %v1355_v19 = vrot.slane %v9003_v44, %v10548_v0  ;;  %v9006_v13 = vcombine.low %v10805_v37, %v10880_v55  ;;  %v9061_v32 = vcombine.high %v10819_v53, %v10822_v57  ;;  %v10933_v35 = vor.u32 %v505_v42, %v10598_v52  ;;  %9549 = vmatpush3.bf16.msra.mxu0 %v10198_v61  ;;  %v10202_v61 = vld [vmem:[%s13972_s2 + $0x188] sm:$0xff]  }
  0x58   : > { %v1413_v16 = vrot.slane %v9005_v60, %v10548_v0  ;;  %v1420_v29 = vrot.slane %v1402_v12, %v10548_v0  ;;  %v1427_v36 = vrot.slane %v1403_v22, %v10548_v0  ;;  %v10941_v47 = vrot.slane %v9002_v39, %v10548_v0  ;;  %v10953_v12 = vld [vmem:[%s10490_s17 + $0x48] sm:$0xf]  ;;  %9632 = vmatprep.subr.bf16.mxu1 %v10199_v6  ;;  %v10203_v6 = vld [vmem:[%s13972_s2 + $0x1c0] sm:$0xff]  }
  0x59   : > { %14079 = vst [vmem:[#allocation7_spill] sm:$0xff] %v10933_v35  ;;  %v1370_v34 = vcombine.low %v10918_v18, %v1355_v19  ;;  %v10938_v30 = vrot.slane %v9006_v13, %v10548_v0  ;;  %v3689_v57 = vrot.slane %v9061_v32, %v10548_v0  ;;  %v9000_v39 = vcombine.low %v10551_v1, %v10933_v35 }
  0x5a   : > { %14080 = vst [vmem:[#allocation8_spill] sm:$0xff] %v10941_v47  ;;  %v1449_v44 = vcombine.low %v10677_v58, %v1413_v16  ;;  %v1450_v53 = vcombine.high %v10677_v58, %v1413_v16  ;;  %v1451_v52 = vcombine.low %v10680_v59, %v1420_v29  ;;  %v10201_v58 = vld [vmem:[%s13972_s2 + $0x1c8] sm:$0xff]   ;;  %v1404_v1 = vcombine.high %v10876_v4, %v10907_v8  ;;  %v10205_v16 = vld [vmem:[%s13972_s2 + $0x238] sm:$0xff]  }
  0x5b   : > { %v1378_v3 = vrot.slane %v1370_v34, %v10548_v0  ;;  %v1453_v42 = vcombine.low %v1427_v36, %v10938_v30  ;;  %v1454_v60 = vcombine.high %v1427_v36, %v10938_v30  ;;  %v10984_v36 = vrot.slane %v9000_v39, %v10548_v0  ;;  %9633 = vmatpush3.bf16.msra.mxu1 %v10200_v2 }
  0x5c   : > { %v1463_v19 = vrot.slane %v1449_v44, %v10548_v0  ;;  %v10964_v22 = vrot.slane %v1451_v52, %v10548_v0  ;;  %v10967_v13 = vrot.slane %v1450_v53, %v10548_v0  ;;  %v1406_v44 = vcombine.high %v10833_v10, %v10880_v55  ;;  %9634 = vmatprep.subr.bf16.mxu1 %v10201_v58 }
  0x5d   : > { %v10978_v32 = vrot.slane %v1453_v42, %v10548_v0  ;;  %v10981_v34 = vrot.slane %v1454_v60, %v10548_v0  ;;  %14085 = vst [vmem:[#allocation13_spill] sm:$0xff] %v10984_v36  ;;  %v1434_v52 = vrot.slane %v1404_v1, %v10548_v0  ;;  %v1452_v50 = vcombine.high %v10680_v59, %v1420_v29  ;;  %v10204_v59 = vld [vmem:[%s13972_s2 + $0x180] sm:$0xff]  }
  0x5e   : > { %14081 = vst [vmem:[#allocation9_spill] sm:$0xff] %v10964_v22  ;;  %14082 = vst [vmem:[#allocation10_spill] sm:$0xff] %v10967_v13  ;;  %v9063_v53 = vcombine.low %v1378_v3, %v1463_v19  ;;  %v9007_v49 = vcombine.low %v10868_v27, %v10753_v40  ;;  %v10996_v39 = vrot.slane %v1406_v44, %v10548_v0  ;;  %10002 = vmatprep.subr.bf16.mxu0 %v10205_v16  ;;  %v11016_v16 = vld [vmem:[%s10490_s17 + $0x50] sm:$0x3] }
  0x5f   : > { %14083 = vst [vmem:[#allocation11_spill] sm:$0xff] %v10978_v32  ;;  %14084 = vst [vmem:[#allocation12_spill] sm:$0xff] %v10981_v34  ;;  %v1514_v42 = vcombine.high %v1463_v19, %v10978_v32  ;;  %v1518_v60 = vcombine.high %v10967_v13, %v10981_v34  ;;  %v9009_v2 = vcombine.low %v10907_v8, %v10805_v37  ;;  %9635 = vmatpush3.bf16.msra.mxu1 %v10202_v61 }
  0x60   : > { %v3703_v29 = vrot.slane %v9063_v53, %v10548_v0  ;;  %v11005_v3 = vrot.slane %v1452_v50, %v10548_v0  ;;  %v1579_v58 = vrot.slane %v9007_v49, %v10548_v0  ;;  %v11009_v19 = vcombine.low %v10953_v12, %v350_v31  ;;  %v11019_v53 = vld [vmem:[%s10490_s17 + $0x54] sm:$0xf]  ;;  %v353_v50 = vld [vmem:[%s10490_s17 + $0x58] sm:$0xf]  ;;  %9636 = vmatprep.subr.bf16.mxu1 %v10203_v6 }
  0x61   : > { %v9065_v1 = vcombine.low %v10967_v13, %v1514_v42  ;;  %v9067_v44 = vcombine.low %v1518_v60, %v10964_v22  ;;  %v1455_v37 = vcombine.low %v1434_v52, %v10996_v39  ;;  %v1456_v15 = vcombine.high %v1434_v52, %v10996_v39  ;;  %v11033_v13 = vld [vmem:[%s10490_s17 + $0x5c] sm:$0x3] }
  0x62   : > { %14086 = vst [vmem:[#allocation14_spill] sm:$0xff] %v11005_v3  ;;  %v3740_v55 = vcombine.high %v3689_v57, %v3703_v29  ;;  %v3739_v49 = vcombine.low %v3689_v57, %v3703_v29  ;;  %v1594_v31 = vcombine.low %v10984_v36, %v1579_v58  ;;  %v1637_v32 = vrot.slane %v9009_v2, %v10548_v0 }
  0x63   : > { %v3717_v42 = vrot.slane %v9065_v1, %v10548_v0  ;;  %v3731_v60 = vrot.slane %v9067_v44, %v10548_v0  ;;  %v11027_v21 = vrot.slane %v1455_v37, %v10548_v0  ;;  %v11030_v52 = vrot.slane %v1456_v15, %v10548_v0  ;;  %9637 = vmatpush3.bf16.msra.mxu1 %v10204_v59 }
  0x64   : > { %v3767_v61 = vrot.slane %v3740_v55, %v10548_v0  ;;  %v3753_v57 = vrot.slane %v3739_v49, %v10548_v0  ;;  %v11038_v29 = vrot.slane %v1594_v31, %v10548_v0  ;;  %v1673_v6 = vcombine.low %v10941_v47, %v1637_v32 }
  0x65   : > { %14087 = vst [vmem:[#allocation15_spill] sm:$0xff] %v11027_v21  ;;  %14088 = vst [vmem:[#allocation16_spill] sm:$0xff] %v11030_v52  ;;  %v3744_v2 = vcombine.high %v3717_v42, %v3731_v60  ;;  %v3743_v58 = vcombine.low %v3717_v42, %v3731_v60  ;;  %v1516_v1 = vcombine.high %v10964_v22, %v11027_v21 }
  0x66   : > { %14089 = vst [vmem:[#allocation17_spill] sm:$0xff] %v11038_v29  ;;  %v1520_v15 = vcombine.high %v11005_v3, %v11030_v52  ;;  %v1674_v44 = vcombine.high %v10941_v47, %v1637_v32  ;;  %v1687_v55 = vrot.slane %v1673_v6, %v10548_v0  ;;  %v11049_v37 = vcombine.low %v11016_v16, %v11016_v16 }
  0x67   : > { %v11052_v49 = vcombine.low %v11019_v53, %v353_v50  ;;  %v3795_v31 = vrot.slane %v3744_v2, %v10548_v0  ;;  %v3781_v42 = vrot.slane %v3743_v58, %v10548_v0  ;;  %v9070_v60 = vcombine.low %v11005_v3, %v1516_v1 }
  0x68   : > { %v9072_v52 = vcombine.low %v1520_v15, %v11038_v29  ;;  %v1701_v59 = vrot.slane %v1674_v44, %v10548_v0  ;;  %v11061_v32 = vcombine.low %v11033_v13, %v11033_v13  ;;  %v14090_v6 = vshrl.u32 %v10798_v28, 16 }
  0x69   : > { %v539_v50 = vshrl.u32 %v11009_v19, 16  ;;  %v3807_v2 = vcombine.low %v3767_v61, %v3795_v31  ;;  %v3803_v36 = vcombine.low %v3753_v57, %v3781_v42  ;;  %v3808_v58 = vcombine.high %v3767_v61, %v3795_v31 }
  0x6a   : > { %v11066_v47 = vor.u32 %v14090_v6, %v10856_v63  ;;  %v3804_v34 = vcombine.high %v3753_v57, %v3781_v42  ;;  %v9074_v1 = vcombine.low %v1687_v55, %v1701_v59  ;;  %v9076_v3 = vcombine.high %v1687_v55, %v1701_v59 }
  0x6b   : > { %v3874_v15 = vrot.slane %v9070_v60, %v10548_v0  ;;  %v3888_v44 = vrot.slane %v9072_v52, %v10548_v0  ;;  %5816 = vmatprep.mubr.bf16.mxu0 %v3807_v2  ;;  %5944 = vmatprep.mubr.bf16.mxu1 %v3808_v58  ;;  %v541_v29 = vshll.u32 %v11009_v19, 16  ;;  %v546_v28 = vshll.u32 %v11049_v37, 16 }
  0x6c   : > { %v554_v63 = vshrl.u32 %v11052_v49, 16  ;;  %v556_v6 = vshll.u32 %v11052_v49, 16  ;;  %5817 = vmatmul.mubr.bf16.gmra.mxu0 %v3803_v36  ;;  %5945 = vmatmul.mubr.bf16.gmra.mxu1 %v3804_v34  ;;  %v3902_v61 = vrot.slane %v9074_v1, %v10548_v0  ;;  %v3916_v57 = vrot.slane %v9076_v3, %v10548_v0 }
  0x6d   : > { %v3925_v55 = vcombine.high %v3874_v15, %v3888_v44  ;;  %v561_v31 = vshll.u32 %v11061_v32, 16  ;;  %v3924_v52 = vcombine.low %v3874_v15, %v3888_v44  ;;  %v543_v42 = vrot.slane %v541_v29, 1 }
  0x6e   : > { %v11078_v60 = vrot.slane %v546_v28, 1  ;;  %v558_v59 = vrot.slane %v556_v6, 1  ;;  %v3929_v2 = vcombine.high %v3902_v61, %v3916_v57  ;;  %v3928_v22 = vcombine.low %v3902_v61, %v3916_v57 }
  0x6f   : > { %v3952_v58 = vrot.slane %v3925_v55, %v10548_v0  ;;  %v11081_v21 = vrot.slane %v561_v31, 1  ;;  %v3938_v34 = vrot.slane %v3924_v52, %v10548_v0  ;;  %v544_v36 = vor.u32 %v543_v42, %v539_v50 }
  0x70   : > { %v559_v1 = vor.u32 %v558_v59, %v554_v63  ;;  %v614_v3 = vrot.slane %v10833_v10, 1  ;;  %v3980_v35 = vrot.slane %v3929_v2, %v10548_v0  ;;  %v3966_v15 = vrot.slane %v3928_v22, %v10548_v0 }
  0x71   : > { %v11088_v29 = vrot.slane %v10837_v17, 1  ;;  %v617_v44 = vrot.slane %v11009_v19, 1  ;;  %v11093_v28 = vsel %vm447_vm1, %v544_v36, %v11078_v60  ;;  %v11100_v50 = vrot.slane %v11049_v37, 1 }
  0x72   : > { %v11097_v6 = vsel %vm447_vm1, %v559_v1, %v11081_v21  ;;  %v1182_v63 = vcombine.high %v10779_v14, %v10876_v4  ;;  %v3992_v22 = vcombine.low %v3952_v58, %v3980_v35  ;;  %v3988_v61 = vcombine.low %v3938_v34, %v3966_v15 }
  0x73   : > { %14091 = vst [vmem:[#allocation18_spill] sm:$0xff] %v11088_v29  ;;  %14092 = vst [vmem:[#allocation19_spill] sm:$0xff] %v11097_v6  ;;  %v3993_v57 = vcombine.high %v3952_v58, %v3980_v35  ;;  %v3989_v55 = vcombine.high %v3938_v34, %v3966_v15  ;;  %v11106_v31 = vsel %vm14073_vm0, %v614_v3, %v11088_v29  ;;  %v535_v2 = vshrl.u32 %v10837_v17, 16 }
  0x74   : > { %14093 = vst [vmem:[#allocation20_spill] sm:$0xff] %v11100_v50  ;;  %v11110_v52 = vsel %vm14073_vm0, %v617_v44, %v11100_v50  ;;  %v11113_v42 = vrot.slane %v1182_v63, %v10548_v0  ;;  %v9004_v59 = vcombine.low %v10753_v40, %v11066_v47  ;;  %5824 = vmatprep.mubr.bf16.mxu0 %v3992_v22 }
  0x75   : > { %14094 = vst [vmem:[#allocation21_spill] sm:$0xff] %v11110_v52  ;;  %5952 = vmatprep.mubr.bf16.mxu1 %v3993_v57  ;;  %v1626_v14 = vcombine.high %v10907_v8, %v10833_v10  ;;  %v9010_v4 = vcombine.low %v10953_v12, %v11093_v28  ;;  %v9011_v35 = vcombine.low %v10887_v43, %v10809_v48 }
  0x76   : > { %5825 = vmatmul.mubr.bf16.gmra.mxu0 %v3988_v61  ;;  %5953 = vmatmul.mubr.bf16.gmra.mxu1 %v3989_v55  ;;  %v11125_v58 = vrot.slane %v9004_v59, %v10548_v0  ;;  %v9013_v40 = vcombine.low %v11106_v31, %v10953_v12  ;;  %v1851_v34 = vcombine.low %v11093_v28, %v11110_v52 }
  0x77   : > { %v1644_v36 = vrot.slane %v1626_v14, %v10548_v0  ;;  %v1803_v1 = vrot.slane %v9011_v35, %v10548_v0  ;;  %v9014_v17 = vcombine.low %v11019_v53, %v11097_v6  ;;  %v11137_v3 = vor.u32 %v535_v2, %v10865_v11 }
  0x78   : > { %v1861_v15 = vrot.slane %v9013_v40, %v10548_v0  ;;  %v1875_v44 = vrot.slane %v1851_v34, %v10548_v0  ;;  %v11142_v12 = vrot.slane %v9010_v4, %v10548_v0  ;;  %v1850_v63 = vcombine.high %v11106_v31, %v11009_v19 }
  0x79   : > { %14095 = vst [vmem:[#allocation22_spill] sm:$0xff] %v11137_v3  ;;  %v1675_v22 = vcombine.low %v11113_v42, %v1644_v36  ;;  %v1676_v61 = vcombine.high %v11113_v42, %v1644_v36  ;;  %v1818_v57 = vcombine.low %v11125_v58, %v1803_v1  ;;  %v11150_v55 = vrot.slane %v9014_v17, %v10548_v0 }
  0x7a   : > { %14096 = vst [vmem:[#allocation23_spill] sm:$0xff] %v11142_v12  ;;  %v1897_v11 = vcombine.low %v10938_v30, %v1861_v15  ;;  %v1898_v59 = vcombine.high %v10938_v30, %v1861_v15  ;;  %v9008_v14 = vcombine.low %v10809_v48, %v11137_v3  ;;  %v1852_v4 = vcombine.high %v11093_v28, %v11110_v52 }
  0x7b   : > { %v1694_v35 = vrot.slane %v1675_v22, %v10548_v0  ;;  %v1708_v2 = vrot.slane %v1676_v61, %v10548_v0  ;;  %v1826_v40 = vrot.slane %v1818_v57, %v10548_v0  ;;  %v1901_v34 = vcombine.low %v1875_v44, %v11150_v55 }
  0x7c   : > { %v1911_v36 = vrot.slane %v1897_v11, %v10548_v0  ;;  %v11164_v1 = vrot.slane %v1898_v59, %v10548_v0  ;;  %v11167_v30 = vrot.slane %v9008_v14, %v10548_v0  ;;  %v1854_v48 = vcombine.high %v11052_v49, %v11097_v6 }
  0x7d   : > { %v11172_v17 = vrot.slane %v1901_v34, %v10548_v0  ;;  %v9079_v15 = vcombine.low %v1694_v35, %v1708_v2  ;;  %v9081_v22 = vcombine.high %v1694_v35, %v1708_v2  ;;  %v1868_v61 = vrot.slane %v1850_v63, %v10548_v0 }
  0x7e   : > { %14097 = vst [vmem:[#allocation24_spill] sm:$0xff] %v11164_v1  ;;  %14098 = vst [vmem:[#allocation25_spill] sm:$0xff] %v11167_v30  ;;  %v9083_v57 = vcombine.low %v1826_v40, %v1911_v36  ;;  %v1882_v11 = vrot.slane %v1852_v4, %v10548_v0  ;;  %v11177_v59 = vrot.slane %v1854_v48, %v10548_v0  ;;  %v11189_v40 = vld [vmem:[%s10490_s17 + $0x60] sm:$0xf]  ;;  %v356_v48 = vld [vmem:[%s10490_s17 + $0x64] sm:$0xf] }
  0x7f   : > { %14099 = vst [vmem:[#allocation26_spill] sm:$0xff] %v11172_v17  ;;  %v1902_v14 = vcombine.high %v1875_v44, %v11150_v55  ;;  %v1962_v10 = vcombine.high %v1911_v36, %v11172_v17  ;;  %v4059_v8 = vrot.slane %v9079_v15, %v10548_v0  ;;  %v4073_v34 = vrot.slane %v9081_v22, %v10548_v0 }
  0x80   : > { %v1899_v6 = vcombine.low %v10996_v39, %v1868_v61  ;;  %v4087_v35 = vrot.slane %v9083_v57, %v10548_v0  ;;  %v1900_v63 = vcombine.high %v10996_v39, %v1868_v61  ;;  %v1903_v2 = vcombine.low %v1882_v11, %v11177_v59 }
  0x81   : > { %v1904_v4 = vcombine.high %v1882_v11, %v11177_v59  ;;  %v9085_v44 = vcombine.low %v11164_v1, %v1962_v10  ;;  %v4110_v36 = vcombine.high %v4059_v8, %v4073_v34  ;;  %v4109_v17 = vcombine.low %v4059_v8, %v4073_v34 }
  0x82   : > { %v11194_v15 = vrot.slane %v1899_v6, %v10548_v0  ;;  %v11197_v22 = vrot.slane %v1900_v63, %v10548_v0  ;;  %v11200_v57 = vrot.slane %v1903_v2, %v10548_v0  ;;  %v11203_v39 = vrot.slane %v1902_v14, %v10548_v0 }
  0x83   : > { %v11206_v61 = vrot.slane %v1904_v4, %v10548_v0  ;;  %v4101_v11 = vrot.slane %v9085_v44, %v10548_v0  ;;  %v4137_v10 = vrot.slane %v4110_v36, %v10548_v0  ;;  %v4123_v8 = vrot.slane %v4109_v17, %v10548_v0 }
  0x84   : > { %14100 = vst [vmem:[#allocation27_spill] sm:$0xff] %v11194_v15  ;;  %14101 = vst [vmem:[#allocation28_spill] sm:$0xff] %v11197_v22  ;;  %v9015_v6 = vcombine.low %v11088_v29, %v11016_v16  ;;  %v1964_v34 = vcombine.high %v11194_v15, %v11200_v57  ;;  %v1966_v63 = vcombine.high %v11164_v1, %v11203_v39  ;;  %v14105_v1 = vshrl.u32 %v11049_v37, 16 }
  0x85   : > { %14102 = vst [vmem:[#allocation29_spill] sm:$0xff] %v11200_v57  ;;  %14103 = vst [vmem:[#allocation30_spill] sm:$0xff] %v11203_v39  ;;  %v1968_v14 = vcombine.high %v11197_v22, %v11206_v61  ;;  %v9017_v2 = vcombine.low %v11110_v52, %v11019_v53  ;;  %v4114_v4 = vcombine.high %v4087_v35, %v4101_v11 }
  0x86   : > { %14104 = vst [vmem:[#allocation31_spill] sm:$0xff] %v11206_v61  ;;  %v4113_v44 = vcombine.low %v4087_v35, %v4101_v11  ;;  %v2027_v36 = vrot.slane %v9015_v6, %v10548_v0  ;;  %v11223_v17 = vcombine.low %v11189_v40, %v356_v48  ;;  %v9088_v57 = vcombine.low %v1966_v63, %v11194_v15 }
  0x87   : > { %v2085_v3 = vrot.slane %v9017_v2, %v10548_v0  ;;  %v9090_v29 = vcombine.low %v11197_v22, %v1964_v34  ;;  %v11231_v61 = vor.u32 %v14105_v1, %v11078_v60  ;;  %v4165_v53 = vrot.slane %v4114_v4, %v10548_v0 }
  0x88   : > { %v4151_v35 = vrot.slane %v4113_v44, %v10548_v0  ;;  %v2042_v11 = vcombine.low %v11167_v30, %v2027_v36  ;;  %v620_v48 = vrot.slane %v11052_v49, 1  ;;  %v4244_v63 = vrot.slane %v9088_v57, %v10548_v0 }
  0x89   : > { %14106 = vst [vmem:[#allocation32_spill] sm:$0xff] %v11231_v61  ;;  %v2121_v6 = vcombine.low %v11142_v12, %v2085_v3  ;;  %v2122_v2 = vcombine.high %v11142_v12, %v2085_v3  ;;  %v4258_v34 = vrot.slane %v9090_v29, %v10548_v0  ;;  %v4177_v22 = vcombine.low %v4137_v10, %v4165_v53 }
  0x8a   : > { %v4173_v37 = vcombine.low %v4123_v8, %v4151_v35  ;;  %v4178_v60 = vcombine.high %v4137_v10, %v4165_v53  ;;  %v4174_v1 = vcombine.high %v4123_v8, %v4151_v35  ;;  %v11242_v4 = vrot.slane %v2042_v11, %v10548_v0  ;;  %v11255_v35 = vld [vmem:[%s10490_s17 + $0x68] sm:$0x3] }
  0x8b   : > { %v2135_v44 = vrot.slane %v2121_v6, %v10548_v0  ;;  %v2149_v36 = vrot.slane %v2122_v2, %v10548_v0  ;;  %v4295_v15 = vcombine.high %v4244_v63, %v4258_v34  ;;  %5832 = vmatprep.mubr.bf16.mxu0 %v4177_v22  ;;  %v4294_v3 = vcombine.low %v4244_v63, %v4258_v34  ;;  %v11275_v34 = vld [vmem:[%s10490_s17 + $0x6c] sm:$0xf] }
  0x8c   : > { %14107 = vst [vmem:[#allocation33_spill] sm:$0xff] %v11242_v4  ;;  %5960 = vmatprep.mubr.bf16.mxu1 %v4178_v60  ;;  %v11247_v57 = vrot.slane %v11061_v32, 1  ;;  %v1630_v10 = vcombine.high %v11009_v19, %v11093_v28  ;;  %5833 = vmatmul.mubr.bf16.gmra.mxu0 %v4173_v37  ;;  %v9092_v8 = vcombine.low %v1968_v14, %v11242_v4  ;;  %v565_v11 = vshrl.u32 %v11061_v32, 16  ;;  %v11279_v37 = vld [vmem:[%s10490_s17 + $0x74] sm:$0x3] }
  0x8d   : > { %5961 = vmatmul.mubr.bf16.gmra.mxu1 %v4174_v1  ;;  %v9094_v53 = vcombine.low %v2135_v44, %v2149_v36  ;;  %v4322_v22 = vrot.slane %v4295_v15, %v10548_v0  ;;  %v4308_v6 = vrot.slane %v4294_v3, %v10548_v0  ;;  %v9012_v28 = vcombine.low %v11016_v16, %v11231_v61 }
  0x8e   : > { %14108 = vst [vmem:[#allocation34_spill] sm:$0xff] %v11247_v57  ;;  %v11261_v2 = vsel %vm14073_vm0, %v620_v48, %v11247_v57  ;;  %v11264_v19 = vrot.slane %v1630_v10, %v10548_v0  ;;  %v4272_v14 = vrot.slane %v9092_v8, %v10548_v0  ;;  %v2074_v63 = vcombine.high %v11110_v52, %v11052_v49  ;;  %v359_v48 = vld [vmem:[%s10490_s17 + $0x70] sm:$0xf] }
  0x8f   : > { %v4286_v15 = vrot.slane %v9094_v53, %v10548_v0  ;;  %v9019_v32 = vcombine.low %v11100_v50, %v11033_v13  ;;  %v11282_v60 = vrot.slane %v9012_v28, %v10548_v0  ;;  %v9021_v16 = vcombine.low %v11261_v2, %v11189_v40 }
  0x90   : > { %14109 = vst [vmem:[#allocation35_spill] sm:$0xff] %v11264_v19  ;;  %v9096_v1 = vcombine.high %v2135_v44, %v2149_v36  ;;  %v11288_v3 = vcombine.low %v11255_v35, %v11255_v35  ;;  %v2092_v8 = vrot.slane %v2074_v63, %v10548_v0  ;;  %v11297_v52 = vcombine.low %v11275_v34, %v359_v48 }
  0x91   : > { %14110 = vst [vmem:[#allocation36_spill] sm:$0xff] %v11282_v60  ;;  %v4299_v49 = vcombine.high %v4272_v14, %v4286_v15  ;;  %v4298_v10 = vcombine.low %v4272_v14, %v4286_v15  ;;  %v2251_v53 = vrot.slane %v9019_v32, %v10548_v0  ;;  %v11293_v29 = vrot.slane %v9021_v16, %v10548_v0 }
  0x92   : > { %v4429_v28 = vrot.slane %v9096_v1, %v10548_v0  ;;  %v11301_v44 = vcombine.low %v11279_v37, %v11279_v37  ;;  %v2123_v15 = vcombine.low %v11264_v19, %v2092_v8  ;;  %v2124_v63 = vcombine.high %v11264_v19, %v2092_v8 }
  0x93   : > { %v4350_v36 = vrot.slane %v4299_v49, %v10548_v0  ;;  %v4336_v14 = vrot.slane %v4298_v10, %v10548_v0  ;;  %v2266_v32 = vcombine.low %v11282_v60, %v2251_v53  ;;  %v2345_v16 = vcombine.low %v11150_v55, %v11293_v29 }
  0x94   : > { %v11311_v48 = vor.u32 %v565_v11, %v11081_v21  ;;  %v569_v1 = vshrl.u32 %v11223_v17, 16  ;;  %v2142_v10 = vrot.slane %v2123_v15, %v10548_v0  ;;  %v2156_v12 = vrot.slane %v2124_v63, %v10548_v0 }
  0x95   : > { %v4362_v4 = vcombine.low %v4322_v22, %v4350_v36  ;;  %v4358_v61 = vcombine.low %v4308_v6, %v4336_v14  ;;  %v4363_v50 = vcombine.high %v4322_v22, %v4350_v36  ;;  %v4359_v49 = vcombine.high %v4308_v6, %v4336_v14 }
  0x96   : > { %14111 = vst [vmem:[#allocation37_spill] sm:$0xff] %v11311_v48  ;;  %v2274_v8 = vrot.slane %v2266_v32, %v10548_v0  ;;  %v11318_v53 = vrot.slane %v2345_v16, %v10548_v0  ;;  %v571_v21 = vshll.u32 %v11223_v17, 16  ;;  %v576_v11 = vshll.u32 %v11288_v3, 16 }
  0x97   : > { %5840 = vmatprep.mubr.bf16.mxu0 %v4362_v4  ;;  %5968 = vmatprep.mubr.bf16.mxu1 %v4363_v50  ;;  %v584_v60 = vshrl.u32 %v11297_v52, 16  ;;  %v586_v22 = vshll.u32 %v11297_v52, 16  ;;  %v9098_v6 = vcombine.low %v2142_v10, %v2156_v12  ;;  %v9100_v36 = vcombine.high %v2142_v10, %v2156_v12 }
  0x98   : > { %5841 = vmatmul.mubr.bf16.gmra.mxu0 %v4358_v61  ;;  %5969 = vmatmul.mubr.bf16.gmra.mxu1 %v4359_v49  ;;  %v9102_v14 = vcombine.low %v2274_v8, %v11318_v53  ;;  %v591_v15 = vshll.u32 %v11301_v44, 16  ;;  %v573_v63 = vrot.slane %v571_v21, 1  ;;  %v11326_v32 = vrot.slane %v576_v11, 1 }
  0x99   : > { %v588_v50 = vrot.slane %v586_v22, 1  ;;  %v11329_v4 = vrot.slane %v11288_v3, 1  ;;  %v4443_v16 = vrot.slane %v9098_v6, %v10548_v0  ;;  %v4457_v19 = vrot.slane %v9100_v36, %v10548_v0 }
  0x9a   : > { %v4471_v61 = vrot.slane %v9102_v14, %v10548_v0  ;;  %v11334_v49 = vrot.slane %v591_v15, 1  ;;  %v574_v12 = vor.u32 %v573_v63, %v569_v1  ;;  %v14112_v8 = vrot.slane %v11223_v17, 1 }
  0x9b   : > { %v589_v10 = vor.u32 %v588_v50, %v584_v60  ;;  %v9016_v11 = vcombine.low %v11033_v13, %v11311_v48  ;;  %v4480_v22 = vcombine.high %v4429_v28, %v4443_v16  ;;  %v4479_v6 = vcombine.low %v4429_v28, %v4443_v16 }
  0x9c   : > { %v11340_v21 = vsel %vm14073_vm0, %v14112_v8, %v11329_v4  ;;  %v4484_v39 = vcombine.high %v4457_v19, %v4471_v61  ;;  %v4483_v30 = vcombine.low %v4457_v19, %v4471_v61  ;;  %v579_v36 = vsel %vm447_vm1, %v574_v12, %v11326_v32 }
  0x9d   : > { %14113 = vst [vmem:[#allocation38_spill] sm:$0xff] %v11340_v21  ;;  %v11348_v1 = vsel %vm447_vm1, %v589_v10, %v11334_v49  ;;  %v11351_v60 = vrot.slane %v9016_v11, %v10548_v0  ;;  %v2298_v14 = vcombine.high %v11261_v2, %v11223_v17  ;;  %v4507_v15 = vrot.slane %v4480_v22, %v10548_v0 }
  0x9e   : > { %14114 = vst [vmem:[#allocation39_spill] sm:$0xff] %v11348_v1  ;;  %v4535_v13 = vrot.slane %v4484_v39, %v10548_v0  ;;  %v4493_v28 = vrot.slane %v4479_v6, %v10548_v0  ;;  %v4521_v19 = vrot.slane %v4483_v30, %v10548_v0  ;;  %v2299_v63 = vcombine.low %v579_v36, %v11340_v21 }
  0x9f   : > { %v2300_v50 = vcombine.high %v579_v36, %v11340_v21  ;;  %v9022_v16 = vcombine.low %v11275_v34, %v11348_v1  ;;  %v2302_v61 = vcombine.high %v11297_v52, %v11348_v1  ;;  %v2316_v39 = vrot.slane %v2298_v14, %v10548_v0 }
  0xa0   : > { %v4547_v12 = vcombine.low %v4507_v15, %v4535_v13  ;;  %v4543_v10 = vcombine.low %v4493_v28, %v4521_v19  ;;  %v4548_v8 = vcombine.high %v4507_v15, %v4535_v13  ;;  %v4544_v11 = vcombine.high %v4493_v28, %v4521_v19 }
  0xa1   : > { %v2323_v22 = vrot.slane %v2299_v63, %v10548_v0  ;;  %v2330_v30 = vrot.slane %v2300_v50, %v10548_v0  ;;  %v11369_v6 = vrot.slane %v9022_v16, %v10548_v0  ;;  %v11372_v48 = vrot.slane %v2302_v61, %v10548_v0 }
  0xa2   : > { %5848 = vmatprep.mubr.bf16.mxu0 %v4547_v12  ;;  %5976 = vmatprep.mubr.bf16.mxu1 %v4548_v8  ;;  %v2346_v1 = vcombine.high %v11150_v55, %v11293_v29  ;;  %v9023_v15 = vcombine.low %v11247_v57, %v11255_v35  ;;  %v580_v14 = vshrl.u32 %v11288_v3, 16  ;;  %v2347_v13 = vcombine.low %v11177_v59, %v2316_v39 }
  0xa3   : > { %5849 = vmatmul.mubr.bf16.gmra.mxu0 %v4543_v10  ;;  %5977 = vmatmul.mubr.bf16.gmra.mxu1 %v4544_v11  ;;  %v2348_v28 = vcombine.high %v11177_v59, %v2316_v39  ;;  %v2349_v19 = vcombine.low %v2323_v22, %v11369_v6  ;;  %v626_v63 = vrot.slane %v11297_v52, 1  ;;  %v2350_v50 = vcombine.high %v2323_v22, %v11369_v6 }
  0xa4   : > { %v2351_v16 = vcombine.low %v2330_v30, %v11372_v48  ;;  %v2352_v55 = vcombine.high %v2330_v30, %v11372_v48  ;;  %v11387_v29 = vrot.slane %v2346_v1, %v10548_v0  ;;  %v11390_v3 = vrot.slane %v2347_v13, %v10548_v0 }
  0xa5   : > { %v11393_v61 = vrot.slane %v2348_v28, %v10548_v0  ;;  %v11396_v59 = vrot.slane %v2349_v19, %v10548_v0  ;;  %v2475_v12 = vrot.slane %v9023_v15, %v10548_v0  ;;  %v11403_v8 = vrot.slane %v2350_v50, %v10548_v0 }
  0xa6   : > { %14115 = vst [vmem:[#allocation40_spill] sm:$0xff] %v11387_v29  ;;  %14116 = vst [vmem:[#allocation41_spill] sm:$0xff] %v11390_v3  ;;  %v11400_v10 = vrot.slane %v2351_v16, %v10548_v0  ;;  %v11406_v1 = vrot.slane %v2352_v55, %v10548_v0  ;;  %v9018_v11 = vcombine.low %v11189_v40, %v579_v36 }
  0xa7   : > { %14117 = vst [vmem:[#allocation42_spill] sm:$0xff] %v11393_v61  ;;  %14118 = vst [vmem:[#allocation43_spill] sm:$0xff] %v11396_v59  ;;  %v2410_v39 = vcombine.high %v11318_v53, %v11396_v59  ;;  %v2490_v22 = vcombine.low %v11351_v60, %v2475_v12  ;;  %v2078_v30 = vcombine.high %v11223_v17, %v579_v36 }
  0xa8   : > { %14119 = vst [vmem:[#allocation44_spill] sm:$0xff] %v11400_v10  ;;  %14120 = vst [vmem:[#allocation45_spill] sm:$0xff] %v11403_v8  ;;  %v9025_v15 = vcombine.low %v11340_v21, %v11275_v34  ;;  %v2412_v13 = vcombine.high %v11390_v3, %v11400_v10  ;;  %v2414_v28 = vcombine.high %v11387_v29, %v11403_v8 }
  0xa9   : > { %14121 = vst [vmem:[#allocation46_spill] sm:$0xff] %v11406_v1  ;;  %v2416_v19 = vcombine.high %v11393_v61, %v11406_v1  ;;  %v11422_v40 = vrot.slane %v9018_v11, %v10548_v0  ;;  %v11425_v53 = vrot.slane %v2490_v22, %v10548_v0  ;;  %v9106_v17 = vcombine.low %v11387_v29, %v2410_v39  ;;  %v362_v1 = vld [vmem:[%s10490_s17 + $0x7c] sm:$0xf] }
  0xaa   : > { %v11429_v36 = vrot.slane %v2078_v30, %v10548_v0  ;;  %v2522_v34 = vcombine.high %v11340_v21, %v11297_v52  ;;  %v9108_v50 = vcombine.low %v2414_v28, %v11390_v3  ;;  %v9110_v16 = vcombine.low %v11393_v61, %v2412_v13  ;;  %v11461_v61 = vld [vmem:[%s10490_s17 + $0x78] sm:$0xf]  ;;  %v11483_v3 = vld [vmem:[%s10490_s17 + $0x84] sm:$0xf] }
  0xab   : > { %14122 = vst [vmem:[#allocation47_spill] sm:$0xff] %v11425_v53  ;;  %v2533_v55 = vrot.slane %v9025_v15, %v10548_v0  ;;  %v11437_v12 = vor.u32 %v580_v14, %v11326_v32  ;;  %v9112_v11 = vcombine.low %v2416_v19, %v11425_v53  ;;  %v4614_v22 = vrot.slane %v9106_v17, %v10548_v0 }
  0xac   : > { %14123 = vst [vmem:[#allocation48_spill] sm:$0xff] %v11429_v36  ;;  %v2540_v39 = vrot.slane %v2522_v34, %v10548_v0  ;;  %v11443_v30 = vrot.slane %v11301_v44, 1  ;;  %v4628_v52 = vrot.slane %v9108_v50, %v10548_v0  ;;  %v4642_v28 = vrot.slane %v9110_v16, %v10548_v0 }
  0xad   : > { %v2569_v15 = vcombine.low %v11422_v40, %v2533_v55  ;;  %v2570_v32 = vcombine.high %v11422_v40, %v2533_v55  ;;  %v4656_v14 = vrot.slane %v9112_v11, %v10548_v0  ;;  %v11474_v8 = vcombine.low %v11461_v61, %v362_v1  ;;  %v366_v1 = vld [vmem:[%s10490_s17 + $0x8c] sm:$0x3] }
  0xae   : > { %v2571_v13 = vcombine.low %v11429_v36, %v2540_v39  ;;  %v2572_v19 = vcombine.high %v11429_v36, %v2540_v39  ;;  %v11454_v17 = vsel %vm14073_vm0, %v626_v63, %v11443_v30  ;;  %v4665_v34 = vcombine.high %v4614_v22, %v4628_v52  ;;  %v11465_v39 = vld [vmem:[%s10490_s17 + $0x80] sm:$0x3] }
  0xaf   : > { %v4664_v50 = vcombine.low %v4614_v22, %v4628_v52  ;;  %v2583_v16 = vrot.slane %v2569_v15, %v10548_v0  ;;  %v2597_v21 = vrot.slane %v2570_v32, %v10548_v0  ;;  %v4669_v53 = vcombine.high %v4642_v28, %v4656_v14 }
  0xb0   : > { %v4668_v59 = vcombine.low %v4642_v28, %v4656_v14  ;;  %v2590_v55 = vrot.slane %v2571_v13, %v10548_v0  ;;  %v2604_v11 = vrot.slane %v2572_v19, %v10548_v0  ;;  %v4692_v63 = vrot.slane %v4665_v34, %v10548_v0 }
  0xb1   : > { %v4678_v29 = vrot.slane %v4664_v50, %v10548_v0  ;;  %v9114_v22 = vcombine.low %v2583_v16, %v2597_v21  ;;  %v9116_v52 = vcombine.high %v2583_v16, %v2597_v21  ;;  %v4720_v15 = vrot.slane %v4669_v53, %v10548_v0 }
  0xb2   : > { %v4706_v28 = vrot.slane %v4668_v59, %v10548_v0  ;;  %v9118_v32 = vcombine.low %v2590_v55, %v2604_v11  ;;  %v9120_v14 = vcombine.high %v2590_v55, %v2604_v11  ;;  %v11478_v34 = vcombine.low %v11465_v39, %v11465_v39 }
  0xb3   : > { %v4799_v13 = vrot.slane %v9114_v22, %v10548_v0  ;;  %v4813_v19 = vrot.slane %v9116_v52, %v10548_v0  ;;  %v4732_v21 = vcombine.low %v4692_v63, %v4720_v15  ;;  %v4733_v50 = vcombine.high %v4692_v63, %v4720_v15  ;;  %v365_v52 = vld [vmem:[%s10490_s17 + $0x88] sm:$0xf] }
  0xb4   : > { %14124 = vst [vmem:[#allocation49_spill] sm:$0xff] %v11478_v34  ;;  %v4728_v53 = vcombine.low %v4678_v29, %v4706_v28  ;;  %v4729_v16 = vcombine.high %v4678_v29, %v4706_v28  ;;  %v4827_v59 = vrot.slane %v9118_v32, %v10548_v0  ;;  %v4841_v55 = vrot.slane %v9120_v14, %v10548_v0 }
  0xb5   : > { %v4850_v11 = vcombine.high %v4799_v13, %v4813_v19  ;;  %v4849_v22 = vcombine.low %v4799_v13, %v4813_v19  ;;  %5856 = vmatprep.mubr.bf16.mxu0 %v4732_v21  ;;  %5984 = vmatprep.mubr.bf16.mxu1 %v4733_v50  ;;  %v638_v10 = vshrl.u32 %v11474_v8, 16  ;;  %v640_v36 = vshll.u32 %v11474_v8, 16 }
  0xb6   : > { %v645_v57 = vshll.u32 %v11478_v34, 16  ;;  %v652_v29 = vrot.slane %v11474_v8, 1  ;;  %5857 = vmatmul.mubr.bf16.gmra.mxu0 %v4728_v53  ;;  %5985 = vmatmul.mubr.bf16.gmra.mxu1 %v4729_v16  ;;  %v4854_v63 = vcombine.high %v4827_v59, %v4841_v55  ;;  %v4853_v28 = vcombine.low %v4827_v59, %v4841_v55 }
  0xb7   : > { %v4877_v15 = vrot.slane %v4850_v11, %v10548_v0  ;;  %v11493_v32 = vrot.slane %v11478_v34, 1  ;;  %v4863_v14 = vrot.slane %v4849_v22, %v10548_v0  ;;  %v642_v13 = vrot.slane %v640_v36, 1 }
  0xb8   : > { %v11496_v19 = vrot.slane %v645_v57, 1  ;;  %v11499_v21 = vcombine.low %v11483_v3, %v365_v52  ;;  %v4905_v50 = vrot.slane %v4854_v63, %v10548_v0  ;;  %v4891_v53 = vrot.slane %v4853_v28, %v10548_v0 }
  0xb9   : > { %14125 = vst [vmem:[#allocation50_spill] sm:$0xff] %v11493_v32  ;;  %v11505_v16 = vsel %vm14073_vm0, %v652_v29, %v11493_v32  ;;  %v11507_v59 = vcombine.low %v366_v1, %v366_v1  ;;  %v643_v55 = vor.u32 %v642_v13, %v638_v10  ;;  %v9020_v57 = vcombine.low %v11255_v35, %v11437_v12 }
  0xba   : > { %14126 = vst [vmem:[#allocation51_spill] sm:$0xff] %v11499_v21  ;;  %14127 = vst [vmem:[#allocation52_spill] sm:$0xff] %v11505_v16  ;;  %v664_v11 = vshrl.u32 %v11499_v21, 16  ;;  %v666_v36 = vshll.u32 %v11499_v21, 16  ;;  %v4917_v22 = vcombine.low %v4877_v15, %v4905_v50  ;;  %v4913_v52 = vcombine.low %v4863_v14, %v4891_v53 }
  0xbb   : > { %14128 = vst [vmem:[#allocation53_spill] sm:$0xff] %v11507_v59  ;;  %v4918_v34 = vcombine.high %v4877_v15, %v4905_v50  ;;  %v4914_v63 = vcombine.high %v4863_v14, %v4891_v53  ;;  %v11515_v28 = vsel %vm447_vm1, %v643_v55, %v11496_v19  ;;  %v671_v1 = vshll.u32 %v11507_v59, 16 }
  0xbc   : > { %v668_v29 = vrot.slane %v666_v36, 1  ;;  %v11519_v10 = vrot.slane %v9020_v57, %v10548_v0  ;;  %5864 = vmatprep.mubr.bf16.mxu0 %v4917_v22  ;;  %v9027_v13 = vcombine.low %v11329_v4, %v11279_v37  ;;  %v9029_v35 = vcombine.low %v11454_v17, %v11461_v61 }
  0xbd   : > { %5992 = vmatprep.mubr.bf16.mxu1 %v4918_v34  ;;  %v2746_v15 = vcombine.high %v11454_v17, %v11474_v8  ;;  %v595_v14 = vshrl.u32 %v11301_v44, 16  ;;  %v11528_v53 = vrot.slane %v671_v1, 1  ;;  %v2747_v55 = vcombine.low %v11515_v28, %v11505_v16 }
  0xbe   : > { %v669_v50 = vor.u32 %v668_v29, %v664_v11  ;;  %v2748_v34 = vcombine.high %v11515_v28, %v11505_v16  ;;  %5865 = vmatmul.mubr.bf16.gmra.mxu0 %v4913_v52  ;;  %5993 = vmatmul.mubr.bf16.gmra.mxu1 %v4914_v63  ;;  %v2699_v36 = vrot.slane %v9027_v13, %v10548_v0 }
  0xbf   : > { %14129 = vst [vmem:[#allocation54_spill] sm:$0xff] %v11528_v53  ;;  %v2757_v57 = vrot.slane %v9029_v35, %v10548_v0  ;;  %v2764_v22 = vrot.slane %v2746_v15, %v10548_v0  ;;  %v2771_v11 = vrot.slane %v2747_v55, %v10548_v0  ;;  %v11542_v1 = vor.u32 %v595_v14, %v11334_v49 }
  0xc0   : > { %v674_v44 = vsel %vm447_vm1, %v669_v50, %v11528_v53  ;;  %v2778_v29 = vrot.slane %v2748_v34, %v10548_v0  ;;  %v2714_v16 = vcombine.low %v11519_v10, %v2699_v36 }
  0xc1   : > { %v9030_v52 = vcombine.low %v11483_v3, %v674_v44  ;;  %v2750_v63 = vcombine.high %v11499_v21, %v674_v44  ;;  %v2793_v13 = vcombine.low %v11369_v6, %v2757_v57  ;;  %v2794_v35 = vcombine.high %v11369_v6, %v2757_v57 }
  0xc2   : > { %v2795_v15 = vcombine.low %v11372_v48, %v2764_v22  ;;  %v2796_v50 = vcombine.high %v11372_v48, %v2764_v22  ;;  %v9024_v55 = vcombine.low %v11279_v37, %v11542_v1  ;;  %v2722_v49 = vrot.slane %v2714_v16, %v10548_v0 }
  0xc3   : > { %v2785_v14 = vrot.slane %v9030_v52, %v10548_v0  ;;  %v2792_v34 = vrot.slane %v2750_v63, %v10548_v0  ;;  %v2807_v3 = vrot.slane %v2793_v13, %v10548_v0  ;;  %v11561_v6 = vrot.slane %v2794_v35, %v10548_v0 }
  0xc4   : > { %v11558_v36 = vrot.slane %v2795_v15, %v10548_v0  ;;  %v11564_v57 = vrot.slane %v2796_v50, %v10548_v0  ;;  %v11567_v48 = vrot.slane %v9024_v55, %v10548_v0  ;;  %v9031_v63 = vcombine.low %v11443_v30, %v11465_v39 }
  0xc5   : > { %v2797_v37 = vcombine.low %v2771_v11, %v2785_v14  ;;  %v2798_v16 = vcombine.high %v2771_v11, %v2785_v14  ;;  %v2799_v22 = vcombine.low %v2778_v29, %v2792_v34  ;;  %v9124_v44 = vcombine.low %v2722_v49, %v2807_v3 }
  0xc6   : > { %14130 = vst [vmem:[#allocation55_spill] sm:$0xff] %v11564_v57  ;;  %v2800_v52 = vcombine.high %v2778_v29, %v2792_v34  ;;  %v685_v13 = vcombine.low %v10591_v41, %v10614_v7  ;;  %v686_v35 = vcombine.high %v10591_v41, %v10614_v7  ;;  %v2923_v49 = vrot.slane %v9031_v63, %v10548_v0 }
  0xc7   : > { %v11576_v15 = vrot.slane %v2797_v37, %v10548_v0  ;;  %v11579_v50 = vrot.slane %v2799_v22, %v10548_v0  ;;  %v11582_v11 = vrot.slane %v2798_v16, %v10548_v0  ;;  %v4984_v29 = vrot.slane %v9124_v44, %v10548_v0 }
  0xc8   : > { %v11586_v55 = vrot.slane %v2800_v52, %v10548_v0  ;;  %v723_v14 = vrot.slane %v685_v13, %v10548_v0  ;;  %v730_v41 = vrot.slane %v686_v35, %v10548_v0  ;;  %v868_v16 = vcombine.low %v10683_v62, %v10602_v56 }
  0xc9   : > { %14131 = vst [vmem:[#allocation56_spill] sm:$0xff] %v11576_v15  ;;  %v2858_v7 = vcombine.high %v2807_v3, %v11576_v15  ;;  %v2860_v34 = vcombine.high %v11558_v36, %v11579_v50  ;;  %v2862_v37 = vcombine.high %v11561_v6, %v11582_v11  ;;  %v2938_v44 = vcombine.low %v11567_v48, %v2923_v49 }
  0xca   : > { %v2864_v22 = vcombine.high %v11564_v57, %v11586_v55  ;;  %v749_v52 = vcombine.low %v723_v14, %v10697_v51  ;;  %v750_v63 = vcombine.high %v723_v14, %v10697_v51  ;;  %v751_v21 = vcombine.low %v730_v41, %v10725_v46 }
  0xcb   : > { %v9126_v3 = vcombine.low %v11561_v6, %v2858_v7  ;;  %v9128_v13 = vcombine.low %v2862_v37, %v11558_v36  ;;  %v9130_v35 = vcombine.low %v11564_v57, %v2860_v34  ;;  %v11608_v32 = vrot.slane %v2938_v44, %v10548_v0 }
  0xcc   : > { %v752_v56 = vcombine.high %v730_v41, %v10725_v46  ;;  %v787_v62 = vrot.slane %v749_v52, %v10548_v0  ;;  %v801_v49 = vrot.slane %v750_v63, %v10548_v0  ;;  %v794_v7 = vrot.slane %v751_v21, %v10548_v0 }
  0xcd   : > { %14132 = vst [vmem:[#allocation57_spill] sm:$0xff] %v11608_v32  ;;  %v4998_v53 = vrot.slane %v9126_v3, %v10548_v0  ;;  %v5012_v51 = vrot.slane %v9128_v13, %v10548_v0  ;;  %v5026_v14 = vrot.slane %v9130_v35, %v10548_v0  ;;  %v9132_v34 = vcombine.low %v2864_v22, %v11608_v32 }
  0xce   : > { %v808_v37 = vrot.slane %v752_v56, %v10548_v0  ;;  %v9035_v44 = vcombine.low %v787_v62, %v801_v49  ;;  %v9037_v59 = vcombine.high %v787_v62, %v801_v49 }
  0xcf   : > { %v5035_v15 = vcombine.high %v4984_v29, %v4998_v53  ;;  %v5039_v46 = vcombine.high %v5012_v51, %v5026_v14  ;;  %v5034_v41 = vcombine.low %v4984_v29, %v4998_v53  ;;  %v5038_v52 = vcombine.low %v5012_v51, %v5026_v14 }
  0xd0   : > { %v5163_v63 = vrot.slane %v9132_v34, %v10548_v0  ;;  %v9039_v57 = vcombine.low %v794_v7, %v808_v37  ;;  %v9041_v3 = vcombine.high %v794_v7, %v808_v37  ;;  %v3141_v13 = vrot.slane %v9035_v44, %v10548_v0 }
  0xd1   : > { %v5062_v35 = vrot.slane %v5035_v15, %v10548_v0  ;;  %v5090_v21 = vrot.slane %v5039_v46, %v10548_v0  ;;  %v5048_v22 = vrot.slane %v5034_v41, %v10548_v0  ;;  %v5076_v56 = vrot.slane %v5038_v52, %v10548_v0 }
  0xd2   : > { %v5171_v32 = vcombine.high %v5163_v63, %v5163_v63  ;;  %v5179_v62 = vrot.slane %v5163_v63, %v10548_v0  ;;  %v3155_v53 = vrot.slane %v9037_v59, %v10548_v0  ;;  %v3169_v29 = vrot.slane %v9039_v57, %v10548_v0 }
  0xd3   : > { %v5102_v49 = vcombine.low %v5062_v35, %v5090_v21  ;;  %v5098_v51 = vcombine.low %v5048_v22, %v5076_v56  ;;  %v5103_v14 = vcombine.high %v5062_v35, %v5090_v21  ;;  %v5099_v7 = vcombine.high %v5048_v22, %v5076_v56 }
  0xd4   : > { %v5193_v34 = vrot.slane %v5171_v32, %v10548_v0  ;;  %v5201_v15 = vcombine.high %v5179_v62, %v5179_v62  ;;  %v3183_v37 = vrot.slane %v9041_v3, %v10548_v0  ;;  %v3186_v44 = vcombine.low %v3141_v13, %v3155_v53 }
  0xd5   : > { %5872 = vmatprep.mubr.bf16.mxu0 %v5102_v49  ;;  %6000 = vmatprep.mubr.bf16.mxu1 %v5103_v14  ;;  %v3187_v46 = vcombine.high %v3141_v13, %v3155_v53  ;;  %v890_v41 = vrot.slane %v868_v16, %v10548_v0  ;;  %v1059_v59 = vcombine.low %v10704_v23, %v10719_v33 }
  0xd6   : > { %5873 = vmatmul.mubr.bf16.gmra.mxu0 %v5098_v51  ;;  %6001 = vmatmul.mubr.bf16.gmra.mxu1 %v5099_v7  ;;  %v5203_v57 = vcombine.high %v5193_v34, %v5193_v34  ;;  %v3190_v52 = vcombine.low %v3169_v29, %v3183_v37  ;;  %v3191_v63 = vcombine.high %v3169_v29, %v3183_v37 }
  0xd7   : > { %5880 = vmatprep.mubr.bf16.mxu0 %v5193_v34  ;;  %v3219_v32 = vrot.slane %v3187_v46, %v10548_v0  ;;  %v11635_v35 = vrot.slane %v3186_v44, %v10548_v0  ;;  %v899_v3 = vcombine.low %v890_v41, %v10918_v18  ;;  %v1061_v13 = vcombine.low %v10707_v24, %v10722_v38  ;;  %v14133_v46 = vld [vmem:[#allocation7_spill] sm:$0xff] }
  0xd8   : > { %6008 = vmatprep.mubr.bf16.mxu1 %v5203_v57  ;;  %v3247_v16 = vrot.slane %v3191_v63, %v10548_v0  ;;  %v3233_v23 = vrot.slane %v3190_v52, %v10548_v0  ;;  %v1063_v21 = vcombine.low %v10710_v25, %v10763_v45  ;;  %v9049_v22 = vcombine.high %v10722_v38, %v1059_v59  ;;  %v14134_v57 = vld [vmem:[#allocation15_spill] sm:$0xff]  ;;  %v14136_v63 = vld [vmem:[#allocation12_spill] sm:$0xff] }
  0xd9   : > { %v913_v56 = vrot.slane %v899_v3, %v10548_v0  ;;  %v9047_v53 = vcombine.high %v1061_v13, %v10716_v26  ;;  %v1116_v18 = vcombine.low %v10842_v20, %v10618_v9  ;;  %v1179_v24 = vcombine.low %v10610_v5, %v10884_v54  ;;  %v14138_v3 = vld [vmem:[#allocation13_spill] sm:$0xff] }
  0xda   : > { %v3254_v29 = vcombine.low %v3219_v32, %v3247_v16  ;;  %v3250_v49 = vcombine.low %v11635_v35, %v3233_v23  ;;  %v3255_v51 = vcombine.high %v3219_v32, %v3247_v16  ;;  %v3251_v14 = vcombine.high %v11635_v35, %v3233_v23  ;;  %v14137_v32 = vld [vmem:[#allocation10_spill] sm:$0xff]  ;;  %v14139_v16 = vld [vmem:[#allocation8_spill] sm:$0xff] }
  0xdb   : > { %v9045_v25 = vcombine.low %v913_v56, %v10716_v26  ;;  %v9051_v38 = vcombine.high %v1063_v21, %v10719_v33  ;;  %v3340_v7 = vrot.slane %v9047_v53, %v10548_v0  ;;  %v3354_v34 = vrot.slane %v9049_v22, %v10548_v0  ;;  %v14135_v33 = vld [vmem:[#allocation9_spill] sm:$0xff] }
  0xdc   : > { %v1138_v37 = vrot.slane %v1116_v18, %v10548_v0  ;;  %v1180_v20 = vcombine.high %v10610_v5, %v10884_v54  ;;  %v1203_v44 = vrot.slane %v1179_v24, %v10548_v0  ;;  %v1347_v41 = vcombine.low %v14133_v46, %v10868_v27 }
  0xdd   : > { %v3326_v59 = vrot.slane %v9045_v25, %v10548_v0  ;;  %v3368_v26 = vrot.slane %v9051_v38, %v10548_v0  ;;  %v1515_v52 = vcombine.low %v14135_v33, %v14134_v57  ;;  %v1517_v35 = vcombine.low %v14137_v32, %v14136_v63 }
  0xde   : > { %5881 = vmatmul.mubr.bf16.gmra.mxu0 %v5179_v62  ;;  %6009 = vmatmul.mubr.bf16.gmra.mxu1 %v5201_v15  ;;  %v1147_v13 = vcombine.low %v1138_v37, %v14138_v3  ;;  %v1210_v5 = vrot.slane %v1180_v20, %v10548_v0  ;;  %v1229_v23 = vcombine.low %v1203_v44, %v14139_v16 }
  0xdf   : > { %6048 = vmatprep.mubr.bf16.mxu0 %v3254_v29  ;;  %6176 = vmatprep.mubr.bf16.mxu1 %v3255_v51  ;;  %v3372_v21 = vcombine.high %v3326_v59, %v3340_v7  ;;  %v3376_v22 = vcombine.high %v3354_v34, %v3368_v26  ;;  %v3371_v56 = vcombine.low %v3326_v59, %v3340_v7  ;;  %v14140_v51 = vld [vmem:[#allocation4_spill] sm:$0xff] }
  0xe0   : > { %v3375_v53 = vcombine.low %v3354_v34, %v3368_v26  ;;  %v1161_v18 = vrot.slane %v1147_v13, %v10548_v0  ;;  %v1230_v24 = vcombine.high %v1203_v44, %v14139_v16  ;;  %v1231_v25 = vcombine.low %v1210_v5, %v11113_v42 }
  0xe1   : > { %v3404_v62 = vrot.slane %v3372_v21, %v10548_v0  ;;  %v3432_v15 = vrot.slane %v3376_v22, %v10548_v0  ;;  %v3390_v38 = vrot.slane %v3371_v56, %v10548_v0  ;;  %v1232_v37 = vcombine.high %v1210_v5, %v11113_v42  ;;  %v10206_v42 = vld [vmem:[%s13972_s2 + $0x230] sm:$0xff]  }
  0xe2   : > { %v3418_v29 = vrot.slane %v3375_v53, %v10548_v0  ;;  %v1162_v20 = vcombine.low %v14140_v51, %v1161_v18  ;;  %v1267_v7 = vrot.slane %v1229_v23, %v10548_v0  ;;  %v1274_v34 = vrot.slane %v1231_v25, %v10548_v0  ;;  %v14141_v53 = vld [vmem:[#allocation11_spill] sm:$0xff] }
  0xe3   : > { %v3439_v46 = vcombine.low %v3404_v62, %v3432_v15  ;;  %v3440_v44 = vcombine.high %v3404_v62, %v3432_v15  ;;  %v1281_v59 = vrot.slane %v1230_v24, %v10548_v0  ;;  %v1288_v26 = vrot.slane %v1232_v37, %v10548_v0  ;;  %v10285_v24 = vld [vmem:[%s13972_s2 + $0x238] sm:$0xff]  }
  0xe4   : > { %v3435_v33 = vcombine.low %v3390_v38, %v3418_v29  ;;  %v3436_v32 = vcombine.high %v3390_v38, %v3418_v29  ;;  %v9053_v3 = vcombine.high %v10763_v45, %v1162_v20  ;;  %v1362_v13 = vrot.slane %v1347_v41, %v10548_v0 }
  0xe5   : > { %v9055_v5 = vcombine.low %v1267_v7, %v1281_v59  ;;  %v9057_v16 = vcombine.high %v1267_v7, %v1281_v59  ;;  %v9059_v23 = vcombine.low %v1274_v34, %v1288_v26  ;;  %v9062_v21 = vcombine.high %v1274_v34, %v1288_v26  ;;  %v14142_v7 = vld [vmem:[#allocation16_spill] sm:$0xff]  ;;  %v14143_v34 = vld [vmem:[#allocation14_spill] sm:$0xff] }
  0xe6   : > { %6049 = vmatmul.mubr.bf16.vlgmr.msra.gmra.mxu0 %v3250_v49  ;;  %6177 = vmatmul.mubr.bf16.vlgmr.msra.gmra.mxu1 %v3251_v14  ;;  %v3511_v22 = vrot.slane %v9053_v3, %v10548_v0  ;;  %v1371_v56 = vcombine.low %v1362_v13, %v11125_v58  ;;  %v9066_v18 = vcombine.high %v1517_v35, %v14141_v53  ;;  %v10207_v35 = vld [vmem:[%s13972_s2 + $0x228] sm:$0xff]  }
  0xe7   : > { %10003 = vmatpush3.bf16.msra.mxu0 %v10285_v24  ;;  %6056 = vmatprep.mubr.bf16.mxu0 %v3439_v46  ;;  %v3525_v45 = vrot.slane %v9055_v5, %v10548_v0  ;;  %v3539_v41 = vrot.slane %v9057_v16, %v10548_v0  ;;  %v3553_v25 = vrot.slane %v9059_v23, %v10548_v0 }
  0xe8   : > { %6184 = vmatprep.mubr.bf16.mxu1 %v3440_v44  ;;  %10004 = vmatprep.subr.bf16.mxu0 %v10206_v42  ;;  %v1385_v49 = vrot.slane %v1371_v56, %v10548_v0  ;;  %v9068_v58 = vcombine.high %v14136_v63, %v1515_v52  ;;  %v3696_v14 = vrot.slane %v9062_v21, %v10548_v0 }
  0xe9   : > { %v3557_v62 = vcombine.high %v3511_v22, %v3525_v45  ;;  %v3561_v15 = vcombine.high %v3539_v41, %v3553_v25  ;;  %v3556_v38 = vcombine.low %v3511_v22, %v3525_v45  ;;  %v3560_v37 = vcombine.low %v3539_v41, %v3553_v25  ;;  %v10208_v22 = vld [vmem:[%s13972_s2 + $0x220] sm:$0xff]   ;;  %v14144_v45 = vld [vmem:[#allocation5_spill] sm:$0xff] }
  0xea   : > { %v9064_v29 = vcombine.low %v1385_v49, %v14141_v53  ;;  %v3724_v51 = vrot.slane %v9066_v18, %v10548_v0  ;;  %v3738_v20 = vrot.slane %v9068_v58, %v10548_v0  ;;  %v1519_v46 = vcombine.low %v14143_v34, %v14142_v7  ;;  %v14145_v58 = vld [vmem:[#allocation25_spill] sm:$0xff] }
  0xeb   : > { %10005 = vmatpush3.bf16.msra.mxu0 %v10206_v42  ;;  %v3589_v52 = vrot.slane %v3557_v62, %v10548_v0  ;;  %v3617_v63 = vrot.slane %v3561_v15, %v10548_v0  ;;  %v3575_v44 = vrot.slane %v3556_v38, %v10548_v0  ;;  %v3603_v59 = vrot.slane %v3560_v37, %v10548_v0  ;;  %v14146_v15 = vld [vmem:[#allocation18_spill] sm:$0xff] }
  0xec   : > { %v3710_v26 = vrot.slane %v9064_v29, %v10548_v0  ;;  %v3746_v3 = vcombine.high %v3724_v51, %v3738_v20  ;;  %10006 = vmatprep.subr.bf16.mxu0 %v10207_v35  ;;  %v3745_v13 = vcombine.low %v3724_v51, %v3738_v20  ;;  %v1571_v5 = vcombine.low %v11066_v47, %v10887_v43  ;;  %v14147_v38 = vld [vmem:[#allocation22_spill] sm:$0xff]  ;;  %v14149_v51 = vld [vmem:[#allocation24_spill] sm:$0xff] }
  0xed   : > { %v3624_v16 = vcombine.low %v3589_v52, %v3617_v63  ;;  %v3620_v23 = vcombine.low %v3575_v44, %v3603_v59  ;;  %v3625_v21 = vcombine.high %v3589_v52, %v3617_v63  ;;  %v3621_v42 = vcombine.high %v3575_v44, %v3603_v59  ;;  %v14148_v29 = vld [vmem:[#allocation30_spill] sm:$0xff]  ;;  %v14150_v44 = vld [vmem:[#allocation23_spill] sm:$0xff] }
  0xee   : > { %6057 = vmatmul.mubr.bf16.gmra.mxu0 %v3435_v33  ;;  %6185 = vmatmul.mubr.bf16.gmra.mxu1 %v3436_v32  ;;  %v3742_v56 = vcombine.high %v3696_v14, %v3710_v26  ;;  %v3802_v53 = vrot.slane %v3746_v3, %v10548_v0  ;;  %v3741_v18 = vcombine.low %v3696_v14, %v3710_v26 }
  0xef   : > { %6064 = vmatprep.mubr.bf16.mxu0 %v3624_v16  ;;  %6192 = vmatprep.mubr.bf16.mxu1 %v3625_v21  ;;  %v11722_v24 = vrot.slane %v3745_v13, %v10548_v0  ;;  %v1586_v47 = vrot.slane %v1571_v5, %v10548_v0  ;;  %v1627_v41 = vcombine.low %v14144_v45, %v11106_v31  ;;  %v14151_v16 = vld [vmem:[#allocation26_spill] sm:$0xff] }
  0xf0   : > { %v3774_v25 = vrot.slane %v3742_v56, %v10548_v0  ;;  %v11729_v49 = vrot.slane %v3741_v18, %v10548_v0  ;;  %10007 = vmatpush3.bf16.msra.mxu0 %v10207_v35  ;;  %v9071_v33 = vcombine.high %v1519_v46, %v14134_v57  ;;  %v1628_v32 = vcombine.high %v14144_v45, %v11106_v31  ;;  %v10209_v35 = vld [vmem:[%s13972_s2 + $0x218] sm:$0xff]  }
  0xf1   : > { %v1595_v14 = vcombine.low %v1586_v47, %v14145_v58  ;;  %v1651_v62 = vrot.slane %v1627_v41, %v10548_v0  ;;  %10008 = vmatprep.subr.bf16.mxu0 %v10208_v22  ;;  %v1795_v37 = vcombine.low %v14147_v38, %v14146_v15  ;;  %v1965_v20 = vcombine.low %v14149_v51, %v14148_v29  ;;  %v14152_v56 = vld [vmem:[#allocation29_spill] sm:$0xff] }
  0xf2   : > { %v3809_v34 = vcombine.low %v3774_v25, %v3802_v53  ;;  %v3805_v57 = vcombine.low %v11729_v49, %v11722_v24  ;;  %v3810_v46 = vcombine.high %v3774_v25, %v3802_v53  ;;  %v3806_v52 = vcombine.high %v11729_v49, %v11722_v24  ;;  %v14153_v53 = vld [vmem:[#allocation27_spill] sm:$0xff]  ;;  %v14154_v47 = vld [vmem:[#allocation17_spill] sm:$0xff]  ;;  %v14156_v49 = vld [vmem:[#allocation28_spill] sm:$0xff] }
  0xf3   : > { %v1609_v63 = vrot.slane %v1595_v14, %v10548_v0  ;;  %v1677_v59 = vcombine.low %v1651_v62, %v14150_v44  ;;  %v1678_v26 = vcombine.high %v1651_v62, %v14150_v44  ;;  %v3881_v3 = vrot.slane %v9071_v33, %v10548_v0  ;;  %v14155_v25 = vld [vmem:[#allocation31_spill] sm:$0xff]  ;;  %v14158_v62 = vld [vmem:[#allocation36_spill] sm:$0xff] }
  0xf4   : > { %10009 = vmatpush3.bf16.msra.mxu0 %v10208_v22  ;;  %v1658_v13 = vrot.slane %v1628_v32, %v10548_v0  ;;  %v1810_v5 = vrot.slane %v1795_v37, %v10548_v0  ;;  %v9086_v21 = vcombine.high %v1965_v20, %v14151_v16  ;;  %v1963_v18 = vcombine.low %v14153_v53, %v14152_v56  ;;  %v10210_v22 = vld [vmem:[%s13972_s2 + $0x210] sm:$0xff]   ;;  %v14157_v33 = vld [vmem:[#allocation35_spill] sm:$0xff] }
  0xf5   : > { %v1610_v24 = vcombine.low %v14154_v47, %v1609_v63  ;;  %v1715_v45 = vrot.slane %v1677_v59, %v10548_v0  ;;  %v1729_v41 = vrot.slane %v1678_v26, %v10548_v0  ;;  %v1967_v58 = vcombine.low %v14156_v49, %v14155_v25  ;;  %10010 = vmatprep.subr.bf16.mxu0 %v10209_v35 }
  0xf6   : > { %6065 = vmatmul.mubr.bf16.gmra.mxu0 %v3620_v23  ;;  %6193 = vmatmul.mubr.bf16.gmra.mxu1 %v3621_v42  ;;  %v1679_v32 = vcombine.low %v1658_v13, %v14157_v33  ;;  %v1680_v14 = vcombine.high %v1658_v13, %v14157_v33  ;;  %v1819_v38 = vcombine.low %v1810_v5, %v14158_v62  ;;  %v14160_v13 = vld [vmem:[#allocation32_spill] sm:$0xff]  ;;  %v10211_v5 = vld [vmem:[%s13972_s2 + $0x208] sm:$0xff]  }
  0xf7   : > { %6072 = vmatprep.mubr.bf16.mxu0 %v3809_v34  ;;  %6200 = vmatprep.mubr.bf16.mxu1 %v3810_v46  ;;  %v9073_v37 = vcombine.high %v14142_v7, %v1610_v24  ;;  %v9075_v51 = vcombine.low %v1715_v45, %v1729_v41  ;;  %v9077_v20 = vcombine.high %v1715_v45, %v1729_v41  ;;  %v14159_v46 = vld [vmem:[#allocation20_spill] sm:$0xff] }
  0xf8   : > { %v1722_v63 = vrot.slane %v1679_v32, %v10548_v0  ;;  %v1736_v44 = vrot.slane %v1680_v14, %v10548_v0  ;;  %v1833_v59 = vrot.slane %v1819_v38, %v10548_v0  ;;  %v4108_v23 = vrot.slane %v9086_v21, %v10548_v0  ;;  %10011 = vmatpush3.bf16.msra.mxu0 %v10209_v35  ;;  %v14161_v35 = vld [vmem:[#allocation19_spill] sm:$0xff] }
  0xf9   : > { %v3895_v42 = vrot.slane %v9073_v37, %v10548_v0  ;;  %v3909_v26 = vrot.slane %v9075_v51, %v10548_v0  ;;  %v3923_v34 = vrot.slane %v9077_v20, %v10548_v0  ;;  %v2019_v7 = vcombine.low %v14160_v13, %v14159_v46  ;;  %10012 = vmatprep.subr.bf16.mxu0 %v10210_v22 }
  0xfa   : > { %v9080_v47 = vcombine.low %v1722_v63, %v1736_v44  ;;  %v9082_v24 = vcombine.high %v1722_v63, %v1736_v44  ;;  %v9084_v45 = vcombine.low %v1833_v59, %v14151_v16  ;;  %v2075_v21 = vcombine.low %v14161_v35, %v11261_v2 }
  0xfb   : > { %v3927_v41 = vcombine.high %v3881_v3, %v3895_v42  ;;  %v3931_v33 = vcombine.high %v3909_v26, %v3923_v34  ;;  %v3926_v32 = vcombine.low %v3881_v3, %v3895_v42  ;;  %v3930_v14 = vcombine.low %v3909_v26, %v3923_v34  ;;  %v10212_v26 = vld [vmem:[%s13972_s2 + $0x200] sm:$0xff]  }
  0xfc   : > { %v4066_v62 = vrot.slane %v9080_v47, %v10548_v0  ;;  %v4080_v38 = vrot.slane %v9082_v24, %v10548_v0  ;;  %v4094_v37 = vrot.slane %v9084_v45, %v10548_v0  ;;  %v2034_v51 = vrot.slane %v2019_v7, %v10548_v0  ;;  %10013 = vmatpush3.bf16.msra.mxu0 %v10210_v22 }
  0xfd   : > { %v3959_v20 = vrot.slane %v3927_v41, %v10548_v0  ;;  %v3987_v16 = vrot.slane %v3931_v33, %v10548_v0  ;;  %v3945_v63 = vrot.slane %v3926_v32, %v10548_v0  ;;  %v3973_v44 = vrot.slane %v3930_v14, %v10548_v0  ;;  %10014 = vmatprep.subr.bf16.mxu0 %v10211_v5 }
  0xfe   : > { %6073 = vmatmul.mubr.bf16.gmra.mxu0 %v3805_v57  ;;  %6201 = vmatmul.mubr.bf16.gmra.mxu1 %v3806_v52  ;;  %v4112_v3 = vcombine.high %v4066_v62, %v4080_v38  ;;  %v4116_v59 = vcombine.high %v4094_v37, %v4108_v23  ;;  %v4111_v42 = vcombine.low %v4066_v62, %v4080_v38  ;;  %v11799_v57 = vpop.f32.mrf.mxu0  ;;  %v11801_v52 = vpop.f32.mrf.mxu1 }
  0xff   : > { %v3994_v34 = vcombine.low %v3959_v20, %v3987_v16  ;;  %v3990_v22 = vcombine.low %v3945_v63, %v3973_v44  ;;  %v3995_v13 = vcombine.high %v3959_v20, %v3987_v16  ;;  %v3991_v7 = vcombine.high %v3945_v63, %v3973_v44  ;;  %v14163_v44 = vld [vmem:[#allocation34_spill] sm:$0xff] }
 0x100   : > { %v4144_v47 = vrot.slane %v4112_v3, %v10548_v0  ;;  %v4172_v24 = vrot.slane %v4116_v59, %v10548_v0  ;;  %v4115_v45 = vcombine.low %v4094_v37, %v4108_v23  ;;  %v11797_v41 = vrot.slane %v4111_v42, %v10548_v0  ;;  %10015 = vmatpush3.bf16.msra.mxu0 %v10211_v5  ;;  %v11825_v49 = vpop.f32.mrf.mxu1  ;;  %v14164_v3 = vld [vmem:[#allocation37_spill] sm:$0xff] }
 0x101   : > { %6080 = vmatprep.mubr.bf16.mxu0 %v3994_v34  ;;  %6208 = vmatprep.mubr.bf16.mxu1 %v3995_v13  ;;  %v2043_v33 = vcombine.low %v2034_v51, %v11351_v60  ;;  %v2099_v32 = vrot.slane %v2075_v21, %v10548_v0  ;;  %v9089_v14 = vcombine.high %v14148_v29, %v1963_v18 }
 0x102   : > { %v4179_v23 = vcombine.low %v4144_v47, %v4172_v24  ;;  %v4158_v62 = vrot.slane %v4115_v45, %v10548_v0  ;;  %v4180_v38 = vcombine.high %v4144_v47, %v4172_v24  ;;  %v9091_v5 = vcombine.high %v1967_v58, %v14152_v56  ;;  %10016 = vmatprep.subr.bf16.mxu0 %v10212_v26  ;;  %v11823_v56 = vpop.f32.mrf.mxu0  ;;  %v14162_v58 = vld [vmem:[#allocation33_spill] sm:$0xff] }
 0x103   : > { %v2057_v37 = vrot.slane %v2043_v33, %v10548_v0  ;;  %v2125_v60 = vcombine.low %v2099_v32, %v11422_v40  ;;  %v2126_v21 = vcombine.high %v2099_v32, %v11422_v40  ;;  %v4251_v53 = vrot.slane %v9089_v14, %v10548_v0  ;;  %v11843_v32 = vpop.f32.mrf.mxu1 }
 0x104   : > { %v4175_v29 = vcombine.low %v11797_v41, %v4158_v62  ;;  %v4176_v18 = vcombine.high %v11797_v41, %v4158_v62  ;;  %v4265_v51 = vrot.slane %v9091_v5, %v10548_v0  ;;  %v2076_v20 = vcombine.high %v14161_v35, %v11261_v2  ;;  %10017 = vmatpush3.bf16.msra.mxu0 %v10212_v26  ;;  %v14165_v41 = vld [vmem:[#allocation48_spill] sm:$0xff] }
 0x105   : > { %v2058_v16 = vcombine.low %v14162_v58, %v2057_v37  ;;  %v2163_v40 = vrot.slane %v2125_v60, %v10548_v0  ;;  %v2177_v63 = vrot.slane %v2126_v21, %v10548_v0  ;;  %v2243_v59 = vcombine.low %v14164_v3, %v14163_v44  ;;  %v14166_v37 = vld [vmem:[#allocation44_spill] sm:$0xff]  ;;  %v14167_v60 = vld [vmem:[#allocation41_spill] sm:$0xff] }
 0x106   : > { %6081 = vmatmul.mubr.bf16.gmra.mxu0 %v3990_v22  ;;  %6209 = vmatmul.mubr.bf16.gmra.mxu1 %v3991_v7  ;;  %v4297_v42 = vcombine.high %v4251_v53, %v4265_v51  ;;  %v4296_v34 = vcombine.low %v4251_v53, %v4265_v51  ;;  %v2106_v35 = vrot.slane %v2076_v20, %v10548_v0  ;;  %v11841_v7 = vpop.f32.mrf.mxu0  ;;  %v14168_v53 = vld [vmem:[#allocation45_spill] sm:$0xff]  ;;  %v14169_v51 = vld [vmem:[#allocation40_spill] sm:$0xff] }
 0x107   : > { %6088 = vmatprep.mubr.bf16.mxu0 %v4179_v23  ;;  %6216 = vmatprep.mubr.bf16.mxu1 %v4180_v38  ;;  %v9093_v26 = vcombine.high %v14155_v25, %v2058_v16  ;;  %v9095_v13 = vcombine.low %v2163_v40, %v2177_v63  ;;  %v2258_v47 = vrot.slane %v2243_v59, %v10548_v0 }
 0x108   : > { %v4329_v24 = vrot.slane %v4297_v42, %v10548_v0  ;;  %v11837_v45 = vrot.slane %v4296_v34, %v10548_v0  ;;  %v2127_v33 = vcombine.low %v2106_v35, %v14165_v41  ;;  %v2128_v22 = vcombine.high %v2106_v35, %v14165_v41 }
 0x109   : > { %v4279_v14 = vrot.slane %v9093_v26, %v10548_v0  ;;  %v4293_v25 = vrot.slane %v9095_v13, %v10548_v0  ;;  %v2267_v23 = vcombine.low %v2258_v47, %v11519_v10  ;;  %v9097_v62 = vcombine.high %v2163_v40, %v2177_v63  ;;  %v14170_v10 = vld [vmem:[#allocation46_spill] sm:$0xff]  ;;  %v11860_v26 = vpop.f32.mrf.mxu0  ;;  %v11862_v13 = vpop.f32.mrf.mxu1 }
 0x10a   : > { %v2170_v38 = vrot.slane %v2127_v33, %v10548_v0  ;;  %v2184_v5 = vrot.slane %v2128_v22, %v10548_v0  ;;  %v2411_v21 = vcombine.low %v14167_v60, %v14166_v37  ;;  %v2413_v20 = vcombine.low %v14169_v51, %v14168_v53  ;;  %v14171_v40 = vld [vmem:[#allocation42_spill] sm:$0xff]  ;;  %v14172_v33 = vld [vmem:[#allocation43_spill] sm:$0xff] }
 0x10b   : > { %v4301_v58 = vcombine.high %v4279_v14, %v4293_v25  ;;  %v4300_v16 = vcombine.low %v4279_v14, %v4293_v25  ;;  %v2281_v3 = vrot.slane %v2267_v23, %v10548_v0  ;;  %v4436_v59 = vrot.slane %v9097_v62, %v10548_v0 }
 0x10c   : > { %v9099_v42 = vcombine.low %v2170_v38, %v2184_v5  ;;  %v9101_v34 = vcombine.high %v2170_v38, %v2184_v5  ;;  %v2415_v63 = vcombine.low %v14171_v40, %v14170_v10  ;;  %v2467_v35 = vcombine.low %v11437_v12, %v11329_v4 }
 0x10d   : > { %v4357_v47 = vrot.slane %v4301_v58, %v10548_v0  ;;  %v4343_v41 = vrot.slane %v4300_v16, %v10548_v0  ;;  %v9103_v22 = vcombine.low %v2281_v3, %v14172_v33  ;;  %v9107_v14 = vcombine.high %v2413_v20, %v14172_v33 }
 0x10e   : > { %6089 = vmatmul.mubr.bf16.gmra.mxu0 %v4175_v29  ;;  %6217 = vmatmul.mubr.bf16.gmra.mxu1 %v4176_v18  ;;  %v4450_v25 = vrot.slane %v9099_v42, %v10548_v0  ;;  %v4464_v23 = vrot.slane %v9101_v34, %v10548_v0  ;;  %v2482_v12 = vrot.slane %v2467_v35, %v10548_v0  ;;  %v11875_v29 = vpop.f32.mrf.mxu0  ;;  %v11877_v18 = vpop.f32.mrf.mxu1  ;;  %v14173_v34 = vld [vmem:[#allocation49_spill] sm:$0xff] }
 0x10f   : > { %v4364_v62 = vcombine.low %v4329_v24, %v4357_v47  ;;  %v4360_v38 = vcombine.low %v11837_v45, %v4343_v41  ;;  %v4365_v5 = vcombine.high %v4329_v24, %v4357_v47  ;;  %v4361_v60 = vcombine.high %v11837_v45, %v4343_v41 }
 0x110   : > { %v4478_v51 = vrot.slane %v9103_v22, %v10548_v0  ;;  %v4482_v58 = vcombine.high %v4436_v59, %v4450_v25  ;;  %v4481_v16 = vcombine.low %v4436_v59, %v4450_v25  ;;  %v2491_v20 = vcombine.low %v2482_v12, %v11567_v48  ;;  %v14175_v12 = vld [vmem:[#allocation47_spill] sm:$0xff] }
 0x111   : > { %6096 = vmatprep.mubr.bf16.mxu0 %v4364_v62  ;;  %6224 = vmatprep.mubr.bf16.mxu1 %v4365_v5  ;;  %v9109_v3 = vcombine.high %v14168_v53, %v2411_v21  ;;  %v9111_v42 = vcombine.high %v2415_v63, %v14166_v37  ;;  %v4621_v24 = vrot.slane %v9107_v14, %v10548_v0  ;;  %v649_v45 = vshrl.u32 %v14173_v34, 16  ;;  %v14174_v21 = vld [vmem:[#allocation39_spill] sm:$0xff]  ;;  %v11890_v37 = vpop.f32.mrf.mxu0  ;;  %v11892_v63 = vpop.f32.mrf.mxu1 }
 0x112   : > { %v4486_v40 = vcombine.high %v4464_v23, %v4478_v51  ;;  %v4514_v35 = vrot.slane %v4482_v58, %v10548_v0  ;;  %v4485_v59 = vcombine.low %v4464_v23, %v4478_v51  ;;  %v4500_v48 = vrot.slane %v4481_v16, %v10548_v0 }
 0x113   : > { %v2505_v47 = vrot.slane %v2491_v20, %v10548_v0  ;;  %v4635_v41 = vrot.slane %v9109_v3, %v10548_v0  ;;  %v4649_v33 = vrot.slane %v9111_v42, %v10548_v0  ;;  %v2523_v53 = vcombine.low %v14174_v21, %v11454_v17 }
 0x114   : > { %v4542_v22 = vrot.slane %v4486_v40, %v10548_v0  ;;  %v4528_v14 = vrot.slane %v4485_v59, %v10548_v0  ;;  %v2524_v25 = vcombine.high %v14174_v21, %v11454_v17  ;;  %v9026_v23 = vcombine.low %v11461_v61, %v11515_v28  ;;  %v11908_v61 = vpop.f32.mrf.mxu0 }
 0x115   : > { %v2506_v62 = vcombine.low %v14175_v12, %v2505_v47  ;;  %v4667_v5 = vcombine.high %v4621_v24, %v4635_v41  ;;  %v4666_v51 = vcombine.low %v4621_v24, %v4635_v41  ;;  %v2526_v58 = vcombine.high %v11474_v8, %v11515_v28  ;;  %v11910_v47 = vpop.f32.mrf.mxu1 }
 0x116   : > { %6097 = vmatmul.mubr.bf16.gmra.mxu0 %v4360_v38  ;;  %6225 = vmatmul.mubr.bf16.gmra.mxu1 %v4361_v60  ;;  %v4549_v16 = vcombine.low %v4514_v35, %v4542_v22  ;;  %v4545_v20 = vcombine.low %v4500_v48, %v4528_v14  ;;  %v4550_v3 = vcombine.high %v4514_v35, %v4542_v22  ;;  %v11926_v12 = vpop.f32.mrf.mxu0 }
 0x117   : > { %v4546_v42 = vcombine.high %v4500_v48, %v4528_v14  ;;  %v9113_v34 = vcombine.high %v14170_v10, %v2506_v62  ;;  %v4699_v40 = vrot.slane %v4667_v5, %v10548_v0  ;;  %v11906_v59 = vrot.slane %v4666_v51, %v10548_v0  ;;  %v11928_v62 = vpop.f32.mrf.mxu1 }
 0x118   : > { %6104 = vmatprep.mubr.bf16.mxu0 %v4549_v16  ;;  %6232 = vmatprep.mubr.bf16.mxu1 %v4550_v3  ;;  %v2547_v8 = vrot.slane %v2523_v53, %v10548_v0  ;;  %v2554_v28 = vrot.slane %v2524_v25, %v10548_v0  ;;  %v2561_v38 = vrot.slane %v9026_v23, %v10548_v0 }
 0x119   : > { %v4663_v60 = vrot.slane %v9113_v34, %v10548_v0  ;;  %v2568_v10 = vrot.slane %v2526_v58, %v10548_v0  ;;  %v11918_v24 = vor.u32 %v649_v45, %v11496_v19  ;;  %v2691_v35 = vcombine.low %v11542_v1, %v11443_v30 }
 0x11a   : > { %v2573_v48 = vcombine.low %v2547_v8, %v2561_v38  ;;  %v2574_v41 = vcombine.high %v2547_v8, %v2561_v38  ;;  %v2859_v21 = vcombine.low %v11558_v36, %v11579_v50  ;;  %v2861_v53 = vcombine.low %v11561_v6, %v11582_v11  ;;  %v11942_v38 = vpop.f32.mrf.mxu0 }
 0x11b   : > { %v4671_v22 = vcombine.high %v4649_v33, %v4663_v60  ;;  %v4670_v14 = vcombine.low %v4649_v33, %v4663_v60  ;;  %v2575_v25 = vcombine.low %v2554_v28, %v2568_v10  ;;  %v2576_v23 = vcombine.high %v2554_v28, %v2568_v10  ;;  %v11944_v60 = vpop.f32.mrf.mxu1 }
 0x11c   : > { %v2611_v19 = vrot.slane %v2573_v48, %v10548_v0  ;;  %v2625_v1 = vrot.slane %v2574_v41, %v10548_v0  ;;  %v9028_v45 = vcombine.low %v11465_v39, %v11918_v24  ;;  %v2706_v36 = vrot.slane %v2691_v35, %v10548_v0  ;;  %v14176_v41 = vld [vmem:[#allocation55_spill] sm:$0xff] }
 0x11d   : > { %v4727_v5 = vrot.slane %v4671_v22, %v10548_v0  ;;  %v4713_v6 = vrot.slane %v4670_v14, %v10548_v0  ;;  %v2618_v33 = vrot.slane %v2575_v25, %v10548_v0  ;;  %v2632_v51 = vrot.slane %v2576_v23, %v10548_v0  ;;  %v14177_v14 = vld [vmem:[#allocation56_spill] sm:$0xff]  ;;  %v14178_v25 = vld [vmem:[#allocation53_spill] sm:$0xff] }
 0x11e   : > { %6105 = vmatmul.mubr.bf16.gmra.mxu0 %v4545_v20  ;;  %6233 = vmatmul.mubr.bf16.gmra.mxu1 %v4546_v42  ;;  %v9115_v58 = vcombine.low %v2611_v19, %v2625_v1  ;;  %v9117_v16 = vcombine.high %v2611_v19, %v2625_v1  ;;  %v2713_v3 = vrot.slane %v9028_v45, %v10548_v0 }
 0x11f   : > { %v4734_v34 = vcombine.low %v4699_v40, %v4727_v5  ;;  %v4730_v8 = vcombine.low %v11906_v59, %v4713_v6  ;;  %v4735_v39 = vcombine.high %v4699_v40, %v4727_v5  ;;  %v4731_v28 = vcombine.high %v11906_v59, %v4713_v6 }
 0x120   : > { %v9119_v10 = vcombine.low %v2618_v33, %v2632_v51  ;;  %v9121_v35 = vcombine.high %v2618_v33, %v2632_v51  ;;  %v4806_v48 = vrot.slane %v9115_v58, %v10548_v0  ;;  %v4820_v20 = vrot.slane %v9117_v16, %v10548_v0  ;;  %v11958_v51 = vpop.f32.mrf.mxu0  ;;  %v11960_v58 = vpop.f32.mrf.mxu1 }
 0x121   : > { %6112 = vmatprep.mubr.bf16.mxu0 %v4734_v34  ;;  %6240 = vmatprep.mubr.bf16.mxu1 %v4735_v39  ;;  %v2715_v42 = vcombine.low %v2706_v36, %v2713_v3  ;;  %v2863_v22 = vcombine.low %v14176_v41, %v11586_v55  ;;  %v9127_v40 = vcombine.high %v2861_v53, %v14177_v14  ;;  %v675_v59 = vshrl.u32 %v14178_v25, 16 }
 0x122   : > { %v4834_v23 = vrot.slane %v9119_v10, %v10548_v0  ;;  %v4848_v19 = vrot.slane %v9121_v35, %v10548_v0  ;;  %v4852_v1 = vcombine.high %v4806_v48, %v4820_v20  ;;  %v4851_v45 = vcombine.low %v4806_v48, %v4820_v20  ;;  %v14180_v20 = vld [vmem:[#allocation50_spill] sm:$0xff] }
 0x123   : > { %v2729_v5 = vrot.slane %v2715_v42, %v10548_v0  ;;  %v9129_v6 = vcombine.high %v11582_v11, %v2859_v21  ;;  %v9131_v33 = vcombine.high %v2863_v22, %v11579_v50  ;;  %v5005_v36 = vrot.slane %v9127_v40, %v10548_v0  ;;  %v14179_v50 = vld [vmem:[#allocation54_spill] sm:$0xff] }
 0x124   : > { %v4856_v53 = vcombine.high %v4834_v23, %v4848_v19  ;;  %v4884_v16 = vrot.slane %v4852_v1, %v10548_v0  ;;  %v4855_v3 = vcombine.low %v4834_v23, %v4848_v19  ;;  %v4870_v34 = vrot.slane %v4851_v45, %v10548_v0  ;;  %v11974_v19 = vpop.f32.mrf.mxu0  ;;  %v11976_v1 = vpop.f32.mrf.mxu1 }
 0x125   : > { %v9125_v39 = vcombine.low %v2729_v5, %v14177_v14  ;;  %v5019_v10 = vrot.slane %v9129_v6, %v10548_v0  ;;  %v5033_v11 = vrot.slane %v9131_v33, %v10548_v0  ;;  %v677_v21 = vor.u32 %v675_v59, %v14179_v50  ;;  %v10286_v14 = vld [vmem:[%s10490_s17 + $0x8c] sm:$0x3]  ;;  %s13840_s17 = scalar_lea.vmem %s13971_s1, %s8960_s8 }
 0x126   : > { %6113 = vmatmul.mubr.bf16.gmra.mxu0 %v4730_v8  ;;  %6241 = vmatmul.mubr.bf16.gmra.mxu1 %v4731_v28  ;;  %v4912_v35 = vrot.slane %v4856_v53, %v10548_v0  ;;  %v4898_v48 = vrot.slane %v4855_v3, %v10548_v0  ;;  %v2915_v42 = vcombine.low %v11918_v24, %v14180_v20  ;;  %v11990_v50 = vpop.f32.mrf.mxu0 }
 0x127   : > { %v4991_v41 = vrot.slane %v9125_v39, %v10548_v0  ;;  %v5041_v22 = vcombine.high %v5019_v10, %v5033_v11  ;;  %v5040_v40 = vcombine.low %v5019_v10, %v5033_v11  ;;  %v9032_v23 = vcombine.low %v10286_v14, %v677_v21  ;;  %v14181_v39 = vld [vmem:[#allocation3_spill] sm:$0xff]  ;;  %v11992_v21 = vpop.f32.mrf.mxu1 }
 0x128   : > { %v4919_v59 = vcombine.low %v4884_v16, %v4912_v35  ;;  %v4915_v8 = vcombine.low %v4870_v34, %v4898_v48  ;;  %v4920_v28 = vcombine.high %v4884_v16, %v4912_v35  ;;  %v4916_v45 = vcombine.high %v4870_v34, %v4898_v48 }
 0x129   : > { %v5037_v5 = vcombine.high %v4991_v41, %v5005_v36  ;;  %v5097_v6 = vrot.slane %v5041_v22, %v10548_v0  ;;  %v5036_v33 = vcombine.low %v4991_v41, %v5005_v36  ;;  %v5083_v24 = vrot.slane %v5040_v40, %v10548_v0 }
 0x12a   : > { %6120 = vmatprep.mubr.bf16.mxu0 %v4919_v59  ;;  %6248 = vmatprep.mubr.bf16.mxu1 %v4920_v28  ;;  %v2930_v53 = vrot.slane %v2915_v42, %v10548_v0  ;;  %v2937_v3 = vrot.slane %v9032_v23, %v10548_v0  ;;  %v817_v10 = vcombine.high %v14181_v39, %v14181_v39 }
 0x12b   : > { %v5069_v11 = vrot.slane %v5037_v5, %v10548_v0  ;;  %v5055_v16 = vrot.slane %v5036_v33, %v10548_v0  ;;  %v824_v34 = vrot.slane %v14181_v39, %v10548_v0  ;;  %v921_v36 = vrot.slane %v10618_v9, %v10548_v0 }
 0x12c   : > { %v2939_v35 = vcombine.low %v2930_v53, %v2937_v3  ;;  %v831_v48 = vrot.slane %v817_v10, %v10548_v0  ;;  %v1065_v42 = vcombine.high %v10884_v54, %v10884_v54  ;;  %v1072_v41 = vrot.slane %v10884_v54, %v10548_v0  ;;  %v12003_v3 = vpop.f32.mrf.mxu0  ;;  %v12005_v54 = vpop.f32.mrf.mxu1 }
 0x12d   : > { %v5104_v22 = vcombine.low %v5069_v11, %v5097_v6  ;;  %v5100_v40 = vcombine.low %v5055_v16, %v5083_v24  ;;  %v5105_v14 = vcombine.high %v5069_v11, %v5097_v6  ;;  %v5101_v23 = vcombine.high %v5055_v16, %v5083_v24  ;;  %v14182_v6 = vld [vmem:[#allocation57_spill] sm:$0xff] }
 0x12e   : > { %6121 = vmatmul.mubr.bf16.gmra.mxu0 %v4915_v8  ;;  %6249 = vmatmul.mubr.bf16.gmra.mxu1 %v4916_v45  ;;  %v2953_v9 = vrot.slane %v2939_v35, %v10548_v0  ;;  %v832_v59 = vcombine.high %v824_v34, %v824_v34  ;;  %v833_v28 = vcombine.high %v831_v48, %v831_v48 }
 0x12f   : > { %6128 = vmatprep.mubr.bf16.mxu0 %v5104_v22  ;;  %6256 = vmatprep.mubr.bf16.mxu1 %v5105_v14  ;;  %v840_v5 = vrot.slane %v824_v34, %v10548_v0  ;;  %v847_v33 = vrot.slane %v831_v48, %v10548_v0  ;;  %v928_v53 = vrot.slane %v921_v36, %v10548_v0  ;;  %v12017_v14 = vpop.f32.mrf.mxu0 }
 0x130   : > { %v2954_v24 = vcombine.low %v14182_v6, %v2953_v9  ;;  %v854_v8 = vrot.slane %v832_v59, %v10548_v0  ;;  %v861_v45 = vrot.slane %v833_v28, %v10548_v0  ;;  %v1079_v39 = vrot.slane %v1065_v42, %v10548_v0  ;;  %v12019_v9 = vpop.f32.mrf.mxu1 }
 0x131   : > { %v1080_v10 = vcombine.high %v1072_v41, %v1072_v41  ;;  %v1088_v11 = vrot.slane %v1072_v41, %v10548_v0  ;;  %v9376_v16 = vadd.f32 %v11823_v56, %v11799_v57  ;;  %v9464_v34 = vadd.f32 %v11825_v49, %v11801_v52 }
 0x132   : > { %v9133_v36 = vcombine.high %v11586_v55, %v2954_v24  ;;  %v3256_v35 = vcombine.low %v840_v5, %v854_v8  ;;  %v9042_v48 = vcombine.high %v840_v5, %v854_v8  ;;  %v3258_v22 = vcombine.low %v847_v33, %v861_v45 }
 0x133   : > { %v9043_v59 = vcombine.high %v847_v33, %v861_v45  ;;  %v1081_v42 = vcombine.high %v1079_v39, %v1079_v39  ;;  %v1095_v28 = vrot.slane %v1079_v39, %v10548_v0  ;;  %v1102_v41 = vrot.slane %v1080_v10, %v10548_v0  ;;  %v12030_v39 = vpop.f32.mrf.mxu0  ;;  %v12032_v10 = vpop.f32.mrf.mxu1 }
 0x134   : > { %v5170_v57 = vrot.slane %v9133_v36, %v10548_v0  ;;  %v3266_v56 = vrot.slane %v3256_v35, %v10548_v0  ;;  %v3273_v52 = vrot.slane %v9042_v48, %v10548_v0  ;;  %v3280_v55 = vrot.slane %v3258_v22, %v10548_v0  ;;  %14183 = vst [vmem:[#allocation7_spill] sm:$0xff] %v12032_v10  ;;  %v14184_v36 = vld [vmem:[#allocation51_spill] sm:$0xff] }
 0x135   : > { %v3287_v49 = vrot.slane %v9043_v59, %v10548_v0  ;;  %v1109_v5 = vrot.slane %v1081_v42, %v10548_v0  ;;  %v1110_v6 = vcombine.high %v1088_v11, %v1088_v11  ;;  %v1111_v24 = vcombine.high %v1095_v28, %v1095_v28  ;;  %v12038_v42 = vld [vmem:[%s13973_s3] ss:$0 sm:$0xff] }
 0x136   : > { %6129 = vmatmul.mubr.bf16.gmra.mxu0 %v5100_v40  ;;  %6257 = vmatmul.mubr.bf16.gmra.mxu1 %v5101_v23  ;;  %v5172_v33 = vcombine.high %v5170_v57, %v5170_v57  ;;  %v5186_v8 = vrot.slane %v5170_v57, %v10548_v0  ;;  %v3288_v45 = vcombine.low %v3266_v56, %v3273_v52 }
 0x137   : > { %v3289_v48 = vcombine.low %v3280_v55, %v3287_v49  ;;  %v1112_v22 = vcombine.high %v1102_v41, %v1102_v41  ;;  %v3441_v20 = vcombine.low %v928_v53, %v1088_v11  ;;  %v3442_v59 = vcombine.low %v1102_v41, %v1110_v6  ;;  %v12049_v6 = vpop.f32.mrf.mxu0 }
 0x138   : > { %v5200_v40 = vrot.slane %v5172_v33, %v10548_v0  ;;  %v5202_v23 = vcombine.high %v5186_v8, %v5186_v8  ;;  %v3296_v57 = vrot.slane %v3288_v45, %v10548_v0  ;;  %v3444_v56 = vcombine.low %v1109_v5, %v1111_v24  ;;  %v12051_v33 = vpop.f32.mrf.mxu1 }
 0x139   : > { %v3303_v52 = vrot.slane %v3289_v48, %v10548_v0  ;;  %v3443_v10 = vcombine.low %v1112_v22, %v1095_v28  ;;  %v3451_v35 = vrot.slane %v3441_v20, %v10548_v0  ;;  %v3458_v55 = vrot.slane %v3442_v59, %v10548_v0  ;;  %v14185_v59 = vld [vmem:[#allocation6_spill] sm:$0xff] }
 0x13a   : > { %6136 = vmatprep.mubr.bf16.mxu0 %v5200_v40  ;;  %v5204_v53 = vcombine.high %v5200_v40, %v5200_v40  ;;  %v3472_v11 = vrot.slane %v3444_v56, %v10548_v0  ;;  %v5795_v41 = vadd.f32 %v9376_v16, %v12038_v42  ;;  %v9379_v49 = vadd.f32 %v11860_v26, %v11841_v7  ;;  %v12072_v56 = vpop.f32.mrf.mxu1 }
 0x13b   : > { %v3304_v24 = vcombine.low %v3296_v57, %v3303_v52  ;;  %v3465_v28 = vrot.slane %v3443_v10, %v10548_v0  ;;  %v3473_v45 = vcombine.low %v3451_v35, %v3458_v55  ;;  %v1113_v20 = vcombine.high %v1109_v5, %v1109_v5  ;;  %v12070_v35 = vpop.f32.mrf.mxu0 }
 0x13c   : > { %6264 = vmatprep.mubr.bf16.mxu1 %v5204_v53  ;;  %v12054_v48 = vadd.f32 %v9464_v34, %v5795_v41  ;;  %v5798_v22 = vadd.f32 %v9379_v49, %v12038_v42  ;;  %v1169_v16 = vrot.slane %v10868_v27, %v10548_v0  ;;  %v1297_v7 = vcombine.high %v14185_v59, %v14185_v59 }
 0x13d   : > { %v3474_v26 = vcombine.low %v3465_v28, %v3472_v11  ;;  %v3481_v40 = vrot.slane %v3473_v45, %v10548_v0  ;;  %v1304_v57 = vrot.slane %v14185_v59, %v10548_v0  ;;  %v9467_v5 = vadd.f32 %v11862_v13, %v11843_v32  ;;  %v12092_v59 = vpop.f32.mrf.mxu0 }
 0x13e   : > { %6137 = vmatmul.mubr.bf16.gmra.mxu0 %v5186_v8  ;;  %6265 = vmatmul.mubr.bf16.gmra.mxu1 %v5202_v23  ;;  %v1176_v34 = vrot.slane %v1169_v16, %v10548_v0  ;;  %v1311_v10 = vrot.slane %v1297_v7, %v10548_v0  ;;  %v1393_v27 = vrot.slane %v10887_v43, %v10548_v0  ;;  %v12094_v7 = vpop.f32.mrf.mxu1 }
 0x13f   : > { %10018 = vmatprep.mubr.bf16.mxu0 %v3304_v24  ;;  %v3488_v55 = vrot.slane %v3474_v26, %v10548_v0  ;;  %v1312_v53 = vcombine.high %v1304_v57, %v1304_v57  ;;  %v1320_v32 = vrot.slane %v1304_v57, %v10548_v0  ;;  %v12077_v13 = vadd.f32 %v9467_v5, %v5798_v22 }
 0x140   : > { %v1313_v8 = vcombine.high %v1311_v10, %v1311_v10  ;;  %v1327_v23 = vrot.slane %v1311_v10, %v10548_v0  ;;  %v3626_v11 = vcombine.low %v1113_v20, %v1176_v34  ;;  %v1400_v43 = vrot.slane %v1393_v27, %v10548_v0 }
 0x141   : > { %v3489_v41 = vcombine.low %v3481_v40, %v3488_v55  ;;  %v1334_v49 = vrot.slane %v1312_v53, %v10548_v0  ;;  %v1521_v28 = vcombine.high %v11106_v31, %v11106_v31  ;;  %v1528_v24 = vrot.slane %v11106_v31, %v10548_v0 }
 0x142   : > { %v1341_v45 = vrot.slane %v1313_v8, %v10548_v0  ;;  %v3636_v22 = vrot.slane %v3626_v11, %v10548_v0  ;;  %v9382_v16 = vadd.f32 %v11890_v37, %v11875_v29  ;;  %v9470_v20 = vadd.f32 %v11892_v63, %v11877_v18  ;;  %v12105_v11 = vpop.f32.mrf.mxu0 }
 0x143   : > { %v3627_v26 = vcombine.low %v1320_v32, %v1334_v49  ;;  %v9060_v40 = vcombine.high %v1320_v32, %v1334_v49  ;;  %v1535_v57 = vrot.slane %v1521_v28, %v10548_v0  ;;  %v1536_v5 = vcombine.high %v1528_v24, %v1528_v24 }
 0x144   : > { %v3629_v31 = vcombine.low %v1327_v23, %v1341_v45  ;;  %v1544_v34 = vrot.slane %v1528_v24, %v10548_v0  ;;  %v9069_v10 = vcombine.high %v1327_v23, %v1341_v45  ;;  %v5803_v27 = vadd.f32 %v9382_v16, %v12038_v42  ;;  %v12107_v23 = vpop.f32.mrf.mxu1 }
 0x145   : > { %v3643_v29 = vrot.slane %v3627_v26, %v10548_v0  ;;  %v3650_v37 = vrot.slane %v9060_v40, %v10548_v0  ;;  %v1551_v18 = vrot.slane %v1535_v57, %v10548_v0  ;;  %v1558_v63 = vrot.slane %v1536_v5, %v10548_v0 }
 0x146   : > { %10019 = vmatmul.mubr.bf16.vlgmr.msra.gmra.mxu0 %v3489_v41  ;;  %v3657_v55 = vrot.slane %v3629_v31, %v10548_v0  ;;  %v1566_v53 = vcombine.high %v1544_v34, %v1544_v34  ;;  %v3812_v32 = vcombine.low %v1400_v43, %v1544_v34  ;;  %v3821_v8 = vrot.slane %v9069_v10, %v10548_v0  ;;  %v10213_v41 = vld [vmem:[%s13974_s4 + $0x78] sm:$0xff]  }
 0x147   : > { %v3658_v49 = vcombine.low %v3636_v22, %v3643_v29  ;;  %v1568_v28 = vcombine.high %v1558_v63, %v1558_v63  ;;  %v12109_v24 = vadd.f32 %v9470_v20, %v5803_v27  ;;  %v9385_v45 = vadd.f32 %v11926_v12, %v11908_v61  ;;  %v10214_v43 = vld [vmem:[%s13974_s4 + $0x38] sm:$0xff]   ;;  %9730 = vmatprep.subr.bf16.mxu1 %v10213_v41  ;;  %v12125_v29 = vpop.f32.mrf.mxu0 }
 0x148   : > { %v3659_v16 = vcombine.low %v3650_v37, %v3657_v55  ;;  %v3813_v26 = vcombine.low %v1558_v63, %v1566_v53  ;;  %v3828_v40 = vrot.slane %v3812_v32, %v10548_v0  ;;  %v1537_v5 = vcombine.high %v1535_v57, %v1535_v57  ;;  %v12127_v37 = vpop.f32.mrf.mxu1  ;;  %9731 = vmatpush3.bf16.msra.mxu1 %v10214_v43 }
 0x149   : > { %v3666_v22 = vrot.slane %v3658_v49, %v10548_v0  ;;  %v3814_v20 = vcombine.low %v1568_v28, %v1551_v18  ;;  %v5806_v31 = vadd.f32 %v9385_v45, %v12038_v42  ;;  %v1567_v34 = vcombine.high %v1551_v18, %v1551_v18  ;;  %v14186_v18 = vld [vmem:[#allocation21_spill] sm:$0xff] }
 0x14a   : > { %v3673_v61 = vrot.slane %v3659_v16, %v10548_v0  ;;  %v3835_v12 = vrot.slane %v3813_v26, %v10548_v0  ;;  %v3843_v10 = vcombine.low %v3821_v8, %v3828_v40  ;;  %v1565_v27 = vrot.slane %v1537_v5, %v10548_v0 }
 0x14b   : > { %v3842_v57 = vrot.slane %v3814_v20, %v10548_v0  ;;  %v1617_v63 = vrot.slane %v14146_v15, %v10548_v0  ;;  %v1752_v55 = vrot.slane %v14186_v18, %v10548_v0  ;;  %v9473_v53 = vadd.f32 %v11928_v62, %v11910_v47 }
 0x14c   : > { %v3674_v32 = vcombine.low %v3666_v22, %v3673_v61  ;;  %v3851_v8 = vrot.slane %v3843_v10, %v10548_v0  ;;  %v1569_v49 = vcombine.high %v1565_v27, %v1565_v27  ;;  %v3996_v28 = vcombine.low %v1565_v27, %v1567_v34  ;;  %v12146_v62 = vpop.f32.mrf.mxu0 }
 0x14d   : > { %v3844_v45 = vcombine.low %v3835_v12, %v3842_v57  ;;  %v1624_v41 = vrot.slane %v1617_v63, %v10548_v0  ;;  %v1760_v43 = vcombine.high %v1752_v55, %v1752_v55  ;;  %v1768_v16 = vrot.slane %v1752_v55, %v10548_v0  ;;  %v12148_v5 = vpop.f32.mrf.mxu1 }
 0x14e   : > { %10022 = vmatprep.mubr.bf16.mxu0 %v3674_v32  ;;  %v4006_v15 = vrot.slane %v3996_v28, %v10548_v0  ;;  %v12140_v26 = vadd.f32 %v9473_v53, %v5806_v31  ;;  %v1745_v40 = vcombine.high %v14186_v18, %v14186_v18  ;;  %v1841_v47 = vrot.slane %v14159_v46, %v10548_v0  ;;  %v12160_v27 = vpop.f32.mrf.mxu0 }
 0x14f   : > { %v3858_v22 = vrot.slane %v3844_v45, %v10548_v0  ;;  %v1782_v20 = vrot.slane %v1760_v43, %v10548_v0  ;;  %v3997_v34 = vcombine.low %v1569_v49, %v1624_v41  ;;  %v1976_v61 = vrot.slane %v11261_v2, %v10548_v0  ;;  %v12162_v57 = vpop.f32.mrf.mxu1  ;;  %v10215_v43 = vld [vmem:[%s13974_s4 + $0x70] sm:$0xff]  }
 0x150   : > { %v1759_v31 = vrot.slane %v1745_v40, %v10548_v0  ;;  %v1848_v12 = vrot.slane %v1841_v47, %v10548_v0  ;;  %v9388_v10 = vadd.f32 %v11958_v51, %v11942_v38  ;;  %v9476_v46 = vadd.f32 %v11960_v58, %v11944_v60  ;;  %v12167_v41 = vpop.f32.mrf.mxu0  ;;  %9732 = vmatprep.subr.bf16.mxu1 %v10215_v43 }
 0x151   : > { %v3859_v63 = vcombine.low %v3851_v8, %v3858_v22  ;;  %v3998_v18 = vcombine.low %v1768_v16, %v1782_v20  ;;  %v9078_v55 = vcombine.high %v1768_v16, %v1782_v20  ;;  %v4013_v53 = vrot.slane %v3997_v34, %v10548_v0  ;;  %v12169_v38 = vpop.f32.mrf.mxu1  ;;  %v10216_v16 = vld [vmem:[%s13974_s4 + $0x30] sm:$0xff]  }
 0x152   : > { %v1761_v32 = vcombine.high %v1759_v31, %v1759_v31  ;;  %v1775_v49 = vrot.slane %v1759_v31, %v10548_v0  ;;  %v1984_v28 = vcombine.high %v1976_v61, %v1976_v61  ;;  %v1992_v45 = vrot.slane %v1976_v61, %v10548_v0  ;;  %9733 = vmatpush3.bf16.msra.mxu1 %v10216_v16 }
 0x153   : > { %10023 = vmatmul.mubr.bf16.gmra.mxu0 %v3859_v63  ;;  %v4020_v60 = vrot.slane %v3998_v18, %v10548_v0  ;;  %v4027_v51 = vrot.slane %v9078_v55, %v10548_v0  ;;  %v4028_v58 = vcombine.low %v4006_v15, %v4013_v53  ;;  %v5811_v8 = vadd.f32 %v9388_v10, %v12038_v42  ;;  %v12187_v10 = vpop.f32.mrf.mxu0  ;;  %v12189_v63 = vpop.f32.mrf.mxu1 }
 0x154   : > { %v1789_v40 = vrot.slane %v1761_v32, %v10548_v0  ;;  %v2006_v47 = vrot.slane %v1984_v28, %v10548_v0  ;;  %v2014_v22 = vcombine.high %v1992_v45, %v1992_v45  ;;  %v4183_v20 = vcombine.low %v1848_v12, %v1992_v45 }
 0x155   : > { %v4029_v34 = vcombine.low %v4020_v60, %v4027_v51  ;;  %v4036_v61 = vrot.slane %v4028_v58, %v10548_v0  ;;  %v12183_v15 = vadd.f32 %v9476_v46, %v5811_v8  ;;  %v9391_v31 = vadd.f32 %v11990_v50, %v11974_v19  ;;  %v14187_v8 = vld [vmem:[#allocation38_spill] sm:$0xff] }
 0x156   : > { %v4181_v18 = vcombine.low %v1775_v49, %v1789_v40  ;;  %v9087_v55 = vcombine.high %v1775_v49, %v1789_v40  ;;  %v4184_v53 = vcombine.low %v2006_v47, %v2014_v22  ;;  %v4205_v32 = vrot.slane %v4183_v20, %v10548_v0 }
 0x157   : > { %v4043_v12 = vrot.slane %v4029_v34, %v10548_v0  ;;  %v5814_v28 = vadd.f32 %v9391_v31, %v12038_v42  ;;  %v1969_v46 = vcombine.high %v11261_v2, %v11261_v2  ;;  %v2016_v45 = vcombine.high %v2006_v47, %v2006_v47 }
 0x158   : > { %v4191_v19 = vrot.slane %v4181_v18, %v10548_v0  ;;  %v4198_v50 = vrot.slane %v9087_v55, %v10548_v0  ;;  %v4212_v60 = vrot.slane %v4184_v53, %v10548_v0  ;;  %v2065_v49 = vrot.slane %v14163_v44, %v10548_v0  ;;  %v12206_v2 = vpop.f32.mrf.mxu0  ;;  %v12208_v40 = vpop.f32.mrf.mxu1 }
 0x159   : > { %v4044_v51 = vcombine.low %v4036_v61, %v4043_v12  ;;  %v1983_v58 = vrot.slane %v1969_v46, %v10548_v0  ;;  %v2200_v43 = vrot.slane %v14187_v8, %v10548_v0  ;;  %v9479_v16 = vadd.f32 %v11992_v21, %v11976_v1 }
 0x15a   : > { %v4213_v47 = vcombine.low %v4191_v19, %v4198_v50  ;;  %v4214_v22 = vcombine.low %v4205_v32, %v4212_v60  ;;  %v2072_v20 = vrot.slane %v2065_v49, %v10548_v0  ;;  %v2193_v44 = vcombine.high %v14187_v8, %v14187_v8  ;;  %v12215_v55 = vpop.f32.mrf.mxu0  ;;  %v12217_v1 = vpop.f32.mrf.mxu1 }
 0x15b   : > { %10026 = vmatprep.mubr.bf16.mxu0 %v4044_v51  ;;  %v1985_v34 = vcombine.high %v1983_v58, %v1983_v58  ;;  %v1999_v61 = vrot.slane %v1983_v58, %v10548_v0  ;;  %v2208_v31 = vcombine.high %v2200_v43, %v2200_v43  ;;  %v2216_v18 = vrot.slane %v2200_v43, %v10548_v0 }
 0x15c   : > { %v4221_v21 = vrot.slane %v4213_v47, %v10548_v0  ;;  %v4228_v53 = vrot.slane %v4214_v22, %v10548_v0  ;;  %v12221_v32 = vadd.f32 %v9479_v16, %v5814_v28  ;;  %v2207_v12 = vrot.slane %v2193_v44, %v10548_v0  ;;  %v12230_v16 = vpop.f32.mrf.mxu0  ;;  %v12232_v44 = vpop.f32.mrf.mxu1 }
 0x15d   : > { %v2013_v46 = vrot.slane %v1985_v34, %v10548_v0  ;;  %v2015_v19 = vcombine.high %v1999_v61, %v1999_v61  ;;  %v2230_v50 = vrot.slane %v2208_v31, %v10548_v0  ;;  %v4366_v60 = vcombine.low %v2016_v45, %v1999_v61  ;;  %v10217_v45 = vld [vmem:[%s13974_s4 + $0x68] sm:$0xff]  }
 0x15e   : > { %14188 = vst [vmem:[#allocation15_spill] sm:$0xff] %v12221_v32  ;;  %v4229_v49 = vcombine.low %v4221_v21, %v4228_v53  ;;  %v2209_v51 = vcombine.high %v2207_v12, %v2207_v12  ;;  %v2223_v58 = vrot.slane %v2207_v12, %v10548_v0  ;;  %v2289_v8 = vrot.slane %v11329_v4, %v10548_v0  ;;  %v10218_v34 = vld [vmem:[%s13974_s4 + $0x28] sm:$0xff]  }
 0x15f   : > { %v2017_v43 = vcombine.high %v2013_v46, %v2013_v46  ;;  %v4367_v47 = vcombine.low %v2013_v46, %v2015_v19  ;;  %v4369_v22 = vcombine.low %v2216_v18, %v2230_v50  ;;  %v4376_v28 = vrot.slane %v4366_v60, %v10548_v0  ;;  %9734 = vmatprep.subr.bf16.mxu1 %v10217_v45 }
 0x160   : > { %10027 = vmatmul.mubr.bf16.gmra.mxu0 %v4229_v49  ;;  %v2237_v4 = vrot.slane %v2209_v51, %v10548_v0  ;;  %v2296_v61 = vrot.slane %v2289_v8, %v10548_v0  ;;  %v2424_v31 = vrot.slane %v11454_v17, %v10548_v0  ;;  %v9104_v21 = vcombine.high %v2216_v18, %v2230_v50  ;;  %v12254_v50 = vpop.f32.mrf.mxu0 }
 0x161   : > { %v4368_v53 = vcombine.low %v2017_v43, %v2072_v20  ;;  %v4383_v12 = vrot.slane %v4367_v47, %v10548_v0  ;;  %v4397_v46 = vrot.slane %v4369_v22, %v10548_v0  ;;  %v9394_v19 = vadd.f32 %v12017_v14, %v12003_v3  ;;  %9735 = vmatpush3.bf16.msra.mxu1 %v10218_v34  ;;  %v12256_v43 = vpop.f32.mrf.mxu1 }
 0x162   : > { %v2440_v60 = vrot.slane %v2424_v31, %v10548_v0  ;;  %v4552_v49 = vcombine.low %v2223_v58, %v2237_v4  ;;  %v9105_v52 = vcombine.high %v2223_v58, %v2237_v4  ;;  %v4561_v51 = vrot.slane %v9104_v21, %v10548_v0 }
 0x163   : > { %v4390_v8 = vrot.slane %v4368_v53, %v10548_v0  ;;  %v4398_v32 = vcombine.low %v4376_v28, %v4383_v12  ;;  %v5819_v20 = vadd.f32 %v9394_v19, %v12038_v42  ;;  %v9482_v18 = vadd.f32 %v12019_v9, %v12005_v54  ;;  %v14189_v19 = vld [vmem:[#allocation7_spill] sm:$0xff] }
 0x164   : > { %v4554_v3 = vcombine.low %v2296_v61, %v2440_v60  ;;  %v4568_v14 = vrot.slane %v4552_v49, %v10548_v0  ;;  %v4575_v58 = vrot.slane %v9105_v52, %v10548_v0  ;;  %v9397_v47 = vadd.f32 %v12049_v6, %v12030_v39  ;;  %v12273_v6 = vpop.f32.mrf.mxu0 }
 0x165   : > { %v4399_v22 = vcombine.low %v4390_v8, %v4397_v46  ;;  %v4406_v28 = vrot.slane %v4398_v32, %v10548_v0  ;;  %v12263_v45 = vadd.f32 %v9482_v18, %v5819_v20  ;;  %v2417_v54 = vcombine.high %v11454_v17, %v11454_v17  ;;  %v12275_v32 = vpop.f32.mrf.mxu1 }
 0x166   : > { %v4582_v9 = vrot.slane %v4554_v3, %v10548_v0  ;;  %v4583_v34 = vcombine.low %v4561_v51, %v4568_v14  ;;  %v5822_v4 = vadd.f32 %v9397_v47, %v12038_v42  ;;  %v2432_v61 = vcombine.high %v2424_v31, %v2424_v31  ;;  %v14190_v47 = vld [vmem:[#allocation52_spill] sm:$0xff] }
 0x167   : > { %v4413_v21 = vrot.slane %v4399_v22, %v10548_v0  ;;  %v2431_v52 = vrot.slane %v2417_v54, %v10548_v0  ;;  %v2462_v53 = vcombine.high %v2440_v60, %v2440_v60  ;;  %v2513_v39 = vrot.slane %v11443_v30, %v10548_v0  ;;  %v12293_v54 = vpop.f32.mrf.mxu1 }
 0x168   : > { %v4584_v12 = vcombine.low %v4575_v58, %v4582_v9  ;;  %v4591_v17 = vrot.slane %v4583_v34, %v10548_v0  ;;  %v2454_v46 = vrot.slane %v2432_v61, %v10548_v0  ;;  %v9485_v31 = vadd.f32 %v12051_v33, %v14189_v19  ;;  %v10219_v9 = vld [vmem:[%s13974_s4 + $0x60] sm:$0xff]  }
 0x169   : > { %v4414_v49 = vcombine.low %v4406_v28, %v4413_v21  ;;  %v2433_v51 = vcombine.high %v2431_v52, %v2431_v52  ;;  %v2447_v8 = vrot.slane %v2431_v52, %v10548_v0  ;;  %v2520_v60 = vrot.slane %v2513_v39, %v10548_v0  ;;  %v12291_v28 = vpop.f32.mrf.mxu0  ;;  %v10220_v34 = vld [vmem:[%s13974_s4 + $0x20] sm:$0xff]   ;;  %9736 = vmatprep.subr.bf16.mxu1 %v10219_v9 }
 0x16a   : > { %v4598_v30 = vrot.slane %v4584_v12, %v10548_v0  ;;  %v2464_v20 = vcombine.high %v2454_v46, %v2454_v46  ;;  %v4736_v18 = vcombine.low %v2454_v46, %v2462_v53  ;;  %v12284_v3 = vadd.f32 %v9485_v31, %v5822_v4  ;;  %9737 = vmatpush3.bf16.msra.mxu1 %v10220_v34  ;;  %v14193_v9 = vld [vmem:[#allocation50_spill] sm:$0xff] }
 0x16b   : > { %10030 = vmatprep.mubr.bf16.mxu0 %v4414_v49  ;;  %v2461_v14 = vrot.slane %v2433_v51, %v10548_v0  ;;  %v2463_v58 = vcombine.high %v2447_v8, %v2447_v8  ;;  %v2641_v22 = vcombine.high %v14190_v47, %v14190_v47  ;;  %v2648_v33 = vrot.slane %v14190_v47, %v10548_v0 }
 0x16c   : > { %v4599_v4 = vcombine.low %v4591_v17, %v4598_v30  ;;  %v4737_v61 = vcombine.low %v2464_v20, %v2447_v8  ;;  %v4746_v21 = vrot.slane %v4736_v18, %v10548_v0  ;;  %v9400_v52 = vadd.f32 %v12092_v59, %v12070_v35  ;;  %v12312_v30 = vpop.f32.mrf.mxu0  ;;  %v12314_v20 = vpop.f32.mrf.mxu1 }
 0x16d   : > { %v2465_v53 = vcombine.high %v2461_v14, %v2461_v14  ;;  %v4738_v39 = vcombine.low %v2461_v14, %v2463_v58  ;;  %v2655_v12 = vrot.slane %v2641_v22, %v10548_v0  ;;  %v2656_v46 = vcombine.high %v2648_v33, %v2648_v33 }
 0x16e   : > { %10031 = vmatmul.mubr.bf16.gmra.mxu0 %v4599_v4  ;;  %v4753_v19 = vrot.slane %v4737_v61, %v10548_v0  ;;  %v2664_v31 = vrot.slane %v2648_v33, %v10548_v0  ;;  %v5827_v49 = vadd.f32 %v9400_v52, %v12038_v42  ;;  %v9488_v17 = vadd.f32 %v12094_v7, %v12072_v56 }
 0x16f   : > { %v4739_v51 = vcombine.low %v2465_v53, %v2520_v60  ;;  %v4760_v8 = vrot.slane %v4738_v39, %v10548_v0  ;;  %v2657_v35 = vcombine.high %v2655_v12, %v2655_v12  ;;  %v2671_v59 = vrot.slane %v2655_v12, %v10548_v0  ;;  %v12333_v12 = vpop.f32.mrf.mxu0 }
 0x170   : > { %v4768_v18 = vcombine.low %v4746_v21, %v4753_v19  ;;  %v2678_v14 = vrot.slane %v2656_v46, %v10548_v0  ;;  %v12317_v58 = vadd.f32 %v9488_v17, %v5827_v49  ;;  %v9403_v47 = vadd.f32 %v12125_v29, %v12105_v11  ;;  %v12335_v46 = vpop.f32.mrf.mxu1 }
 0x171   : > { %v4767_v56 = vrot.slane %v4739_v51, %v10548_v0  ;;  %v2685_v7 = vrot.slane %v2657_v35, %v10548_v0  ;;  %v14191_v60 = vrot.slane %v14178_v25, 1  ;;  %v14192_v22 = vrot.slane %v14184_v36, 1 }
 0x172   : > { %v2737_v34 = vrot.slane %v14193_v9, %v10548_v0  ;;  %v4776_v4 = vrot.slane %v4768_v18, %v10548_v0  ;;  %v4921_v61 = vcombine.low %v2664_v31, %v2678_v14  ;;  %v9122_v21 = vcombine.high %v2664_v31, %v2678_v14 }
 0x173   : > { %v680_v33 = vsel %vm14073_vm0, %v14192_v22, %v14191_v60  ;;  %v5830_v52 = vadd.f32 %v9403_v47, %v12038_v42  ;;  %v4769_v11 = vcombine.low %v4760_v8, %v4767_v56  ;;  %v4923_v29 = vcombine.low %v2671_v59, %v2685_v7 }
 0x174   : > { %v9123_v53 = vcombine.high %v2671_v59, %v2685_v7  ;;  %v2744_v39 = vrot.slane %v2737_v34, %v10548_v0  ;;  %v4931_v36 = vrot.slane %v4921_v61, %v10548_v0  ;;  %v4938_v19 = vrot.slane %v9122_v21, %v10548_v0 }
 0x175   : > { %v2865_v49 = vcombine.high %v680_v33, %v680_v33  ;;  %v2872_v17 = vrot.slane %v680_v33, %v10548_v0  ;;  %v4783_v31 = vrot.slane %v4769_v11, %v10548_v0  ;;  %v4945_v51 = vrot.slane %v4923_v29, %v10548_v0 }
 0x176   : > { %v4952_v8 = vrot.slane %v9123_v53, %v10548_v0  ;;  %v9491_v35 = vadd.f32 %v12127_v37, %v12107_v23  ;;  %v4953_v59 = vcombine.low %v4931_v36, %v4938_v19  ;;  %v14194_v22 = vrot.slane %v14178_v25, 1  ;;  %v12352_v9 = vpop.f32.mrf.mxu0  ;;  %v12354_v34 = vpop.f32.mrf.mxu1  ;;  %v10221_v23 = vld [vmem:[%s13974_s4 + $0x58] sm:$0xff]  }
 0x177   : > { %v2879_v18 = vrot.slane %v2865_v49, %v10548_v0  ;;  %v2880_v14 = vcombine.high %v2872_v17, %v2872_v17  ;;  %v2888_v47 = vrot.slane %v2872_v17, %v10548_v0  ;;  %v4784_v56 = vcombine.low %v4776_v4, %v4783_v31  ;;  %v10222_v37 = vld [vmem:[%s13974_s4 + $0x18] sm:$0xff]   ;;  %9738 = vmatprep.subr.bf16.mxu1 %v10221_v23 }
 0x178   : > { %v4954_v7 = vcombine.low %v4945_v51, %v4952_v8  ;;  %v12347_v60 = vadd.f32 %v9491_v35, %v5830_v52  ;;  %v2961_v33 = vrot.slane %v14194_v22, %v10548_v0  ;;  %v4961_v4 = vrot.slane %v4953_v59, %v10548_v0  ;;  %v9423_v36 = vpop.f32.mrf.mxu0  ;;  %v9511_v19 = vpop.f32.mrf.mxu1  ;;  %9739 = vmatpush3.bf16.msra.mxu1 %v10222_v37 }
 0x179   : > { %v2881_v61 = vcombine.high %v2879_v18, %v2879_v18  ;;  %v2895_v21 = vrot.slane %v2879_v18, %v10548_v0  ;;  %v2902_v25 = vrot.slane %v2880_v14, %v10548_v0  ;;  %10034 = vmatprep.mubr.bf16.mxu0 %v4784_v56  ;;  %v2910_v11 = vcombine.high %v2888_v47, %v2888_v47 }
 0x17a   : > { %v4968_v52 = vrot.slane %v4954_v7, %v10548_v0  ;;  %v5106_v29 = vcombine.low %v2744_v39, %v2888_v47  ;;  %v2968_v53 = vrot.slane %v2961_v33, %v10548_v0  ;;  %v9406_v51 = vadd.f32 %v12160_v27, %v12146_v62  ;;  %v9425_v39 = vpop.f32.mrf.mxu0  ;;  %v9513_v14 = vpop.f32.mrf.mxu1 }
 0x17b   : > { %v2909_v49 = vrot.slane %v2881_v61, %v10548_v0  ;;  %v2911_v17 = vcombine.high %v2895_v21, %v2895_v21  ;;  %v2912_v31 = vcombine.high %v2902_v25, %v2902_v25  ;;  %v5107_v35 = vcombine.low %v2902_v25, %v2910_v11 }
 0x17c   : > { %v4969_v8 = vcombine.low %v4961_v4, %v4968_v52  ;;  %v5116_v59 = vrot.slane %v5106_v29, %v10548_v0  ;;  %v9494_v18 = vadd.f32 %v12162_v57, %v12148_v5  ;;  %v5835_v22 = vadd.f32 %v9406_v51, %v12038_v42  ;;  %v9426_v57 = vpop.f32.mrf.mxu0  ;;  %v9514_v23 = vpop.f32.mrf.mxu1 }
 0x17d   : > { %v5108_v47 = vcombine.low %v2912_v31, %v2895_v21  ;;  %v5109_v56 = vcombine.low %v2909_v49, %v2911_v17  ;;  %v2913_v7 = vcombine.high %v2909_v49, %v2909_v49  ;;  %v5123_v33 = vrot.slane %v5107_v35, %v10548_v0 }
 0x17e   : > { %10035 = vmatmul.mubr.bf16.gmra.mxu0 %v4969_v8  ;;  %v9409_v62 = vadd.f32 %v12187_v10, %v12167_v41  ;;  %v9497_v27 = vadd.f32 %v12189_v63, %v12169_v38  ;;  %v9412_v5 = vadd.f32 %v12215_v55, %v12206_v2  ;;  %v12383_v21 = vadd.f32 %v9494_v18, %v5835_v22  ;;  %v9428_v10 = vpop.f32.mrf.mxu0  ;;  %v9516_v63 = vpop.f32.mrf.mxu1  ;;  %v10226_v22 = vld [vmem:[%s13974_s4 + $0xb8] sm:$0xff]  }
 0x17f   : > { %v5130_v37 = vrot.slane %v5108_v47, %v10548_v0  ;;  %v5137_v4 = vrot.slane %v5109_v56, %v10548_v0  ;;  %v5205_v61 = vcombine.low %v2913_v7, %v2968_v53  ;;  %v5138_v25 = vcombine.low %v5116_v59, %v5123_v33 }
 0x180   : > { %v5838_v52 = vadd.f32 %v9409_v62, %v12038_v42  ;;  %v5843_v41 = vadd.f32 %v9412_v5, %v12038_v42  ;;  %v9500_v38 = vadd.f32 %v12217_v1, %v12208_v40  ;;  %v9415_v11 = vadd.f32 %v12254_v50, %v12230_v16  ;;  %v9429_v1 = vpop.f32.mrf.mxu0  ;;  %v9517_v31 = vpop.f32.mrf.mxu1 }
 0x181   : > { %v5139_v2 = vcombine.low %v5130_v37, %v5137_v4  ;;  %v5212_v55 = vrot.slane %v5205_v61, %v10548_v0  ;;  %v9503_v29 = vadd.f32 %v12256_v43, %v12232_v44  ;;  %v5146_v53 = vrot.slane %v5138_v25, %v10548_v0 }
 0x182   : > { %v12395_v49 = vadd.f32 %v9497_v27, %v5838_v52  ;;  %v12397_v17 = vadd.f32 %v9500_v38, %v5843_v41  ;;  %v9418_v40 = vadd.f32 %v12291_v28, %v12273_v6  ;;  %v5846_v16 = vadd.f32 %v9415_v11, %v12038_v42  ;;  %v9431_v28 = vpop.f32.mrf.mxu0  ;;  %v9519_v59 = vpop.f32.mrf.mxu1  ;;  %v10227_v38 = vld [vmem:[%s13974_s4 + $0xf0] sm:$0xff]  }
 0x183   : > { %v5153_v51 = vrot.slane %v5139_v2, %v10548_v0  ;;  %v5219_v8 = vrot.slane %v5212_v55, %v10548_v0  ;;  %v9506_v44 = vadd.f32 %v12293_v54, %v12275_v32  ;;  %v9421_v43 = vadd.f32 %v12333_v12, %v12312_v30  ;;  %v10223_v0 = vld [vmem:[%s13974_s4 + $0x50] sm:$0xff]  }
 0x184   : > { %v5851_v50 = vadd.f32 %v9418_v40, %v12038_v42  ;;  %v9509_v35 = vadd.f32 %v12335_v46, %v12314_v20  ;;  %v9424_v6 = vadd.f32 %v9423_v36, %v12352_v9  ;;  %v10224_v32 = vld [vmem:[%s13974_s4 + $0x10] sm:$0xff]   ;;  %v12418_v18 = vadd.f32 %v9503_v29, %v5846_v16  ;;  %v10225_v20 = vld [vmem:[%s13974_s4 + $0xf8] sm:$0xff]   ;;  %v9432_v56 = vpop.f32.mrf.mxu0  ;;  %v9520_v7 = vpop.f32.mrf.mxu1  ;;  %9740 = vmatprep.subr.bf16.mxu1 %v10223_v0 }
 0x185   : > { %v5154_v54 = vcombine.low %v5146_v53, %v5153_v51  ;;  %v9512_v30 = vadd.f32 %v9511_v19, %v12354_v34  ;;  %v9427_v12 = vadd.f32 %v9426_v57, %v9425_v39  ;;  %v5854_v9 = vadd.f32 %v9421_v43, %v12038_v42  ;;  %9741 = vmatpush3.bf16.msra.mxu1 %v10224_v32 }
 0x186   : > { %v12424_v46 = vadd.f32 %v9506_v44, %v5851_v50  ;;  %v5859_v36 = vadd.f32 %v9424_v6, %v12038_v42  ;;  %v9515_v47 = vadd.f32 %v9514_v23, %v9513_v14  ;;  %v9430_v19 = vadd.f32 %v9429_v1, %v9428_v10  ;;  %9794 = vmatprep.subr.bf16.mxu0 %v10225_v20  ;;  %v10228_v10 = vld [vmem:[%s13974_s4 + $0xb0] sm:$0xff]   ;;  %v10230_v6 = vld [vmem:[%s13974_s4 + $0xe8] sm:$0xff]   ;;  %v10233_v20 = vld [vmem:[%s13974_s4 + $0xe0] sm:$0xff]  }
 0x187   : > { %10038 = vmatprep.mubr.bf16.mxu0 %v5154_v54  ;;  %v5862_v34 = vadd.f32 %v9427_v12, %v12038_v42  ;;  %v9518_v39 = vadd.f32 %v9517_v31, %v9516_v63  ;;  %v9433_v33 = vadd.f32 %v9432_v56, %v9431_v28  ;;  %v12432_v62 = vadd.f32 %v9509_v35, %v5854_v9  ;;  %v10229_v35 = vld [vmem:[%s13974_s4 + $0x48] sm:$0xff]  }
 0x188   : > { %10039 = vmatmul.mubr.bf16.gmra.mxu0 %v5219_v8  ;;  %v12434_v27 = vadd.f32 %v9512_v30, %v5859_v36  ;;  %v9521_v5 = vadd.f32 %v9520_v7, %v9519_v59  ;;  %v5867_v57 = vadd.f32 %v9430_v19, %v12038_v42  ;;  %v10231_v28 = vld [vmem:[%s13974_s4 + $0x8] sm:$0xff]   ;;  %9742 = vmatprep.subr.bf16.mxu1 %v10229_v35  ;;  %v10234_v36 = vld [vmem:[%s13974_s4 + $0xa0] sm:$0xff]  }
 0x189   : > { %v12436_v14 = vadd.f32 %v9515_v47, %v5862_v34  ;;  %v5870_v23 = vadd.f32 %v9433_v33, %v12038_v42  ;;  %9795 = vmatpush3.bf16.msra.mxu0 %v10226_v22  ;;  %v10232_v54 = vld [vmem:[%s13974_s4 + $0xa8] sm:$0xff]   ;;  %9743 = vmatpush3.bf16.msra.mxu1 %v10231_v28  ;;  %v10236_v33 = vld [vmem:[%s13974_s4 + $0x98] sm:$0xff]  }
 0x18a   : > { %v12440_v37 = vadd.f32 %v9518_v39, %v5867_v57  ;;  %9796 = vmatprep.subr.bf16.mxu0 %v10227_v38  ;;  %v10241_v35 = vld [vmem:[%s13974_s4 + $0xc8] sm:$0xff]  }
 0x18b   : > { %v12442_v4 = vadd.f32 %v9521_v5, %v5870_v23 }
 0x18d   : > { %9797 = vmatpush3.bf16.msra.mxu0 %v10228_v10 }
 0x18e   : > { %9798 = vmatprep.subr.bf16.mxu0 %v10230_v6 }
 0x191   : > { %9799 = vmatpush3.bf16.msra.mxu0 %v10232_v54 }
 0x192   : > { %9800 = vmatprep.subr.bf16.mxu0 %v10233_v20 }
 0x195   : > { %9801 = vmatpush3.bf16.msra.mxu0 %v10234_v36 }
 0x196   : > { %v9434_v61 = vpop.f32.mrf.mxu0  ;;  %v9522_v25 = vpop.f32.mrf.mxu1 }
 0x198   : > { %v9435_v52 = vpop.f32.mrf.mxu0  ;;  %v9523_v41 = vpop.f32.mrf.mxu1 }
 0x199   : > { %v9436_v63 = vadd.f32 %v9435_v52, %v9434_v61  ;;  %v9524_v2 = vadd.f32 %v9523_v41, %v9522_v25 }
 0x19a   : > { %v9437_v55 = vpop.f32.mrf.mxu0  ;;  %v9525_v11 = vpop.f32.mrf.mxu1 }
 0x19b   : > { %v5875_v29 = vadd.f32 %v9436_v63, %v12038_v42 }
 0x19c   : > { %v9438_v53 = vpop.f32.mrf.mxu0  ;;  %v9526_v40 = vpop.f32.mrf.mxu1 }
 0x19d   : > { %v12451_v1 = vadd.f32 %v9524_v2, %v5875_v29  ;;  %v9439_v31 = vadd.f32 %v9438_v53, %v9437_v55  ;;  %v9527_v51 = vadd.f32 %v9526_v40, %v9525_v11  ;;  %v10237_v29 = vld [vmem:[%s13974_s4 + $0x40] sm:$0xff]   ;;  %v10238_v53 = vld [vmem:[%s13974_s4 + $0xd0] sm:$0xff]  }
 0x19e   : > { %v9440_v8 = vpop.f32.mrf.mxu0  ;;  %v9528_v16 = vpop.f32.mrf.mxu1  ;;  %9744 = vmatprep.subr.bf16.mxu1 %v10237_v29 }
 0x19f   : > { %v5878_v44 = vadd.f32 %v9439_v31, %v12038_v42 }
 0x1a0   : > { %v9441_v50 = vpop.f32.mrf.mxu0  ;;  %v9529_v43 = vpop.f32.mrf.mxu1 }
 0x1a1   : > { %v12463_v59 = vadd.f32 %v9527_v51, %v5878_v44  ;;  %v9442_v0 = vadd.f32 %v9441_v50, %v9440_v8  ;;  %v9530_v32 = vadd.f32 %v9529_v43, %v9528_v16  ;;  %v10240_v51 = vld [vmem:[%s13974_s4 + $0x90] sm:$0xff]  }
 0x1a2   : > { %v9443_v30 = vpop.f32.mrf.mxu0  ;;  %v9531_v12 = vpop.f32.mrf.mxu1 }
 0x1a3   : > { %v5883_v9 = vadd.f32 %v9442_v0, %v12038_v42  ;;  %v10235_v42 = vld [vmem:[%s13974_s4 + $0xd8] sm:$0xff]   ;;  %v10242_v0 = vld [vmem:[%s13974_s4 + $0x88] sm:$0xff]  }
 0x1a4   : > { %v9444_v47 = vpop.f32.mrf.mxu0  ;;  %v9532_v56 = vpop.f32.mrf.mxu1  ;;  %9802 = vmatprep.subr.bf16.mxu0 %v10235_v42 }
 0x1a5   : > { %v12475_v7 = vadd.f32 %v9530_v32, %v5883_v9  ;;  %9803 = vmatpush3.bf16.msra.mxu0 %v10236_v33  ;;  %v10243_v9 = vld [vmem:[%s13974_s4 + $0xc0] sm:$0xff]  }
 0x1a6   : > { %v9550_v22 = vpop.f32.mrf.mxu0  ;;  %v9638_v34 = vpop.f32.mrf.mxu1  ;;  %9804 = vmatprep.subr.bf16.mxu0 %v10238_v53  ;;  %v10244_v56 = vld [vmem:[%s13974_s4 + $0x80] sm:$0xff]  }
 0x1a8   : > { %v9551_v19 = vpop.f32.mrf.mxu0  ;;  %v9639_v39 = vpop.f32.mrf.mxu1 }
 0x1a9   : > { %v9552_v5 = vadd.f32 %v9551_v19, %v9550_v22  ;;  %v9640_v57 = vadd.f32 %v9639_v39, %v9638_v34  ;;  %9805 = vmatpush3.bf16.msra.mxu0 %v10240_v51 }
 0x1aa   : > { %v9553_v23 = vpop.f32.mrf.mxu0  ;;  %v9641_v61 = vpop.f32.mrf.mxu1  ;;  %9806 = vmatprep.subr.bf16.mxu0 %v10241_v35 }
 0x1ab   : > { %v6051_v25 = vadd.f32 %v9552_v5, %v12054_v48  ;;  %v10239_v48 = vld [vmem:[%s13974_s4] sm:$0xff]  }
 0x1ac   : > { %v9554_v52 = vpop.f32.mrf.mxu0  ;;  %v9642_v41 = vpop.f32.mrf.mxu1  ;;  %9745 = vmatpush3.bf16.msra.mxu1 %v10239_v48 }
 0x1ad   : > { %v9555_v38 = vadd.f32 %v9554_v52, %v9553_v23  ;;  %v9643_v10 = vadd.f32 %v9642_v41, %v9641_v61  ;;  %v12484_v63 = vadd.f32 %v9640_v57, %v6051_v25  ;;  %9807 = vmatpush3.bf16.msra.mxu0 %v10242_v0  ;;  %v14195_v41 = vld [vmem:[#allocation15_spill] sm:$0xff] }
 0x1ae   : > { %v9556_v2 = vpop.f32.mrf.mxu0  ;;  %v9644_v55 = vpop.f32.mrf.mxu1  ;;  %9808 = vmatprep.subr.bf16.mxu0 %v10243_v9 }
 0x1af   : > { %v6054_v11 = vadd.f32 %v9555_v38, %v12077_v13 }
 0x1b0   : > { %v9557_v40 = vpop.f32.mrf.mxu0  ;;  %v9645_v31 = vpop.f32.mrf.mxu1 }
 0x1b1   : > { %v9558_v8 = vadd.f32 %v9557_v40, %v9556_v2  ;;  %v9646_v13 = vadd.f32 %v9645_v31, %v9644_v55  ;;  %v12499_v16 = vadd.f32 %v9643_v10, %v6054_v11  ;;  %9809 = vmatpush3.bf16.msra.mxu0 %v10244_v56  ;;  %v10245_v40 = vld [vmem:[%s13974_s4 + $0x178] sm:$0xff]  }
 0x1b2   : > { %v9559_v44 = vpop.f32.mrf.mxu0  ;;  %v9647_v50 = vpop.f32.mrf.mxu1  ;;  %9858 = vmatprep.subr.bf16.mxu1 %v10245_v40 }
 0x1b3   : > { %v6059_v43 = vadd.f32 %v9558_v8, %v12109_v24 }
 0x1b4   : > { %v9560_v6 = vpop.f32.mrf.mxu0  ;;  %v9648_v28 = vpop.f32.mrf.mxu1 }
 0x1b5   : > { %v9561_v32 = vadd.f32 %v9560_v6, %v9559_v44  ;;  %v9649_v54 = vadd.f32 %v9648_v28, %v9647_v50  ;;  %v12508_v30 = vadd.f32 %v9646_v13, %v6059_v43 }
 0x1b6   : > { %v9562_v12 = vpop.f32.mrf.mxu0  ;;  %v9650_v20 = vpop.f32.mrf.mxu1 }
 0x1b7   : > { %v6062_v24 = vadd.f32 %v9561_v32, %v12140_v26 }
 0x1b8   : > { %v9563_v36 = vpop.f32.mrf.mxu0  ;;  %v9651_v47 = vpop.f32.mrf.mxu1 }
 0x1b9   : > { %v9564_v22 = vadd.f32 %v9563_v36, %v9562_v12  ;;  %v9652_v34 = vadd.f32 %v9651_v47, %v9650_v20  ;;  %v12517_v19 = vadd.f32 %v9649_v54, %v6062_v24 }
 0x1ba   : > { %v9565_v39 = vpop.f32.mrf.mxu0  ;;  %v9653_v42 = vpop.f32.mrf.mxu1 }
 0x1bb   : > { %v6067_v26 = vadd.f32 %v9564_v22, %v12183_v15 }
 0x1bc   : > { %v9566_v33 = vpop.f32.mrf.mxu0  ;;  %v9654_v5 = vpop.f32.mrf.mxu1 }
 0x1bd   : > { %v9567_v57 = vadd.f32 %v9566_v33, %v9565_v39  ;;  %v9655_v23 = vadd.f32 %v9654_v5, %v9653_v42  ;;  %v12520_v61 = vadd.f32 %v9652_v34, %v6067_v26 }
 0x1be   : > { %v9568_v25 = vpop.f32.mrf.mxu0  ;;  %v9656_v52 = vpop.f32.mrf.mxu1 }
 0x1bf   : > { %v6070_v38 = vadd.f32 %v9567_v57, %v14195_v41 }
 0x1c0   : > { %v9569_v10 = vpop.f32.mrf.mxu0  ;;  %v9657_v2 = vpop.f32.mrf.mxu1 }
 0x1c1   : > { %v9570_v55 = vadd.f32 %v9569_v10, %v9568_v25  ;;  %v9658_v11 = vadd.f32 %v9657_v2, %v9656_v52  ;;  %v12523_v29 = vadd.f32 %v9655_v23, %v6070_v38 }
 0x1c2   : > { %v9571_v53 = vpop.f32.mrf.mxu0  ;;  %v9659_v48 = vpop.f32.mrf.mxu1 }
 0x1c3   : > { %v6075_v15 = vadd.f32 %v9570_v55, %v12263_v45 }
 0x1c4   : > { %v9572_v31 = vpop.f32.mrf.mxu0  ;;  %v9660_v51 = vpop.f32.mrf.mxu1 }
 0x1c5   : > { %v9573_v8 = vadd.f32 %v9572_v31, %v9571_v53  ;;  %v9661_v13 = vadd.f32 %v9660_v51, %v9659_v48  ;;  %v12529_v44 = vadd.f32 %v9658_v11, %v6075_v15 }
 0x1c6   : > { %v9574_v50 = vpop.f32.mrf.mxu0  ;;  %v9662_v43 = vpop.f32.mrf.mxu1 }
 0x1c7   : > { %v6078_v35 = vadd.f32 %v9573_v8, %v12284_v3 }
 0x1c8   : > { %v9575_v6 = vpop.f32.mrf.mxu0  ;;  %v9663_v28 = vpop.f32.mrf.mxu1 }
 0x1c9   : > { %v9576_v0 = vadd.f32 %v9575_v6, %v9574_v50  ;;  %v9664_v32 = vadd.f32 %v9663_v28, %v9662_v43  ;;  %v12532_v45 = vadd.f32 %v9661_v13, %v6078_v35 }
 0x1ca   : > { %v9577_v54 = vpop.f32.mrf.mxu0  ;;  %v9665_v12 = vpop.f32.mrf.mxu1 }
 0x1cb   : > { %v6083_v20 = vadd.f32 %v9576_v0, %v12317_v58 }
 0x1cc   : > { %v9578_v24 = vpop.f32.mrf.mxu0  ;;  %v9666_v9 = vpop.f32.mrf.mxu1 }
 0x1cd   : > { %v9579_v36 = vadd.f32 %v9578_v24, %v9577_v54  ;;  %v9667_v47 = vadd.f32 %v9666_v9, %v9665_v12  ;;  %v12535_v56 = vadd.f32 %v9664_v32, %v6083_v20 }
 0x1ce   : > { %v9580_v22 = vpop.f32.mrf.mxu0  ;;  %v9668_v34 = vpop.f32.mrf.mxu1 }
 0x1cf   : > { %v6086_v3 = vadd.f32 %v9579_v36, %v12347_v60 }
 0x1d0   : > { %v9581_v39 = vpop.f32.mrf.mxu0  ;;  %v9669_v42 = vpop.f32.mrf.mxu1 }
 0x1d1   : > { %v9582_v26 = vadd.f32 %v9581_v39, %v9580_v22  ;;  %v9670_v33 = vadd.f32 %v9669_v42, %v9668_v34  ;;  %v12538_v5 = vadd.f32 %v9667_v47, %v6086_v3 }
 0x1d2   : > { %v9583_v57 = vpop.f32.mrf.mxu0  ;;  %v9671_v23 = vpop.f32.mrf.mxu1 }
 0x1d3   : > { %v6091_v58 = vadd.f32 %v9582_v26, %v12383_v21 }
 0x1d4   : > { %v9584_v25 = vpop.f32.mrf.mxu0  ;;  %v9672_v52 = vpop.f32.mrf.mxu1 }
 0x1d5   : > { %v9585_v41 = vadd.f32 %v9584_v25, %v9583_v57  ;;  %v9673_v38 = vadd.f32 %v9672_v52, %v9671_v23  ;;  %v12541_v10 = vadd.f32 %v9670_v33, %v6091_v58 }
 0x1d6   : > { %v9586_v2 = vpop.f32.mrf.mxu0  ;;  %v9674_v55 = vpop.f32.mrf.mxu1 }
 0x1d7   : > { %v6094_v60 = vadd.f32 %v9585_v41, %v12395_v49  ;;  %v10253_v41 = vld [vmem:[%s13974_s4 + $0x1f8] sm:$0xff]  }
 0x1d8   : > { %v9587_v11 = vpop.f32.mrf.mxu0  ;;  %v9675_v53 = vpop.f32.mrf.mxu1  ;;  %9922 = vmatprep.subr.bf16.mxu0 %v10253_v41  ;;  %v14196_v41 = vld [vmem:[#allocation2_spill] sm:$0xff] }
 0x1d9   : > { %v9588_v48 = vadd.f32 %v9587_v11, %v9586_v2  ;;  %v9676_v15 = vadd.f32 %v9675_v53, %v9674_v55  ;;  %v12544_v40 = vadd.f32 %v9673_v38, %v6094_v60 }
 0x1da   : > { %v9589_v31 = vpop.f32.mrf.mxu0  ;;  %v9677_v51 = vpop.f32.mrf.mxu1 }
 0x1db   : > { %v6099_v21 = vadd.f32 %v9588_v48, %v12397_v17 }
 0x1dc   : > { %v9590_v8 = vpop.f32.mrf.mxu0  ;;  %v9678_v13 = vpop.f32.mrf.mxu1 }
 0x1dd   : > { %v9591_v50 = vadd.f32 %v9590_v8, %v9589_v31  ;;  %v9679_v43 = vadd.f32 %v9678_v13, %v9677_v51  ;;  %v12547_v35 = vadd.f32 %v9676_v15, %v6099_v21 }
 0x1de   : > { %v9592_v6 = vpop.f32.mrf.mxu0  ;;  %v9680_v28 = vpop.f32.mrf.mxu1 }
 0x1df   : > { %v6102_v49 = vadd.f32 %v9591_v50, %v12418_v18 }
 0x1e0   : > { %v9593_v0 = vpop.f32.mrf.mxu0  ;;  %v9681_v32 = vpop.f32.mrf.mxu1 }
 0x1e1   : > { %v9594_v54 = vadd.f32 %v9593_v0, %v9592_v6  ;;  %v9682_v12 = vadd.f32 %v9681_v32, %v9680_v28  ;;  %v12550_v20 = vadd.f32 %v9679_v43, %v6102_v49 }
 0x1e2   : > { %v9595_v24 = vpop.f32.mrf.mxu0  ;;  %v9683_v9 = vpop.f32.mrf.mxu1 }
 0x1e3   : > { %v6107_v17 = vadd.f32 %v9594_v54, %v12424_v46 }
 0x1e4   : > { %v9596_v36 = vpop.f32.mrf.mxu0  ;;  %v9684_v47 = vpop.f32.mrf.mxu1 }
 0x1e5   : > { %v9597_v22 = vadd.f32 %v9596_v36, %v9595_v24  ;;  %v9685_v34 = vadd.f32 %v9684_v47, %v9683_v9  ;;  %v12553_v3 = vadd.f32 %v9682_v12, %v6107_v17 }
 0x1e6   : > { %v9598_v39 = vpop.f32.mrf.mxu0  ;;  %v9686_v42 = vpop.f32.mrf.mxu1 }
 0x1e7   : > { %v6110_v18 = vadd.f32 %v9597_v22, %v12432_v62 }
 0x1e8   : > { %v9599_v26 = vpop.f32.mrf.mxu0  ;;  %v9687_v33 = vpop.f32.mrf.mxu1 }
 0x1e9   : > { %v9600_v57 = vadd.f32 %v9599_v26, %v9598_v39  ;;  %v9688_v23 = vadd.f32 %v9687_v33, %v9686_v42  ;;  %v12556_v58 = vadd.f32 %v9685_v34, %v6110_v18 }
 0x1ea   : > { %v9601_v25 = vpop.f32.mrf.mxu0  ;;  %v9689_v52 = vpop.f32.mrf.mxu1 }
 0x1eb   : > { %v6115_v46 = vadd.f32 %v9600_v57, %v12434_v27  ;;  %v10328_v57 = vmov 1983009808  }
 0x1ec   : > { %v9602_v38 = vpop.f32.mrf.mxu0  ;;  %v9690_v2 = vpop.f32.mrf.mxu1 }
 0x1ed   : > { %v9603_v55 = vadd.f32 %v9602_v38, %v9601_v25  ;;  %v9691_v60 = vadd.f32 %v9690_v2, %v9689_v52  ;;  %v12562_v11 = vadd.f32 %v9688_v23, %v6115_v46  ;;  %v6494_v23 = vunpack.c.l.s4 %v10328_v57 }
 0x1ee   : > { %v9604_v62 = vpop.f32.mrf.mxu0  ;;  %v9692_v53 = vpop.f32.mrf.mxu1 }
 0x1ef   : > { %v6118_v48 = vadd.f32 %v9603_v55, %v12436_v14 }
 0x1f0   : > { %v9605_v15 = vpop.f32.mrf.mxu0  ;;  %v9693_v31 = vpop.f32.mrf.mxu1 }
 0x1f1   : > { %v9606_v51 = vadd.f32 %v9605_v15, %v9604_v62  ;;  %v9694_v21 = vadd.f32 %v9693_v31, %v9692_v53  ;;  %v12565_v27 = vadd.f32 %v9691_v60, %v6118_v48  ;;  %v6495_v62 = vunpack.c.0.s8 %v6494_v23 }
 0x1f2   : > { %v9607_v8 = vpop.f32.mrf.mxu0  ;;  %v9695_v13 = vpop.f32.mrf.mxu1  ;;  %v6876_v15 = vstv %s9207_s11 }
 0x1f3   : > { %v6123_v50 = vadd.f32 %v9606_v51, %v12440_v37  ;;  %vm6893_vm2 = vcmp.ge.s32.totalorder %v6876_v15, 0  ;;  %vm6903_vm3 = vcmp.lt.s32.totalorder %v6876_v15, 16 }
 0x1f4   : > { %v9608_v43 = vpop.f32.mrf.mxu0  ;;  %v9696_v6 = vpop.f32.mrf.mxu1  ;;  %vm12606_vm8 = vmand %vm6893_vm2, %vm6903_vm3 }
 0x1f5   : > { %v9609_v28 = vadd.f32 %v9608_v43, %v9607_v8  ;;  %v9697_v49 = vadd.f32 %v9696_v6, %v9695_v13  ;;  %v12568_v0 = vadd.f32 %v9694_v21, %v6123_v50  ;;  %v12587_v21 = vadd.s32 1, %v6876_v15 }
 0x1f6   : > { %v9610_v32 = vpop.f32.mrf.mxu0  ;;  %v9698_v54 = vpop.f32.mrf.mxu1  ;;  %v12592_v50 = vsub.s32 %v6495_v62, %v14196_v41  ;;  %v12596_v6 = vadd.s32 4294967295, %v14196_v41 }
 0x1f7   : > { %v6126_v14 = vadd.f32 %v9609_v28, %v12442_v4  ;;  %vm6894_vm5 = vcmp.ge.s32.totalorder %v12587_v21, 0  ;;  %vm6904_vm6 = vcmp.lt.s32.totalorder %v12587_v21, 16  ;;  %v12601_v28 = vadd.s32 2, %v6876_v15 }
 0x1f8   : > { %v9611_v12 = vpop.f32.mrf.mxu0  ;;  %v9699_v24 = vpop.f32.mrf.mxu1  ;;  %vm14072_vm10 = vcmp.ge.s32.totalorder %v12596_v6, 0  ;;  %vm12645_vm14 = vmand %vm6894_vm5, %vm6904_vm6 }
 0x1f9   : > { %v9612_v9 = vadd.f32 %v9611_v12, %v9610_v32  ;;  %v9700_v17 = vadd.f32 %v9699_v24, %v9698_v54  ;;  %v12571_v36 = vadd.f32 %v9697_v49, %v6126_v14  ;;  %v12604_v54 = vadd.s32 3, %v6876_v15  ;;  %vm12661_vm1 = vmand %vm12645_vm14, %vm14072_vm10 }
 0x1fa   : > { %v9613_v47 = vpop.f32.mrf.mxu0  ;;  %v9701_v22 = vpop.f32.mrf.mxu1  ;;  %v12610_v12 = vadd.s32 4, %v6876_v15  ;;  %v12612_v24 = vadd.s32 5, %v6876_v15 }
 0x1fb   : > { %v6131_v37 = vadd.f32 %v9612_v9, %v12451_v1  ;;  %v6889_v1 = vadd.s32 16, %v14196_v41  ;;  %v12614_v9 = vadd.s32 6, %v6876_v15 }
 0x1fc   : > { %v9614_v34 = vpop.f32.mrf.mxu0  ;;  %v9702_v39 = vpop.f32.mrf.mxu1 }
 0x1fd   : > { %v9615_v42 = vadd.f32 %v9614_v34, %v9613_v47  ;;  %v9703_v18 = vadd.f32 %v9702_v39, %v9701_v22  ;;  %v12577_v26 = vadd.f32 %v9700_v17, %v6131_v37  ;;  %v12585_v51 = vadd.s32 4294967295, %v6889_v1 }
 0x1fe   : > { %v9616_v4 = vpop.f32.mrf.mxu0  ;;  %v9704_v33 = vpop.f32.mrf.mxu1  ;;  %v12616_v17 = vadd.s32 7, %v6876_v15 }
 0x1ff   : > { %v6134_v25 = vadd.f32 %v9615_v42, %v12463_v59  ;;  %vm6958_vm4 = vcmp.lt.s32.totalorder %v12585_v51, 16  ;;  %v12621_v42 = vadd.s32 8, %v6876_v15 }
 0x200   : > { %v9617_v52 = vpop.f32.mrf.mxu0  ;;  %v9705_v46 = vpop.f32.mrf.mxu1  ;;  %14199 = vst [vmem:[#allocation9_spill] sm:$0xff] %v12616_v17  ;;  %vm6961_vm11 = vmand %vm12606_vm8, %vm6958_vm4 }
 0x201   : > { %v9618_v38 = vadd.f32 %v9617_v52, %v9616_v4  ;;  %v9706_v2 = vadd.f32 %v9705_v46, %v9704_v33  ;;  %v12582_v55 = vadd.f32 %v9703_v18, %v6134_v25  ;;  %14200 = vst [vmem:[#allocation12_spill] sm:$0xff] %v12621_v42  ;;  %v12623_v18 = vadd.s32 9, %v6876_v15 }
 0x202   : > { %v9619_v60 = vpop.f32.mrf.mxu0  ;;  %v9707_v53 = vpop.f32.mrf.mxu1 }
 0x203   : > { %v6139_v48 = vadd.f32 %v9618_v38, %v12475_v7  ;;  %14201 = vst [vmem:[#allocation10_spill] sm:$0xff] %v12623_v18 }
 0x204   : > { %v9620_v31 = vpop.f32.mrf.mxu0  ;;  %v9708_v59 = vpop.f32.mrf.mxu1 }
 0x205   : > { %v12589_v8 = vadd.f32 %v9706_v2, %v6139_v48 }
 0x206   : > { %v10020_v13 = vpop.f32.mrf.mxu0 }
 0x207   : > { %v6315_v43 = vadd.f32 %v10020_v13, %v12508_v30  ;;  %v10248_v30 = vld [vmem:[%s13974_s4 + $0x130] sm:$0xff]  }
 0x208   : > { %v6306_v7 = vpop.f32.mrf.mxu0 }
 0x209   : > { %vm6402_vm7 = vcmp.gt.f32.partialorder %v6315_v43, 0.0  ;;  %v6425_v49 = vmul.f32 0.2, %v6315_v43  ;;  %v6307_v32 = vadd.f32 %v6306_v7, %v12484_v63 }
 0x20a   : > { %v10021_v14 = vpop.f32.mrf.mxu0 }
 0x20b   : > { %v6448_v47 = vsel %vm6402_vm7, %v6315_v43, %v6425_v49  ;;  %vm6400_vm9 = vcmp.gt.f32.partialorder %v6307_v32, 0.0  ;;  %v6423_v22 = vmul.f32 0.2, %v6307_v32  ;;  %v6318_v63 = vadd.f32 %v10021_v14, %v12517_v19 }
 0x20c   : > { %v6526_v37 = vcombine.high %v6448_v47, %v6448_v47  ;;  %v6533_v34 = vrot.slane %v6448_v47, %v12592_v50  ;;  %v6309_v39 = vpop.f32.mrf.mxu0 }
 0x20d   : > { %v6446_v4 = vsel %vm6400_vm9, %v6307_v32, %v6423_v22  ;;  %vm6403_vm12 = vcmp.gt.f32.partialorder %v6318_v63, 0.0  ;;  %v6426_v33 = vmul.f32 0.2, %v6318_v63  ;;  %v6310_v19 = vadd.f32 %v6309_v39, %v12499_v16  ;;  %vm9287_vm9 = vmpackc.low %vm12645_vm14, %vm12661_vm1 }
 0x20e   : > { %v6540_v57 = vrot.slane %v6526_v37, %v12592_v50  ;;  %v6541_v23 = vcombine.high %v6533_v34, %v6533_v34  ;;  %v7089_v25 = vrot.slane %v6533_v34, %v12592_v50  ;;  %v6492_v52 = vcombine.high %v6446_v4, %v6446_v4 }
 0x20f   : > { %v6499_v46 = vrot.slane %v6446_v4, %v12592_v50  ;;  %v6449_v41 = vsel %vm6403_vm12, %v6318_v63, %v6426_v33  ;;  %vm6401_vm13 = vcmp.gt.f32.partialorder %v6310_v19, 0.0  ;;  %v6424_v1 = vmul.f32 0.2, %v6310_v19 }
 0x210   : > { %v7090_v38 = vcombine.low %v6541_v23, %v6540_v57  ;;  %v12633_v2 = vsel %vm6961_vm11, %v7089_v25, 0.0  ;;  %v6506_v60 = vrot.slane %v6492_v52, %v12592_v50  ;;  %v6542_v62 = vcombine.high %v6540_v57, %v6540_v57 }
 0x211   : > { %v6507_v16 = vcombine.high %v6499_v46, %v6499_v46  ;;  %v6543_v48 = vcombine.high %v6449_v41, %v6449_v41  ;;  %v6550_v15 = vrot.slane %v6449_v41, %v12592_v50  ;;  %v6447_v59 = vsel %vm6401_vm13, %v6310_v19, %v6424_v1  ;;  %vm12759_vm13 = vmand %vm12606_vm8, %vm14072_vm10 }
 0x212   : > { %v6508_v31 = vcombine.high %v6506_v60, %v6506_v60  ;;  %v7098_v13 = vrot.slane %v7090_v38, %v12592_v50  ;;  %v6509_v37 = vcombine.high %v6447_v59, %v6447_v59  ;;  %v6516_v34 = vrot.slane %v6447_v59, %v12592_v50 }
 0x213   : > { %v7049_v7 = vcombine.low %v6499_v46, %v6507_v16  ;;  %v6557_v49 = vrot.slane %v6543_v48, %v12592_v50  ;;  %v6558_v32 = vcombine.high %v6550_v15, %v6550_v15  ;;  %v7091_v14 = vcombine.low %v6542_v62, %v6550_v15  ;;  %v10024_v47 = vpop.f32.mrf.mxu0 }
 0x214   : > { %v7050_v63 = vcombine.low %v6506_v60, %v6508_v31  ;;  %v6331_v39 = vadd.f32 %v10024_v47, %v12529_v44  ;;  %v6523_v25 = vrot.slane %v6509_v37, %v12592_v50  ;;  %v6524_v52 = vcombine.high %v6516_v34, %v6516_v34 }
 0x215   : > { %v7057_v4 = vrot.slane %v7049_v7, %v12592_v50  ;;  %v12652_v33 = vcombine.low %v6558_v32, %v6557_v49  ;;  %v6322_v19 = vpop.f32.mrf.mxu0  ;;  %v6559_v57 = vcombine.high %v6557_v49, %v6557_v49  ;;  %v7105_v23 = vrot.slane %v7091_v14, %v12592_v50 }
 0x216   : > { %v7064_v21 = vrot.slane %v7050_v63, %v12592_v50  ;;  %vm6406_vm15 = vcmp.gt.f32.partialorder %v6331_v39, 0.0  ;;  %v6429_v46 = vmul.f32 0.2, %v6331_v39  ;;  %v6323_v41 = vadd.f32 %v6322_v19, %v12520_v61 }
 0x217   : > { %v10025_v1 = vpop.f32.mrf.mxu0  ;;  %v12666_v38 = vcombine.low %v7098_v13, %v7105_v23  ;;  %v7115_v60 = vrot.slane %v12652_v33, %v12592_v50  ;;  %v6525_v16 = vcombine.high %v6523_v25, %v6523_v25  ;;  %v7066_v48 = vcombine.low %v6516_v34, %v6524_v52 }
 0x218   : > { %v12670_v62 = vcombine.low %v7057_v4, %v7064_v21  ;;  %v6334_v15 = vadd.f32 %v10025_v1, %v12532_v45  ;;  %v6452_v31 = vsel %vm6406_vm15, %v6331_v39, %v6429_v46  ;;  %vm6404_vm2 = vcmp.gt.f32.partialorder %v6323_v41, 0.0 }
 0x219   : > { %v6427_v59 = vmul.f32 0.2, %v6323_v41  ;;  %v6325_v7 = vpop.f32.mrf.mxu0  ;;  %v12676_v61 = vsel %vm12661_vm1, %v12666_v38, 0.0  ;;  %v7067_v13 = vcombine.low %v6523_v25, %v6525_v16  ;;  %v7074_v49 = vrot.slane %v7066_v48, %v12592_v50 }
 0x21a   : > { %v6594_v32 = vcombine.high %v6452_v31, %v6452_v31  ;;  %v6601_v14 = vrot.slane %v6452_v31, %v12592_v50  ;;  %vm6407_vm3 = vcmp.gt.f32.partialorder %v6334_v15, 0.0  ;;  %v6430_v63 = vmul.f32 0.2, %v6334_v15 }
 0x21b   : > { %v6450_v47 = vsel %vm6404_vm2, %v6323_v41, %v6427_v59  ;;  %v6326_v45 = vadd.f32 %v6325_v7, %v12523_v29  ;;  %v7081_v37 = vrot.slane %v7067_v13, %v12592_v50  ;;  %v14211_v18 = vrot.slane %v12633_v2, 1 }
 0x21c   : > { %v12683_v34 = vrot.slane %v6594_v32, %v12592_v50  ;;  %v6609_v39 = vcombine.high %v6601_v14, %v6601_v14  ;;  %v6560_v4 = vcombine.high %v6450_v47, %v6450_v47  ;;  %v6567_v33 = vrot.slane %v6450_v47, %v12592_v50 }
 0x21d   : > { %v6453_v19 = vsel %vm6407_vm3, %v6334_v15, %v6430_v63  ;;  %vm6405_vm5 = vcmp.gt.f32.partialorder %v6326_v45, 0.0  ;;  %v6428_v23 = vmul.f32 0.2, %v6326_v45  ;;  %v12686_v21 = vcombine.low %v7074_v49, %v7081_v37 }
 0x21e   : > { %v12688_v25 = vcombine.low %v6601_v14, %v6609_v39  ;;  %v6574_v29 = vrot.slane %v6560_v4, %v12592_v50  ;;  %v6575_v46 = vcombine.high %v6567_v33, %v6567_v33  ;;  %v7108_v41 = vcombine.low %v6559_v57, %v6567_v33 }
 0x21f   : > { %v6610_v1 = vcombine.high %v12683_v34, %v12683_v34  ;;  %v6611_v16 = vcombine.high %v6453_v19, %v6453_v19  ;;  %v6618_v59 = vrot.slane %v6453_v19, %v12592_v50  ;;  %v6451_v32 = vsel %vm6405_vm5, %v6326_v45, %v6428_v23 }
 0x220   : > { %v6576_v31 = vcombine.high %v6574_v29, %v6574_v29  ;;  %v10028_v7 = vpop.f32.mrf.mxu0  ;;  %v7122_v13 = vrot.slane %v7108_v41, %v12592_v50  ;;  %v12702_v49 = vrot.slane %v6575_v46, %v12592_v50  ;;  %v6577_v37 = vcombine.high %v6451_v32, %v6451_v32 }
 0x221   : > { %v6625_v57 = vrot.slane %v6611_v16, %v12592_v50  ;;  %v6626_v47 = vcombine.high %v6618_v59, %v6618_v59  ;;  %v12708_v63 = vcombine.low %v6610_v1, %v6618_v59  ;;  %v6584_v4 = vrot.slane %v6451_v32, %v12592_v50 }
 0x222   : > { %v12706_v14 = vcombine.low %v6574_v29, %v6576_v31  ;;  %v6338_v39 = vpop.f32.mrf.mxu0  ;;  %v6347_v33 = vadd.f32 %v10028_v7, %v12541_v10  ;;  %v6591_v16 = vrot.slane %v6577_v37, %v12592_v50  ;;  %v12716_v45 = vcombine.low %v7115_v60, %v7122_v13 }
 0x223   : > { %v6339_v19 = vadd.f32 %v6338_v39, %v12535_v56  ;;  %v6627_v41 = vcombine.high %v6625_v57, %v6625_v57  ;;  %v12713_v46 = vcombine.low %v6626_v47, %v6625_v57  ;;  %v6592_v29 = vcombine.high %v6584_v4, %v6584_v4 }
 0x224   : > { %v10029_v52 = vpop.f32.mrf.mxu0  ;;  %vm6410_vm6 = vcmp.gt.f32.partialorder %v6347_v33, 0.0  ;;  %v6433_v1 = vmul.f32 0.2, %v6347_v33  ;;  %v6593_v31 = vcombine.high %v6591_v16, %v6591_v16  ;;  %v12730_v32 = vpack.c.bf16 %v12716_v45, %v12666_v38 }
 0x225   : > { %vm6408_vm7 = vcmp.gt.f32.partialorder %v6339_v19, 0.0  ;;  %v6431_v59 = vmul.f32 0.2, %v6339_v19  ;;  %v6350_v10 = vadd.f32 %v10029_v52, %v12544_v40  ;;  %v12725_v60 = vcombine.low %v6584_v4, %v6592_v29 }
 0x226   : > { %v6341_v7 = vpop.f32.mrf.mxu0  ;;  %v6456_v13 = vsel %vm6410_vm6, %v6347_v33, %v6433_v1  ;;  %v12732_v47 = vcombine.low %v6591_v16, %v6593_v31  ;;  %9310 = vmatprep.mubr.msk.bf16.mxu0 %vm9287_vm9, %v12730_v32  ;;  %vm7600_vm3 = vcmask 1045504   ;;  %vm12814_vm6 = vmand %vm12645_vm14, %vm6958_vm4 }
 0x227   : > { %v6342_v57 = vadd.f32 %v6341_v7, %v12538_v5  ;;  %v6662_v40 = vcombine.high %v6456_v13, %v6456_v13  ;;  %v6669_v52 = vrot.slane %v6456_v13, %v12592_v50  ;;  %v6454_v37 = vsel %vm6408_vm7, %v6339_v19, %v6431_v59 }
 0x228   : > { %v6628_v39 = vcombine.high %v6454_v37, %v6454_v37  ;;  %v6635_v56 = vrot.slane %v6454_v37, %v12592_v50  ;;  %vm6411_vm11 = vcmp.gt.f32.partialorder %v6350_v10, 0.0  ;;  %v6434_v15 = vmul.f32 0.2, %v6350_v10 }
 0x229   : > { %v6676_v5 = vrot.slane %v6662_v40, %v12592_v50  ;;  %v6677_v38 = vcombine.high %v6669_v52, %v6669_v52  ;;  %vm6409_vm12 = vcmp.gt.f32.partialorder %v6342_v57, 0.0  ;;  %v6432_v4 = vmul.f32 0.2, %v6342_v57 }
 0x22a   : > { %v6642_v33 = vrot.slane %v6628_v39, %v12592_v50  ;;  %v6643_v19 = vcombine.high %v6635_v56, %v6635_v56  ;;  %v12744_v16 = vcombine.low %v6627_v41, %v6635_v56  ;;  %v6457_v29 = vsel %vm6411_vm11, %v6350_v10, %v6434_v15 }
 0x22b   : > { %v6678_v1 = vcombine.high %v6676_v5, %v6676_v5  ;;  %v12746_v31 = vcombine.low %v6669_v52, %v6677_v38  ;;  %v6679_v59 = vcombine.high %v6457_v29, %v6457_v29  ;;  %v12749_v7 = vrot.slane %v6457_v29, %v12592_v50 }
 0x22c   : > { %v6644_v13 = vcombine.high %v6642_v33, %v6642_v33  ;;  %v12751_v37 = vcombine.low %v6643_v19, %v6642_v33  ;;  %v6455_v23 = vsel %vm6409_vm12, %v6342_v57, %v6432_v4  ;;  %vm6895_vm11 = vcmp.ge.s32.totalorder %v12601_v28, 0 }
 0x22d   : > { %14206 = vst [vmem:[#allocation13_spill] sm:$0xff] %v12749_v7  ;;  %v12763_v41 = vcombine.low %v6676_v5, %v6678_v1  ;;  %v6693_v56 = vrot.slane %v6679_v59, %v12592_v50  ;;  %v6694_v52 = vcombine.high %v12749_v7, %v12749_v7  ;;  %v6645_v4 = vcombine.high %v6455_v23, %v6455_v23 }
 0x22e   : > { %v10032_v39 = vpop.f32.mrf.mxu0  ;;  %v12771_v57 = vrot.slane %v6644_v13, %v12592_v50  ;;  %v6652_v33 = vrot.slane %v6455_v23, %v12592_v50  ;;  %v12782_v59 = vsel %vm12759_vm13, %v12670_v62, 0.0  ;;  %v7490_v23 = vsel %vm12606_vm8, %v12686_v21, 0.0 }
 0x22f   : > { %v12776_v5 = vcombine.low %v6694_v52, %v6693_v56  ;;  %v6363_v19 = vadd.f32 %v10032_v39, %v12553_v3  ;;  %v6695_v1 = vcombine.high %v6693_v56, %v6693_v56  ;;  %v6659_v13 = vrot.slane %v6645_v4, %v12592_v50 }
 0x230   : > { %14209 = vst [vmem:[#allocation8_spill] sm:$0xff] %v12771_v57  ;;  %v6354_v29 = vpop.f32.mrf.mxu0  ;;  %v6660_v10 = vcombine.high %v6652_v33, %v6652_v33  ;;  %v7544_v3 = vrot.slane %v12782_v59, 1  ;;  %v7545_v56 = vrot.slane %v7490_v23, 1  ;;  %vm6905_vm12 = vcmp.lt.s32.totalorder %v12601_v28, 16 }
 0x231   : > { %14210 = vst [vmem:[#allocation4_spill] sm:$0xff] %v12776_v5  ;;  %v6355_v40 = vadd.f32 %v6354_v29, %v12547_v35  ;;  %vm6414_vm15 = vcmp.gt.f32.partialorder %v6363_v19, 0.0  ;;  %v6437_v52 = vmul.f32 0.2, %v6363_v19  ;;  %v6661_v39 = vcombine.high %v6659_v13, %v6659_v13 }
 0x232   : > { %v10033_v38 = vpop.f32.mrf.mxu0  ;;  %v12790_v48 = vcombine.low %v6652_v33, %v6660_v10  ;;  %v7546_v29 = vsel %vm14073_vm0, %v7544_v3, %v7545_v56  ;;  %v7548_v7 = vsel %vm14073_vm0, %v7545_v56, %v14211_v18  ;;  %v7601_v3 = vrot.slane %v12782_v59, 2 }
 0x233   : > { %vm6412_vm2 = vcmp.gt.f32.partialorder %v6355_v40, 0.0  ;;  %v6435_v53 = vmul.f32 0.2, %v6355_v40  ;;  %v6460_v4 = vsel %vm6414_vm15, %v6363_v19, %v6437_v52  ;;  %v6366_v43 = vadd.f32 %v10033_v38, %v12556_v58  ;;  %vm9284_vm15 = vmpackc.low %vm12606_vm8, %vm12759_vm13 }
 0x234   : > { %v6357_v35 = vpop.f32.mrf.mxu0  ;;  %v12797_v5 = vcombine.low %v6659_v13, %v6661_v39  ;;  %v6730_v42 = vcombine.high %v6460_v4, %v6460_v4  ;;  %v6737_v17 = vrot.slane %v6460_v4, %v12592_v50  ;;  %vm6896_vm8 = vcmp.ge.s32.totalorder %v12604_v54, 0 }
 0x235   : > { %v6458_v10 = vsel %vm6412_vm2, %v6355_v40, %v6435_v53  ;;  %vm6415_vm5 = vcmp.gt.f32.partialorder %v6366_v43, 0.0  ;;  %v6438_v19 = vmul.f32 0.2, %v6366_v43  ;;  %v6358_v52 = vadd.f32 %v6357_v35, %v12550_v20 }
 0x236   : > { %v6696_v33 = vcombine.high %v6458_v10, %v6458_v10  ;;  %v6703_v57 = vrot.slane %v6458_v10, %v12592_v50  ;;  %v6744_v58 = vrot.slane %v6730_v42, %v12592_v50  ;;  %v6745_v38 = vcombine.high %v6737_v17, %v6737_v17 }
 0x237   : > { %v6461_v39 = vsel %vm6415_vm5, %v6366_v43, %v6438_v19  ;;  %vm6413_vm7 = vcmp.gt.f32.partialorder %v6358_v52, 0.0  ;;  %v7602_v35 = vrot.slane %v7490_v23, 2  ;;  %v7692_v19 = vpack.c.bf16 %v7548_v7, %v7546_v29 }
 0x238   : > { %v6710_v18 = vrot.slane %v6696_v33, %v12592_v50  ;;  %v6711_v13 = vcombine.high %v6703_v57, %v6703_v57  ;;  %v12805_v56 = vcombine.low %v6695_v1, %v6703_v57  ;;  %v6746_v4 = vcombine.high %v6744_v58, %v6744_v58 }
 0x239   : > { %v12807_v53 = vcombine.low %v6737_v17, %v6745_v38  ;;  %v6747_v40 = vcombine.high %v6461_v39, %v6461_v39  ;;  %v6754_v10 = vrot.slane %v6461_v39, %v12592_v50  ;;  %v6436_v57 = vmul.f32 0.2, %v6358_v52  ;;  %v10247_v39 = vld [vmem:[%s13974_s4 + $0x170] sm:$0xff]   ;;  %8336 = vmatprep.mubr.bf16.mxu1 %v7692_v19 }
 0x23a   : > { %v12818_v42 = vcombine.low %v6711_v13, %v6710_v18  ;;  %v6712_v1 = vcombine.high %v6710_v18, %v6710_v18  ;;  %v12820_v43 = vcombine.low %v6744_v58, %v6746_v4  ;;  %v10246_v58 = vld [vmem:[%s13974_s4 + $0x138] sm:$0xff]   ;;  %v12837_v38 = vsel %vm12645_vm14, %v12716_v45, 0.0 }
 0x23b   : > { %v12823_v17 = vrot.slane %v6747_v40, %v12592_v50  ;;  %v6762_v59 = vcombine.high %v6754_v10, %v6754_v10  ;;  %v6459_v33 = vsel %vm6413_vm7, %v6358_v52, %v6436_v57  ;;  %v12842_v23 = vsel %vm12814_vm6, %v12702_v49, 0.0  ;;  %vm12924_vm6 = vmand %vm6895_vm11, %vm6905_vm12 }
 0x23c   : > { %v6713_v52 = vcombine.high %v6459_v33, %v6459_v33  ;;  %v6720_v18 = vrot.slane %v6459_v33, %v12592_v50  ;;  %v7603_v45 = vsel %vm7600_vm3, %v7601_v3, %v7602_v35  ;;  %v14215_v4 = vrot.slane %v12633_v2, 2  ;;  %v10254_v2 = vld [vmem:[%s13974_s4 + $0x1b8] sm:$0xff]   ;;  %vm12942_vm7 = vmand %vm12924_vm6, %vm14072_vm10 }
 0x23d   : > { %v12844_v7 = vcombine.low %v6754_v10, %v6762_v59  ;;  %v7550_v10 = vrot.slane %v12837_v38, 1  ;;  %v14216_v3 = vpack.c.bf16 %v12686_v21, %v12670_v62  ;;  %v10257_v62 = vld [vmem:[%s13974_s4 + $0x1f0] sm:$0xff]   ;;  %vm6906_vm13 = vcmp.lt.s32.totalorder %v12604_v54, 16  ;;  %vm12967_vm14 = vmpackc.low %vm12924_vm6, %vm12942_vm7 }
 0x23e   : > { %v10036_v13 = vpop.f32.mrf.mxu0  ;;  %v7605_v49 = vsel %vm7600_vm3, %v7602_v35, %v14215_v4  ;;  %v6727_v57 = vrot.slane %v6713_v52, %v12592_v50  ;;  %v6728_v59 = vcombine.high %v6720_v18, %v6720_v18  ;;  %v12861_v33 = vcombine.low %v6712_v1, %v6720_v18 }
 0x23f   : > { %14214 = vst [vmem:[#allocation11_spill] sm:$0xff] %v12844_v7  ;;  %v6379_v40 = vadd.f32 %v10036_v13, %v12568_v0  ;;  %9286 = vmatmul.mubr.msk.bf16.vlgmr.msra.gmra.mxu1 %vm9284_vm15, %v14216_v3  ;;  %v7693_v35 = vpack.c.bf16 %v7605_v49, %v7603_v45  ;;  %v14217_v1 = vrot.slane %v12676_v61, 1  ;;  %v7552_v18 = vrot.slane %v12842_v23, 1  ;;  %v10249_v45 = vld [vmem:[%s13974_s4 + $0x168] sm:$0xff]  }
 0x240   : > { %v6370_v0 = vpop.f32.mrf.mxu0  ;;  %9859 = vmatpush3.bf16.msra.mxu1 %v10246_v58  ;;  %v6729_v21 = vcombine.high %v6727_v57, %v6727_v57  ;;  %v12886_v58 = vrot.slane %v6728_v59, %v12592_v50  ;;  %v7607_v49 = vrot.slane %v12837_v38, 2  ;;  %v7609_v3 = vrot.slane %v12842_v23, 2 }
 0x241   : > { %vm6418_vm2 = vcmp.gt.f32.partialorder %v6379_v40, 0.0  ;;  %v6441_v19 = vmul.f32 0.2, %v6379_v40  ;;  %v7551_v52 = vsel %vm14073_vm0, %v14217_v1, %v7550_v10  ;;  %9860 = vmatprep.subr.bf16.mxu1 %v10247_v39  ;;  %8434 = vmatmul.mubr.bf16.vlgmr.msra.gmra.mxu0 %v7693_v35  ;;  %v6371_v59 = vadd.f32 %v6370_v0, %v12562_v11  ;;  %v10250_v11 = vld [vmem:[%s13974_s4 + $0x128] sm:$0xff]  }
 0x242   : > { %v10037_v13 = vpop.f32.mrf.mxu0  ;;  %v12897_v1 = vcombine.low %v6727_v57, %v6729_v21  ;;  %v7553_v20 = vsel %vm14073_vm0, %v7550_v10, %v7552_v18  ;;  %9923 = vmatpush3.bf16.msra.mxu0 %v10254_v2  ;;  %v10258_v57 = vld [vmem:[%s13974_s4 + $0x1b0] sm:$0xff]   ;;  %v7146_v2 = vrot.slane %v12725_v60, %v12592_v50  ;;  %v7180_v54 = vrot.slane %v12708_v63, %v12592_v50  ;;  %v10264_v63 = vld [vmem:[%s13974_s4 + $0x1a0] sm:$0xff]  }
 0x243   : > { %v6464_v4 = vsel %vm6418_vm2, %v6379_v40, %v6441_v19  ;;  %v12901_v7 = vpack.c.bf16 %v7553_v20, %v7551_v52  ;;  %vm6416_vm5 = vcmp.gt.f32.partialorder %v6371_v59, 0.0  ;;  %v6439_v35 = vmul.f32 0.2, %v6371_v59  ;;  %9924 = vmatprep.subr.bf16.mxu0 %v10257_v62  ;;  %v10251_v19 = vld [vmem:[%s13974_s4 + $0x160] sm:$0xff]   ;;  %v10260_v62 = vld [vmem:[%s13974_s4 + $0x1e8] sm:$0xff]  }
 0x244   : > { %v6798_v29 = vcombine.high %v6464_v4, %v6464_v4  ;;  %v6805_v39 = vrot.slane %v6464_v4, %v12592_v50  ;;  %v6373_v15 = vpop.f32.mrf.mxu0  ;;  %v6763_v40 = vcombine.high %v12823_v17, %v12823_v17  ;;  %9861 = vmatpush3.bf16.msra.mxu1 %v10248_v30  ;;  %v7139_v20 = vrot.slane %v12706_v14, %v12592_v50 }
 0x245   : > { %9862 = vmatprep.subr.bf16.mxu1 %v10249_v45  ;;  %8344 = vmatprep.mubr.bf16.mxu1 %v12901_v7  ;;  %v6462_v52 = vsel %vm6416_vm5, %v6371_v59, %v6439_v35  ;;  %v7156_v14 = vrot.slane %v12732_v47, %v12592_v50  ;;  %v6382_v60 = vadd.f32 %v10037_v13, %v12571_v36  ;;  %v10252_v59 = vld [vmem:[%s13974_s4 + $0x120] sm:$0xff]   ;;  %vm6897_vm12 = vcmp.ge.s32.totalorder %v12610_v12, 0 }
 0x246   : > { %v6812_v10 = vrot.slane %v6798_v29, %v12592_v50  ;;  %v6813_v0 = vcombine.high %v6805_v39, %v6805_v39  ;;  %v6374_v30 = vadd.f32 %v6373_v15, %v12565_v27  ;;  %v6764_v45 = vcombine.high %v6462_v52, %v6462_v52  ;;  %9925 = vmatpush3.bf16.msra.mxu0 %v10258_v57  ;;  %v10265_v29 = vld [vmem:[%s13974_s4 + $0x148] sm:$0xff]  }
 0x247   : > { %v6771_v28 = vrot.slane %v6462_v52, %v12592_v50  ;;  %9289 = vmatmul.mubr.msk.bf16.gmra.mxu1 %vm9287_vm9, %v12730_v32  ;;  %v7147_v36 = vcombine.low %v7139_v20, %v7146_v2  ;;  %v14222_v15 = vrot.slane %v12688_v25, %v12592_v50  ;;  %vm6419_vm11 = vcmp.gt.f32.partialorder %v6382_v60, 0.0  ;;  %9926 = vmatprep.subr.bf16.mxu0 %v10260_v62  ;;  %vm13005_vm9 = vmand %vm6896_vm8, %vm6906_vm13  ;;  %v10280_v25 = vld [vmem:[%s13974_s4 + $0x220] sm:$0xff]  }
 0x248   : > { %v6814_v21 = vcombine.high %v6812_v10, %v6812_v10  ;;  %v12935_v18 = vcombine.low %v6805_v39, %v6813_v0  ;;  %v10040_v27 = vpop.f32.mrf.mxu0  ;;  %v6442_v4 = vmul.f32 0.2, %v6382_v60  ;;  %9863 = vmatpush3.bf16.msra.mxu1 %v10250_v11  ;;  %v6778_v22 = vrot.slane %v6764_v45, %v12592_v50  ;;  %v10255_v11 = vld [vmem:[%s13974_s4 + $0x158] sm:$0xff]   ;;  %v10262_v0 = vld [vmem:[%s13974_s4 + $0x1a8] sm:$0xff]   ;;  %vm13040_vm2 = vmand %vm13005_vm9, %vm14072_vm10 }
 0x249   : > { %v7164_v13 = vcombine.low %v7156_v14, %v14222_v15  ;;  %v6779_v44 = vcombine.high %v6771_v28, %v6771_v28  ;;  %v12961_v32 = vcombine.low %v6763_v40, %v6771_v28  ;;  %9864 = vmatprep.subr.bf16.mxu1 %v10251_v19  ;;  %v12978_v57 = vsel %vm12942_vm7, %v7147_v36, 0.0  ;;  %v10256_v15 = vld [vmem:[%s13974_s4 + $0x118] sm:$0xff]   ;;  %vm13060_vm8 = vmand %vm12924_vm6, %vm6958_vm4 }
 0x24a   : > { %v12958_v39 = vcombine.low %v6812_v10, %v6814_v21  ;;  %v12971_v35 = vpop.f32.mrf.mxu0  ;;  %v6465_v10 = vsel %vm6419_vm11, %v6382_v60, %v6442_v4  ;;  %vm6417_vm1 = vcmp.gt.f32.partialorder %v6374_v30, 0.0  ;;  %v7554_v2 = vrot.slane %v12978_v57, 1  ;;  %v10263_v21 = vld [vmem:[%s13974_s4 + $0x1e0] sm:$0xff]   ;;  %9927 = vmatpush3.bf16.msra.mxu0 %v10262_v0  ;;  %vm13078_vm13 = vmpackc.low %vm13005_vm9, %vm13040_vm2 }
 0x24b   : > { %v12980_v40 = vpack.c.bf16 %v7164_v13, %v7147_v36  ;;  %v12985_v20 = vcombine.low %v6779_v44, %v6778_v22  ;;  %v7611_v19 = vrot.slane %v12978_v57, 2  ;;  %v6815_v52 = vcombine.high %v6465_v10, %v6465_v10  ;;  %9928 = vmatprep.subr.bf16.mxu0 %v10263_v21 }
 0x24c   : > { %v10041_v14 = vpop.f32.mrf.mxu0  ;;  %v6822_v60 = vrot.slane %v6465_v10, %v12592_v50  ;;  %v6440_v62 = vmul.f32 0.2, %v6374_v30  ;;  %v6780_v45 = vcombine.high %v6778_v22, %v6778_v22  ;;  %v14225_v28 = vrot.slane %v12676_v61, 2  ;;  %9865 = vmatpush3.bf16.msra.mxu1 %v10252_v59  ;;  %v10259_v59 = vld [vmem:[%s13974_s4 + $0x150] sm:$0xff]  }
 0x24d   : > { %9313 = vmatprep.mubr.msk.bf16.mxu0 %vm12967_vm14, %v12980_v40  ;;  %v6829_v4 = vrot.slane %v6815_v52, %v12592_v50  ;;  %v7610_v61 = vsel %vm7600_vm3, %v7607_v49, %v7609_v3  ;;  %v7187_v22 = vrot.slane %v12713_v46, %v12592_v50  ;;  %9866 = vmatprep.subr.bf16.mxu1 %v10255_v11  ;;  %vm6907_vm15 = vcmp.lt.s32.totalorder %v12610_v12, 16 }
 0x24e   : > { %v7608_v47 = vsel %vm7600_vm3, %v14225_v28, %v7607_v49  ;;  %v6830_v44 = vcombine.high %v6822_v60, %v6822_v60  ;;  %v6463_v10 = vsel %vm6417_vm1, %v6374_v30, %v6440_v62  ;;  %v7204_v38 = vrot.slane %v12751_v37, %v12592_v50  ;;  %v10266_v30 = vld [vmem:[%s13974_s4 + $0x1d8] sm:$0xff]   ;;  %9929 = vmatpush3.bf16.msra.mxu0 %v10264_v63 }
 0x24f   : > { %v13026_v52 = vpack.c.bf16 %v7610_v61, %v7608_v47  ;;  %v6831_v46 = vcombine.high %v6829_v4, %v6829_v4  ;;  %v6781_v23 = vcombine.high %v6463_v10, %v6463_v10  ;;  %v6788_v49 = vrot.slane %v6463_v10, %v12592_v50  ;;  %v6389_v10 = vpop.f32.mrf.mxu0  ;;  %9930 = vmatprep.subr.bf16.mxu0 %v10266_v30  ;;  %v10283_v61 = vld [vmem:[%s13974_s4 + $0x208] sm:$0xff]  }
 0x250   : > { %v7188_v37 = vcombine.low %v7180_v54, %v7187_v22  ;;  %v13047_v11 = vcombine.low %v6822_v60, %v6830_v44  ;;  %v14230_v0 = vrot.slane %v12744_v16, %v12592_v50  ;;  %v6395_v62 = vadd.f32 %v10040_v27, %v12589_v8  ;;  %9867 = vmatpush3.bf16.msra.mxu1 %v10256_v15  ;;  %v10261_v16 = vld [vmem:[%s13974_s4 + $0x110] sm:$0xff]  }
 0x251   : > { %8442 = vmatmul.mubr.bf16.gmra.mxu0 %v13026_v52  ;;  %v7496_v60 = vsel %vm12924_vm6, %v7164_v13, 0.0  ;;  %v13069_v28 = vcombine.low %v6829_v4, %v6831_v46  ;;  %v6795_v8 = vrot.slane %v6781_v23, %v12592_v50  ;;  %v6796_v27 = vcombine.high %v6788_v49, %v6788_v49  ;;  %9868 = vmatprep.subr.bf16.mxu1 %v10259_v59  ;;  %v10268_v4 = vld [vmem:[%s13974_s4 + $0x198] sm:$0xff]  }
 0x252   : > { %v13053_v14 = vcombine.low %v14230_v0, %v7204_v38  ;;  %v13072_v47 = vcombine.low %v6780_v45, %v6788_v49  ;;  %v13089_v45 = vsel %vm13040_vm2, %v7188_v37, 0.0  ;;  %vm6422_vm5 = vcmp.gt.f32.partialorder %v6395_v62, 0.0  ;;  %v10269_v38 = vld [vmem:[%s13974_s4 + $0x1d0] sm:$0xff]   ;;  %9931 = vmatpush3.bf16.msra.mxu0 %v10268_v4  ;;  %vm13153_vm2 = vmand %vm6897_vm12, %vm6907_vm15 }
 0x253   : > { %v6797_v54 = vcombine.high %v6795_v8, %v6795_v8  ;;  %v13097_v22 = vcombine.low %v6796_v27, %v6795_v8  ;;  %v7559_v44 = vrot.slane %v13089_v45, 1  ;;  %v7616_v63 = vrot.slane %v13089_v45, 2  ;;  %9932 = vmatprep.subr.bf16.mxu0 %v10269_v38  ;;  %v10272_v38 = vld [vmem:[%s13974_s4 + $0x1c8] sm:$0xff]   ;;  %vm13174_vm12 = vmand %vm13005_vm9, %vm6958_vm4 }
 0x254   : > { %v13092_v15 = vpack.c.bf16 %v13053_v14, %v7188_v37  ;;  %v7361_v59 = vrot.slane %v13072_v47, %v12592_v50  ;;  %v6445_v46 = vmul.f32 0.2, %v6395_v62  ;;  %v14235_v23 = vrot.slane %v12683_v34, %v12592_v50  ;;  %9869 = vmatpush3.bf16.msra.mxu1 %v10261_v16  ;;  %v10267_v37 = vld [vmem:[%s13974_s4 + $0x108] sm:$0xff]   ;;  %v10271_v34 = vld [vmem:[%s13974_s4 + $0x140] sm:$0xff]  }
 0x255   : > { %v7555_v3 = vrot.slane %v7496_v60, 1  ;;  %v13118_v30 = vrot.slane %v6797_v54, %v12592_v50  ;;  %v7612_v8 = vrot.slane %v7496_v60, 2  ;;  %9870 = vmatprep.subr.bf16.mxu1 %v10265_v29  ;;  %v6390_v54 = vadd.f32 %v6389_v10, %v12582_v55  ;;  %v10270_v60 = vld [vmem:[%s13974_s4 + $0x190] sm:$0xff]  }
 0x256   : > { %9316 = vmatprep.mubr.msk.bf16.mxu0 %vm13078_vm13, %v13092_v15  ;;  %v7497_v49 = vsel %vm13060_vm8, %v14235_v23, 0.0  ;;  %v6468_v21 = vsel %vm6422_vm5, %v6395_v62, %v6445_v46  ;;  %v6387_v23 = vadd.f32 %v12971_v35, %v12577_v26  ;;  %vm6898_vm6 = vcmp.ge.s32.totalorder %v12612_v24, 0  ;;  %v10273_v46 = vld [vmem:[%s13974_s4 + $0x100] sm:$0xff]   ;;  %9933 = vmatpush3.bf16.msra.mxu0 %v10270_v60 }
 0x257   : > { %v7557_v0 = vrot.slane %v7497_v49, 1  ;;  %v7614_v27 = vrot.slane %v7497_v49, 2  ;;  %v7556_v16 = vsel %vm14073_vm0, %v7554_v2, %v7555_v3  ;;  %v13134_v29 = vrot.slane %v6468_v21, %v12592_v50  ;;  %v10275_v21 = vld [vmem:[%s13974_s4 + $0x1c0] sm:$0xff]   ;;  %9934 = vmatprep.subr.bf16.mxu0 %v10272_v38 }
 0x258   : > { %v7613_v62 = vsel %vm7600_vm3, %v7611_v19, %v7612_v8  ;;  %vm6908_vm7 = vcmp.lt.s32.totalorder %v12612_v24, 16  ;;  %vm6420_vm11 = vcmp.gt.f32.partialorder %v6387_v23, 0.0  ;;  %v6443_v55 = vmul.f32 0.2, %v6387_v23  ;;  %9871 = vmatpush3.bf16.msra.mxu1 %v10267_v37 }
 0x259   : > { %v7558_v49 = vsel %vm14073_vm0, %v7555_v3, %v7557_v0  ;;  %v7615_v2 = vsel %vm7600_vm3, %v7612_v8, %v7614_v27  ;;  %vm6421_vm1 = vcmp.gt.f32.partialorder %v6390_v54, 0.0  ;;  %v6873_v35 = vcombine.high %v13134_v29, %v13134_v29  ;;  %9872 = vmatprep.subr.bf16.mxu1 %v10271_v34 }
 0x25a   : > { %v13143_v26 = vpack.c.bf16 %v7558_v49, %v7556_v16  ;;  %v6444_v4 = vmul.f32 0.2, %v6390_v54  ;;  %v13147_v57 = vpack.c.bf16 %v7615_v2, %v7613_v62  ;;  %v7221_v10 = vrot.slane %v12790_v48, %v12592_v50 }
 0x25b   : > { %v6466_v3 = vsel %vm6420_vm11, %v6387_v23, %v6443_v55  ;;  %v7228_v12 = vrot.slane %v12797_v5, %v12592_v50  ;;  %v7245_v37 = vrot.slane %v12763_v41, %v12592_v50  ;;  %v7499_v0 = vsel %vm13005_vm9, %v13053_v14, 0.0  ;;  %v10274_v5 = vld [vmem:[%s13974_s4 + $0x188] sm:$0xff]   ;;  %v13187_v41 = vld [vmem:[%s13974_s4 + $0x238] sm:$0xff]   ;;  %vm13201_vm9 = vmand %vm13153_vm2, %vm14072_vm10 }
 0x25c   : > { %8352 = vmatprep.mubr.bf16.mxu1 %v13143_v26  ;;  %v13190_v8 = vrot.slane %v6873_v35, %v12592_v50  ;;  %v6832_v27 = vcombine.high %v6466_v3, %v6466_v3  ;;  %v13193_v34 = vrot.slane %v6466_v3, %v12592_v50  ;;  %v6467_v36 = vsel %vm6421_vm1, %v6390_v54, %v6444_v4  ;;  %vm13226_vm5 = vmpackc.low %vm13153_vm2, %vm13201_vm9 }
 0x25d   : > { %8450 = vmatmul.mubr.bf16.gmra.mxu0 %v13147_v57  ;;  %v6849_v16 = vcombine.high %v6467_v36, %v6467_v36  ;;  %v6856_v23 = vrot.slane %v6467_v36, %v12592_v50  ;;  %9292 = vmatmul.mubr.msk.bf16.gmra.mxu1 %vm12967_vm14, %v12980_v40  ;;  %v7229_v54 = vcombine.low %v7221_v10, %v7228_v12  ;;  %vm6899_vm15 = vcmp.ge.s32.totalorder %v12614_v9, 0  ;;  %vm13252_vm11 = vmand %vm13153_vm2, %vm6958_vm4 }
 0x25e   : > { %v14242_v60 = vrot.slane %v12746_v31, %v12592_v50  ;;  %vm6909_vm8 = vcmp.lt.s32.totalorder %v12614_v9, 16  ;;  %v6846_v62 = vrot.slane %v6832_v27, %v12592_v50  ;;  %v6847_v2 = vcombine.high %v13193_v34, %v13193_v34  ;;  %v14245_v31 = vld [vmem:[#allocation8_spill] sm:$0xff]  ;;  %9873 = vmatpush3.bf16.msra.mxu1 %v10273_v46  ;;  %9935 = vmatpush3.bf16.msra.mxu0 %v10274_v5  ;;  %v10276_v27 = vld [vmem:[%s13974_s4 + $0x180] sm:$0xff]  }
 0x25f   : > { %v7500_v4 = vsel %vm13174_vm12, %v14245_v31, 0.0  ;;  %v6863_v10 = vrot.slane %v6849_v16, %v12592_v50  ;;  %v6864_v3 = vcombine.high %v6856_v23, %v6856_v23  ;;  %v7501_v12 = vsel %vm13201_vm9, %v7229_v54, 0.0  ;;  %10042 = vmatprep.subr.bf16.mxu1 %v13187_v41  ;;  %9936 = vmatprep.subr.bf16.mxu0 %v10275_v21  ;;  %vm13271_vm9 = vmand %vm6898_vm6, %vm6908_vm7 }
 0x260   : > { %v7246_v49 = vcombine.low %v14242_v60, %v7245_v37  ;;  %v7418_v36 = vcombine.low %v6847_v2, %v6846_v62  ;;  %v6848_v48 = vcombine.high %v6846_v62, %v6846_v62  ;;  %v7564_v60 = vrot.slane %v7501_v12, 1  ;;  %v14248_v62 = vld [vmem:[#allocation9_spill] sm:$0xff]  ;;  %vm13299_vm6 = vmand %vm13271_vm9, %vm14072_vm10 }
 0x261   : > { %v7621_v38 = vrot.slane %v7501_v12, 2  ;;  %v6865_v46 = vcombine.high %v6863_v10, %v6863_v10  ;;  %v13242_v16 = vcombine.low %v6864_v3, %v6863_v10  ;;  %v7560_v14 = vrot.slane %v7499_v0, 1  ;;  %vm13320_vm7 = vmpackc.low %vm13271_vm9, %vm13299_vm6 }
 0x262   : > { %v13236_v37 = vpack.c.bf16 %v7246_v49, %v7229_v54  ;;  %v7562_v5 = vrot.slane %v7500_v4, 1  ;;  %v7426_v54 = vrot.slane %v7418_v36, %v12592_v50  ;;  %v7419_v31 = vcombine.low %v6848_v48, %v6856_v23  ;;  %9937 = vmatpush3.bf16.msra.mxu0 %v10276_v27  ;;  %v14251_v36 = vld [vmem:[#allocation12_spill] sm:$0xff] }
 0x263   : > { %v7617_v55 = vrot.slane %v7499_v0, 2  ;;  %v7619_v13 = vrot.slane %v7500_v4, 2  ;;  %v13259_v2 = vcombine.low %v6865_v46, %v13134_v29  ;;  %v7443_v23 = vrot.slane %v13242_v16, %v12592_v50  ;;  %v14252_v27 = vld [vmem:[#allocation4_spill] sm:$0xff] }
 0x264   : > { %9319 = vmatprep.mubr.msk.bf16.mxu0 %vm13226_vm5, %v13236_v37  ;;  %v7561_v0 = vsel %vm14073_vm0, %v7559_v44, %v7560_v14  ;;  %v7563_v4 = vsel %vm14073_vm0, %v7560_v14, %v7562_v5  ;;  %v7433_v29 = vrot.slane %v7419_v31, %v12592_v50  ;;  %vm6901_vm1 = vcmp.ge.s32.totalorder %v14251_v36, 0  ;;  %v14255_v5 = vld [vmem:[#allocation13_spill] sm:$0xff] }
 0x265   : > { %v13276_v3 = vpack.c.bf16 %v7563_v4, %v7561_v0  ;;  %v7618_v12 = vsel %vm7600_vm3, %v7616_v63, %v7617_v55  ;;  %v7620_v44 = vsel %vm7600_vm3, %v7617_v55, %v7619_v13  ;;  %vm6911_vm12 = vcmp.lt.s32.totalorder %v14251_v36, 16 }
 0x266   : > { %v7450_v24 = vrot.slane %v13259_v2, %v12592_v50  ;;  %v13286_v48 = vpack.c.bf16 %v7620_v44, %v7618_v12  ;;  %v7262_v46 = vrot.slane %v14252_v27, %v12592_v50  ;;  %v7269_v14 = vrot.slane %v12805_v56, %v12592_v50 }
 0x267   : > { %v13292_v45 = vcombine.low %v7426_v54, %v7433_v29  ;;  %8360 = vmatprep.mubr.bf16.mxu1 %v13276_v3  ;;  %v7279_v63 = vrot.slane %v12818_v42, %v12592_v50  ;;  %v7502_v55 = vsel %vm13153_vm2, %v7246_v49, 0.0  ;;  %v14256_v56 = vrot.slane %v14255_v5, %v12592_v50  ;;  %vm13331_vm2 = vmand %vm6899_vm15, %vm6909_vm8 }
 0x268   : > { %8458 = vmatmul.mubr.bf16.gmra.mxu0 %v13286_v48  ;;  %9295 = vmatmul.mubr.msk.bf16.gmra.mxu1 %vm13078_vm13, %v13092_v15  ;;  %v7270_v31 = vcombine.low %v7262_v46, %v7269_v14  ;;  %v7565_v19 = vrot.slane %v7502_v55, 1  ;;  %v7622_v0 = vrot.slane %v7502_v55, 2  ;;  %v14259_v21 = vrot.slane %v12861_v33, %v12592_v50  ;;  %vm13348_vm15 = vmand %vm13271_vm9, %vm6958_vm4 }
 0x269   : > { %v7503_v54 = vsel %vm13252_vm11, %v14256_v56, 0.0  ;;  %v7303_v44 = vrot.slane %v12897_v1, %v12592_v50  ;;  %v7310_v27 = vrot.slane %v12807_v53, %v12592_v50  ;;  %vm6944_vm8 = vmand %vm13331_vm2, %vm14072_vm10  ;;  %v7320_v56 = vrot.slane %v12820_v43, %v12592_v50 }
 0x26a   : > { %v7567_v49 = vrot.slane %v7503_v54, 1  ;;  %v7287_v4 = vcombine.low %v7279_v63, %v14259_v21  ;;  %v7624_v29 = vrot.slane %v7503_v54, 2  ;;  %v7504_v46 = vsel %vm13299_vm6, %v7270_v31, 0.0  ;;  %vm13375_vm11 = vmpackc.low %vm13331_vm2, %vm6944_vm8 }
 0x26b   : > { %v7566_v33 = vsel %vm14073_vm0, %v7564_v60, %v7565_v19  ;;  %v7623_v63 = vsel %vm7600_vm3, %v7621_v38, %v7622_v0  ;;  %v7569_v1 = vrot.slane %v7504_v46, 1  ;;  %v7626_v55 = vrot.slane %v7504_v46, 2  ;;  %v14264_v60 = vld [vmem:[#allocation10_spill] sm:$0xff] }
 0x26c   : > { %v7568_v14 = vsel %vm14073_vm0, %v7565_v19, %v7567_v49  ;;  %v13352_v53 = vpack.c.bf16 %v7287_v4, %v7270_v31  ;;  %v7625_v38 = vsel %vm7600_vm3, %v7622_v0, %v7624_v29  ;;  %v7311_v5 = vcombine.low %v7303_v44, %v7310_v27  ;;  %v14267_v0 = vld [vmem:[#allocation11_spill] sm:$0xff] }
 0x26d   : > { %v13354_v13 = vpack.c.bf16 %v7568_v14, %v7566_v33  ;;  %v7505_v54 = vsel %vm13271_vm9, %v7287_v4, 0.0  ;;  %v13371_v31 = vpack.c.bf16 %v7625_v38, %v7623_v63  ;;  %v7506_v43 = vsel %vm13348_vm15, %v12886_v58, 0.0  ;;  %vm13399_vm15 = vmand %vm13331_vm2, %vm6958_vm4 }
 0x26e   : > { %9322 = vmatprep.mubr.msk.bf16.mxu0 %vm13320_vm7, %v13352_v53  ;;  %v7570_v10 = vrot.slane %v7505_v54, 1  ;;  %v7627_v49 = vrot.slane %v7505_v54, 2  ;;  %v14268_v21 = vrot.slane %v14267_v0, %v12592_v50  ;;  %v7507_v29 = vsel %vm6944_vm8, %v7311_v5, 0.0  ;;  %vm13417_vm8 = vmand %vm6901_vm1, %vm6911_vm12 }
 0x26f   : > { %8368 = vmatprep.mubr.bf16.mxu1 %v13354_v13  ;;  %v7572_v44 = vrot.slane %v7506_v43, 1  ;;  %v7629_v27 = vrot.slane %v7506_v43, 2  ;;  %vm14269_vm9 = vcmp.lt.s32.totalorder %v14248_v62, 16  ;;  %vm14270_vm6 = vcmp.ge.s32.totalorder %v14248_v62, 0 }
 0x270   : > { %v7328_v4 = vcombine.low %v7320_v56, %v14268_v21  ;;  %vm13389_vm10 = vmand %vm14270_vm6, %vm14269_vm9  ;;  %v7574_v33 = vrot.slane %v7507_v29, 1  ;;  %v7631_v14 = vrot.slane %v7507_v29, 2  ;;  %v7571_v58 = vsel %vm14073_vm0, %v7569_v1, %v7570_v10  ;;  %8466 = vmatmul.mubr.bf16.gmra.mxu0 %v13371_v31  ;;  %9298 = vmatmul.mubr.msk.bf16.gmra.mxu1 %vm13226_vm5, %v13236_v37 }
 0x271   : > { %v7628_v63 = vsel %vm7600_vm3, %v7626_v55, %v7627_v49  ;;  %v7573_v1 = vsel %vm14073_vm0, %v7570_v10, %v7572_v44  ;;  %v7630_v55 = vsel %vm7600_vm3, %v7627_v49, %v7629_v27  ;;  %vm14277_vm6 = vcmp.ge.s32.totalorder %v12596_v6, 0 }
 0x272   : > { %v13407_v62 = vpack.c.bf16 %v7328_v4, %v7311_v5  ;;  %v7508_v38 = vsel %vm13331_vm2, %v7328_v4, 0.0  ;;  %v13421_v54 = vpack.c.bf16 %v7573_v1, %v7571_v58  ;;  %v13423_v43 = vpack.c.bf16 %v7630_v55, %v7628_v63  ;;  %vm13429_vm9 = vmand %vm13389_vm10, %vm14277_vm6 }
 0x273   : > { %v7344_v12 = vrot.slane %v12961_v32, %v12592_v50  ;;  %v7351_v36 = vrot.slane %v12985_v20, %v12592_v50  ;;  %v7368_v10 = vrot.slane %v13097_v22, %v12592_v50  ;;  %vm13446_vm1 = vmpackc.low %vm13389_vm10, %vm13429_vm9  ;;  %v14282_v32 = vrot.slane %v12823_v17, %v12592_v50 }
 0x274   : > { %9325 = vmatprep.mubr.msk.bf16.mxu0 %vm13375_vm11, %v13407_v62  ;;  %v7575_v0 = vrot.slane %v7508_v38, 1  ;;  %v7632_v21 = vrot.slane %v7508_v38, 2  ;;  %8376 = vmatprep.mubr.bf16.mxu1 %v13421_v54  ;;  %vm14283_vm12 = vmmov %vm14277_vm6  ;;  %v7385_v17 = vrot.slane %v12935_v18, %v12592_v50  ;;  %v7392_v9 = vrot.slane %v12958_v39, %v12592_v50 }
 0x275   : > { %v7509_v20 = vsel %vm13399_vm15, %v14282_v32, 0.0  ;;  %v7352_v4 = vcombine.low %v7344_v12, %v7351_v36  ;;  %vm13460_vm2 = vmand %vm13417_vm8, %vm14283_vm12  ;;  %v7369_v27 = vcombine.low %v7361_v59, %v7368_v10  ;;  %vm14289_vm12 = vcmp.ge.s32.totalorder %v14264_v60, 0 }
 0x276   : > { %v7577_v22 = vrot.slane %v7509_v20, 1  ;;  %v7634_v29 = vrot.slane %v7509_v20, 2  ;;  %v7576_v58 = vsel %vm14073_vm0, %v7574_v33, %v7575_v0  ;;  %v7633_v63 = vsel %vm7600_vm3, %v7631_v14, %v7632_v21  ;;  %vm13477_vm15 = vmand %vm13389_vm10, %vm6958_vm4 }
 0x277   : > { %v7510_v18 = vsel %vm13429_vm9, %v7352_v4, 0.0  ;;  %v7409_v33 = vrot.slane %v13069_v28, %v12592_v50  ;;  %vm6985_vm6 = vmand %vm13417_vm8, %vm6958_vm4  ;;  %v13491_v55 = vpack.c.bf16 %v7369_v27, %v7352_v4  ;;  %vm14288_vm9 = vcmp.lt.s32.totalorder %v14264_v60, 16 }
 0x278   : > { %v7578_v47 = vsel %vm14073_vm0, %v7575_v0, %v7577_v22  ;;  %v7635_v59 = vsel %vm7600_vm3, %v7632_v21, %v7634_v29  ;;  %v7579_v39 = vrot.slane %v7510_v18, 1  ;;  %v7636_v14 = vrot.slane %v7510_v18, 2  ;;  %vm13499_vm0 = vmand %vm14289_vm12, %vm14288_vm9  ;;  %8474 = vmatmul.mubr.bf16.gmra.mxu0 %v13423_v43  ;;  %9301 = vmatmul.mubr.msk.bf16.gmra.mxu1 %vm13320_vm7, %v13352_v53 }
 0x279   : > { %v13493_v38 = vpack.c.bf16 %v7578_v47, %v7576_v58  ;;  %v13503_v28 = vpack.c.bf16 %v7635_v59, %v7633_v63  ;;  %v7393_v12 = vcombine.low %v7385_v17, %v7392_v9  ;;  %v14292_v36 = vrot.slane %v13047_v11, %v12592_v50  ;;  %9328 = vmatprep.mubr.msk.bf16.mxu0 %vm13446_vm1, %v13491_v55 }
 0x27a   : > { %v7511_v32 = vsel %vm13389_vm10, %v7369_v27, 0.0  ;;  %v7512_v60 = vsel %vm13477_vm15, %v13118_v30, 0.0  ;;  %v14293_v21 = vrot.slane %v13193_v34, %v12592_v50  ;;  %vm6988_vm10 = vmand %vm13499_vm0, %vm6958_vm4  ;;  %vm14294_vm15 = vcmask 1046528  }
 0x27b   : > { %v7410_v10 = vcombine.low %v14292_v36, %v7409_v33  ;;  %v7580_v20 = vrot.slane %v7511_v32, 1  ;;  %v7637_v0 = vrot.slane %v7511_v32, 2  ;;  %8384 = vmatprep.mubr.bf16.mxu1 %v13493_v38  ;;  %v7513_v46 = vsel %vm13460_vm2, %v7393_v12, 0.0  ;;  %vm14298_vm12 = vmmov %vm14294_vm15 }
 0x27c   : > { %v7515_v11 = vsel %vm6985_vm6, %v14293_v21, 0.0  ;;  %v7582_v22 = vrot.slane %v7512_v60, 1  ;;  %v7639_v29 = vrot.slane %v7512_v60, 2  ;;  %v7660_v30 = vrot.slane %v7513_v46, 1  ;;  %vm9329_vm4 = vmpackc.low %vm13417_vm8, %vm13460_vm2 }
 0x27d   : > { %v13526_v4 = vpack.c.bf16 %v7410_v10, %v7393_v12  ;;  %v7667_v34 = vrot.slane %v7513_v46, 2  ;;  %v7581_v17 = vsel %vm14294_vm15, %v7579_v39, %v7580_v20  ;;  %v7638_v27 = vsel %vm7600_vm3, %v7636_v14, %v7637_v0  ;;  %vm14299_vm15 = vmmov %vm14298_vm12 }
 0x27e   : > { %vm14295_vm6 = vcmp.ge.s32.totalorder %v12596_v6, 0  ;;  %v7583_v63 = vsel %vm14298_vm12, %v7580_v20, %v7582_v22  ;;  %v7640_v51 = vsel %vm7600_vm3, %v7637_v0, %v7639_v29  ;;  %v7514_v9 = vsel %vm13417_vm8, %v7410_v10, 0.0 }
 0x27f   : > { %vm13538_vm9 = vmand %vm13499_vm0, %vm14295_vm6  ;;  %v7663_v1 = vrot.slane %v7515_v11, 1  ;;  %v13546_v18 = vpack.c.bf16 %v7583_v63, %v7581_v17  ;;  %v13548_v47 = vpack.c.bf16 %v7640_v51, %v7638_v27  ;;  %v7661_v59 = vrot.slane %v7514_v9, 1 }
 0x280   : > { %v13556_v6 = vcombine.low %v7443_v23, %v7450_v24  ;;  %v7516_v33 = vsel %vm13538_vm9, %v13292_v45, 0.0  ;;  %v7518_v39 = vsel %vm6988_vm10, %v13190_v8, 0.0  ;;  %v7668_v14 = vrot.slane %v7514_v9, 2  ;;  %vm14300_vm6 = vmmov %vm14298_vm12  ;;  %8482 = vmatmul.mubr.bf16.gmra.mxu0 %v13503_v28  ;;  %9304 = vmatmul.mubr.msk.bf16.gmra.mxu1 %vm13375_vm11, %v13407_v62 }
 0x281   : > { %v7670_v12 = vrot.slane %v7515_v11, 2  ;;  %v7662_v2 = vsel %vm14299_vm15, %v7660_v30, %v7661_v59  ;;  %v7664_v36 = vsel %vm14300_vm6, %v7661_v59, %v7663_v1  ;;  %v7677_v16 = vrot.slane %v7516_v33, 1  ;;  %9331 = vmatprep.mubr.msk.bf16.mxu0 %vm9329_vm4, %v13526_v4  ;;  %8392 = vmatprep.mubr.bf16.mxu1 %v13546_v18  ;;  %vm14301_vm10 = vmmov %vm14300_vm6 }
 0x282   : > { %v7517_v50 = vsel %vm13499_vm0, %v13556_v6, 0.0  ;;  %v13571_v23 = vpack.c.bf16 %v7664_v36, %v7662_v2  ;;  %v7680_v8 = vrot.slane %v7518_v39, 1  ;;  %v7684_v10 = vrot.slane %v7516_v33, 2  ;;  %vm14302_vm12 = vmmov %vm14300_vm6 }
 0x283   : > { %v7678_v24 = vrot.slane %v7517_v50, 1  ;;  %v7685_v32 = vrot.slane %v7517_v50, 2  ;;  %v7687_v60 = vrot.slane %v7518_v39, 2  ;;  %v7669_v20 = vsel %vm7600_vm3, %v7667_v34, %v7668_v14 }
 0x284   : > { %v7671_v0 = vsel %vm7600_vm3, %v7668_v14, %v7670_v12  ;;  %v9354_v29 = vpack.c.bf16 %v13556_v6, %v13292_v45  ;;  %v10278_v45 = vld [vmem:[%s13974_s4 + $0x230] sm:$0xff]  }
 0x285   : > { %v7679_v21 = vsel %vm14301_vm10, %v7677_v16, %v7678_v24  ;;  %v7681_v11 = vsel %vm14302_vm12, %v7678_v24, %v7680_v8  ;;  %v13588_v46 = vpack.c.bf16 %v7671_v0, %v7669_v20  ;;  %v13593_v30 = vsel %vm7600_vm3, %v7684_v10, %v7685_v32 }
 0x286   : > { %v7719_v22 = vpack.c.bf16 %v7681_v11, %v7679_v21  ;;  %v13596_v34 = vsel %vm7600_vm3, %v7685_v32, %v7687_v60  ;;  %vm9353_vm3 = vmpackc.low %vm13499_vm0, %vm13538_vm9 }
 0x287   : > { %v7720_v17 = vpack.c.bf16 %v13596_v34, %v13593_v30 }
 0x288   : > { %8490 = vmatmul.mubr.bf16.gmra.mxu0 %v13548_v47  ;;  %9307 = vmatmul.mubr.msk.bf16.gmra.mxu1 %vm13446_vm1, %v13491_v55 }
 0x289   : > { %8627 = vmatprep.mubr.bf16.mxu0 %v13143_v26  ;;  %8530 = vmatprep.mubr.bf16.mxu1 %v13026_v52  ;;  %v10279_v52 = vld [vmem:[%s13974_s4 + $0x228] sm:$0xff]  }
 0x290   : > { %9334 = vmatmul.mubr.msk.bf16.vlgmr.msra.gmra.mxu0 %vm12967_vm14, %v12980_v40  ;;  %8531 = vmatmul.mubr.bf16.vlgmr.msra.gmra.mxu1 %v12901_v7  ;;  %v10281_v7 = vld [vmem:[%s13974_s4 + $0x218] sm:$0xff]   ;;  %v10282_v40 = vld [vmem:[%s13974_s4 + $0x210] sm:$0xff]  }
 0x291   : > { %8635 = vmatprep.mubr.bf16.mxu0 %v13276_v3  ;;  %10043 = vmatpush3.bf16.msra.mxu1 %v13187_v41 }
 0x292   : > { %8538 = vmatprep.mubr.bf16.mxu1 %v13147_v57  ;;  %10044 = vmatprep.subr.bf16.mxu1 %v10278_v45 }
 0x295   : > { %10045 = vmatpush3.bf16.msra.mxu1 %v10278_v45 }
 0x296   : > { %10046 = vmatprep.subr.bf16.mxu1 %v10279_v52 }
 0x298   : > { %9337 = vmatmul.mubr.msk.bf16.gmra.mxu0 %vm13078_vm13, %v13092_v15  ;;  %8539 = vmatmul.mubr.bf16.gmra.mxu1 %v13143_v26  ;;  %v10284_v15 = vld [vmem:[%s13974_s4 + $0x200] sm:$0xff]  }
 0x299   : > { %8643 = vmatprep.mubr.bf16.mxu0 %v13354_v13  ;;  %8546 = vmatprep.mubr.bf16.mxu1 %v13286_v48 }
 0x29a   : > { %10047 = vmatpush3.bf16.msra.mxu1 %v10279_v52 }
 0x29b   : > { %10048 = vmatprep.subr.bf16.mxu1 %v10280_v25 }
 0x29e   : > { %10049 = vmatpush3.bf16.msra.mxu1 %v10280_v25 }
 0x29f   : > { %10050 = vmatprep.subr.bf16.mxu1 %v10281_v7 }
 0x2a0   : > { %9340 = vmatmul.mubr.msk.bf16.gmra.mxu0 %vm13226_vm5, %v13236_v37  ;;  %8547 = vmatmul.mubr.bf16.gmra.mxu1 %v13276_v3 }
 0x2a1   : > { %8651 = vmatprep.mubr.bf16.mxu0 %v13421_v54  ;;  %8554 = vmatprep.mubr.bf16.mxu1 %v13371_v31 }
 0x2a2   : > { %10051 = vmatpush3.bf16.msra.mxu1 %v10281_v7 }
 0x2a3   : > { %10052 = vmatprep.subr.bf16.mxu1 %v10282_v40 }
 0x2a6   : > { %10053 = vmatpush3.bf16.msra.mxu1 %v10282_v40 }
 0x2a7   : > { %10054 = vmatprep.subr.bf16.mxu1 %v10283_v61 }
 0x2a8   : > { %9343 = vmatmul.mubr.msk.bf16.gmra.mxu0 %vm13320_vm7, %v13352_v53  ;;  %8555 = vmatmul.mubr.bf16.gmra.mxu1 %v13354_v13 }
 0x2a9   : > { %8659 = vmatprep.mubr.bf16.mxu0 %v13493_v38  ;;  %8562 = vmatprep.mubr.bf16.mxu1 %v13423_v43 }
 0x2aa   : > { %10055 = vmatpush3.bf16.msra.mxu1 %v10283_v61 }
 0x2ab   : > { %10056 = vmatprep.subr.bf16.mxu1 %v10284_v15 }
 0x2ae   : > { %10057 = vmatpush3.bf16.msra.mxu1 %v10284_v15 }
 0x2b0   : > { %9346 = vmatmul.mubr.msk.bf16.gmra.mxu0 %vm13375_vm11, %v13407_v62  ;;  %8563 = vmatmul.mubr.bf16.gmra.mxu1 %v13421_v54 }
 0x2b1   : > { %8667 = vmatprep.mubr.bf16.mxu0 %v13546_v18  ;;  %8570 = vmatprep.mubr.bf16.mxu1 %v13503_v28 }
 0x2b8   : > { %9349 = vmatmul.mubr.msk.bf16.gmra.mxu0 %vm13446_vm1, %v13491_v55  ;;  %8571 = vmatmul.mubr.bf16.gmra.mxu1 %v13493_v38 }
 0x2b9   : > { %8675 = vmatprep.mubr.bf16.mxu0 %v13571_v23  ;;  %8578 = vmatprep.mubr.bf16.mxu1 %v13548_v47 }
 0x2c0   : > { %9352 = vmatmul.mubr.msk.bf16.gmra.mxu0 %vm9329_vm4, %v13526_v4  ;;  %8579 = vmatmul.mubr.bf16.gmra.mxu1 %v13546_v18 }
 0x2c1   : > { %8683 = vmatprep.mubr.bf16.mxu0 %v7719_v22  ;;  %8586 = vmatprep.mubr.bf16.mxu1 %v13588_v46 }
 0x2c8   : > { %9355 = vmatmul.mubr.msk.bf16.gmra.mxu0 %vm9353_vm3, %v9354_v29  ;;  %8587 = vmatmul.mubr.bf16.gmra.mxu1 %v13571_v23 }
 0x2c9   : > { %10058 = vmatprep.mubr.bf16.mxu1 %v13147_v57  ;;  %v13690_v57 = vld [vmem:[%s13975_s5] ss:$0 sm:$0xff] }
 0x2d0   : > { %10059 = vmatmul.mubr.bf16.vlgmr.msra.gmra.mxu1 %v13286_v48 }
 0x2d1   : > { %10062 = vmatprep.mubr.bf16.mxu1 %v13371_v31 }
 0x2d8   : > { %10063 = vmatmul.mubr.bf16.gmra.mxu1 %v13423_v43 }
 0x2d9   : > { %10066 = vmatprep.mubr.bf16.mxu1 %v13503_v28 }
 0x2e0   : > { %10067 = vmatmul.mubr.bf16.gmra.mxu1 %v13548_v47 }
 0x2e1   : > { %10070 = vmatprep.mubr.bf16.mxu1 %v13588_v46 }
 0x2e8   : > { %10071 = vmatmul.mubr.bf16.gmra.mxu1 %v7720_v17 }
 0x2ff   : > { %v9746_v26 = vpop.f32.mrf.mxu1 }
 0x301   : > { %v9747_v41 = vpop.f32.mrf.mxu1  ;;  %v9810_v35 = vpop.f32.mrf.mxu0 }
 0x302   : > { %v9748_v37 = vadd.f32 %v9747_v41, %v9746_v26 }
 0x303   : > { %v9749_v3 = vpop.f32.mrf.mxu1  ;;  %v9811_v48 = vpop.f32.mrf.mxu0 }
 0x304   : > { %v8339_v42 = vadd.f32 %v9748_v37, %v13690_v57  ;;  %v9812_v53 = vadd.f32 %v9811_v48, %v9810_v35 }
 0x305   : > { %v9750_v13 = vpop.f32.mrf.mxu1  ;;  %v9813_v31 = vpop.f32.mrf.mxu0 }
 0x306   : > { %v9751_v19 = vadd.f32 %v9750_v13, %v9749_v3  ;;  %v13693_v56 = vadd.f32 %v9812_v53, %v8339_v42 }
 0x307   : > { %v9752_v62 = vpop.f32.mrf.mxu1  ;;  %v9814_v54 = vpop.f32.mrf.mxu0 }
 0x308   : > { %v8342_v43 = vadd.f32 %v9751_v19, %v13690_v57  ;;  %v9815_v49 = vadd.f32 %v9814_v54, %v9813_v31 }
 0x309   : > { %v9753_v44 = vpop.f32.mrf.mxu1 }
 0x30a   : > { %v9754_v55 = vadd.f32 %v9753_v44, %v9752_v62  ;;  %v13696_v5 = vadd.f32 %v9815_v49, %v8342_v43 }
 0x30b   : > { %v9755_v38 = vpop.f32.mrf.mxu1 }
 0x30c   : > { %v8347_v58 = vadd.f32 %v9754_v55, %v13690_v57 }
 0x30d   : > { %v9756_v28 = vpop.f32.mrf.mxu1 }
 0x30e   : > { %v9757_v4 = vadd.f32 %v9756_v28, %v9755_v38 }
 0x310   : > { %v8350_v1 = vadd.f32 %v9757_v4, %v13690_v57 }
 0x311   : > { %v9816_v27 = vpop.f32.mrf.mxu0 }
 0x313   : > { %v9817_v63 = vpop.f32.mrf.mxu0 }
 0x314   : > { %v9818_v51 = vadd.f32 %v9817_v63, %v9816_v27 }
 0x315   : > { %v9819_v9 = vpop.f32.mrf.mxu0 }
 0x316   : > { %v13700_v18 = vadd.f32 %v9818_v51, %v8347_v58 }
 0x317   : > { %v9820_v47 = vpop.f32.mrf.mxu0 }
 0x318   : > { %v9821_v59 = vadd.f32 %v9820_v47, %v9819_v9 }
 0x31a   : > { %v13702_v6 = vadd.f32 %v9821_v59, %v8350_v1 }
 0x31d   : > { %v9822_v33 = vpop.f32.mrf.mxu0  ;;  %v9758_v39 = vpop.f32.mrf.mxu1 }
 0x31f   : > { %v9823_v14 = vpop.f32.mrf.mxu0  ;;  %v9759_v2 = vpop.f32.mrf.mxu1 }
 0x320   : > { %v9824_v12 = vadd.f32 %v9823_v14, %v9822_v33  ;;  %v9760_v36 = vadd.f32 %v9759_v2, %v9758_v39 }
 0x321   : > { %v9825_v50 = vpop.f32.mrf.mxu0  ;;  %v9761_v16 = vpop.f32.mrf.mxu1 }
 0x322   : > { %v8355_v23 = vadd.f32 %v9760_v36, %v13690_v57 }
 0x323   : > { %v9826_v24 = vpop.f32.mrf.mxu0  ;;  %v9762_v10 = vpop.f32.mrf.mxu1 }
 0x324   : > { %v9827_v8 = vadd.f32 %v9826_v24, %v9825_v50  ;;  %v9763_v32 = vadd.f32 %v9762_v10, %v9761_v16  ;;  %v13705_v60 = vadd.f32 %v9824_v12, %v8355_v23 }
 0x326   : > { %v8358_v20 = vadd.f32 %v9763_v32, %v13690_v57 }
 0x328   : > { %v9828_v0 = vpop.f32.mrf.mxu0  ;;  %v9764_v21 = vpop.f32.mrf.mxu1  ;;  %v13708_v11 = vadd.f32 %v9827_v8, %v8358_v20 }
 0x32a   : > { %v9829_v46 = vpop.f32.mrf.mxu0  ;;  %v9765_v22 = vpop.f32.mrf.mxu1 }
 0x32b   : > { %v9830_v29 = vadd.f32 %v9829_v46, %v9828_v0  ;;  %v9766_v30 = vadd.f32 %v9765_v22, %v9764_v21 }
 0x32c   : > { %v9831_v34 = vpop.f32.mrf.mxu0  ;;  %v9767_v17 = vpop.f32.mrf.mxu1 }
 0x32d   : > { %v8363_v45 = vadd.f32 %v9766_v30, %v13690_v57 }
 0x32e   : > { %v9832_v52 = vpop.f32.mrf.mxu0  ;;  %v9768_v25 = vpop.f32.mrf.mxu1 }
 0x32f   : > { %v9833_v7 = vadd.f32 %v9832_v52, %v9831_v34  ;;  %v9769_v40 = vadd.f32 %v9768_v25, %v9767_v17  ;;  %v13711_v61 = vadd.f32 %v9830_v29, %v8363_v45 }
 0x330   : > { %v9834_v15 = vpop.f32.mrf.mxu0  ;;  %v9770_v26 = vpop.f32.mrf.mxu1 }
 0x331   : > { %v8366_v41 = vadd.f32 %v9769_v40, %v13690_v57 }
 0x332   : > { %v9835_v35 = vpop.f32.mrf.mxu0  ;;  %v9771_v37 = vpop.f32.mrf.mxu1 }
 0x333   : > { %v9836_v3 = vadd.f32 %v9835_v35, %v9834_v15  ;;  %v9772_v48 = vadd.f32 %v9771_v37, %v9770_v26  ;;  %v13714_v42 = vadd.f32 %v9833_v7, %v8366_v41 }
 0x334   : > { %v9837_v53 = vpop.f32.mrf.mxu0  ;;  %v9773_v13 = vpop.f32.mrf.mxu1 }
 0x335   : > { %v8371_v31 = vadd.f32 %v9772_v48, %v13690_v57 }
 0x336   : > { %v9838_v19 = vpop.f32.mrf.mxu0  ;;  %v9774_v62 = vpop.f32.mrf.mxu1 }
 0x337   : > { %v9839_v54 = vadd.f32 %v9838_v19, %v9837_v53  ;;  %v9775_v43 = vadd.f32 %v9774_v62, %v9773_v13  ;;  %v13717_v49 = vadd.f32 %v9836_v3, %v8371_v31 }
 0x338   : > { %v9840_v44 = vpop.f32.mrf.mxu0  ;;  %v9776_v55 = vpop.f32.mrf.mxu1 }
 0x339   : > { %v8374_v38 = vadd.f32 %v9775_v43, %v13690_v57 }
 0x33a   : > { %v9841_v28 = vpop.f32.mrf.mxu0  ;;  %v9777_v4 = vpop.f32.mrf.mxu1 }
 0x33b   : > { %v9842_v27 = vadd.f32 %v9841_v28, %v9840_v44  ;;  %v9778_v58 = vadd.f32 %v9777_v4, %v9776_v55  ;;  %v13720_v63 = vadd.f32 %v9839_v54, %v8374_v38 }
 0x33c   : > { %v9843_v51 = vpop.f32.mrf.mxu0  ;;  %v9779_v9 = vpop.f32.mrf.mxu1 }
 0x33d   : > { %14303 = vst [vmem:[#allocation16_spill] sm:$0xff] %v13720_v63  ;;  %v8379_v1 = vadd.f32 %v9778_v58, %v13690_v57 }
 0x33e   : > { %v9844_v47 = vpop.f32.mrf.mxu0  ;;  %v9780_v59 = vpop.f32.mrf.mxu1 }
 0x33f   : > { %v9845_v33 = vadd.f32 %v9844_v47, %v9843_v51  ;;  %v9781_v39 = vadd.f32 %v9780_v59, %v9779_v9  ;;  %v13723_v14 = vadd.f32 %v9842_v27, %v8379_v1 }
 0x340   : > { %v9846_v12 = vpop.f32.mrf.mxu0  ;;  %v9782_v2 = vpop.f32.mrf.mxu1 }
 0x341   : > { %v8382_v36 = vadd.f32 %v9781_v39, %v13690_v57 }
 0x342   : > { %v9847_v50 = vpop.f32.mrf.mxu0  ;;  %v9783_v16 = vpop.f32.mrf.mxu1 }
 0x343   : > { %v9848_v23 = vadd.f32 %v9847_v50, %v9846_v12  ;;  %v9784_v24 = vadd.f32 %v9783_v16, %v9782_v2  ;;  %v13726_v8 = vadd.f32 %v9845_v33, %v8382_v36 }
 0x344   : > { %v9849_v10 = vpop.f32.mrf.mxu0  ;;  %v9785_v32 = vpop.f32.mrf.mxu1 }
 0x345   : > { %14304 = vst [vmem:[#allocation14_spill] sm:$0xff] %v13726_v8  ;;  %v8387_v20 = vadd.f32 %v9784_v24, %v13690_v57 }
 0x346   : > { %v9850_v0 = vpop.f32.mrf.mxu0  ;;  %v9786_v21 = vpop.f32.mrf.mxu1 }
 0x347   : > { %v9851_v46 = vadd.f32 %v9850_v0, %v9849_v10  ;;  %v9787_v22 = vadd.f32 %v9786_v21, %v9785_v32  ;;  %v13729_v29 = vadd.f32 %v9848_v23, %v8387_v20 }
 0x348   : > { %v13731_v30 = vpop.f32.mrf.mxu0  ;;  %v9788_v34 = vpop.f32.mrf.mxu1 }
 0x349   : > { %14305 = vst [vmem:[#allocation5_spill] sm:$0xff] %v13729_v29  ;;  %14306 = vst [vmem:[#allocation25_spill] sm:$0xff] %v13731_v30  ;;  %v8390_v17 = vadd.f32 %v9787_v22, %v13690_v57 }
 0x34a   : > { %v13734_v45 = vpop.f32.mrf.mxu0  ;;  %v9789_v52 = vpop.f32.mrf.mxu1 }
 0x34b   : > { %14307 = vst [vmem:[#allocation18_spill] sm:$0xff] %v13734_v45  ;;  %v13736_v25 = vadd.f32 %v9789_v52, %v9788_v34  ;;  %v13738_v7 = vadd.f32 %v9851_v46, %v8390_v17 }
 0x34c   : > { %v13740_v40 = vpop.f32.mrf.mxu0  ;;  %v9791_v15 = vpop.f32.mrf.mxu1 }
 0x34d   : > { %14308 = vst [vmem:[#allocation22_spill] sm:$0xff] %v13738_v7  ;;  %14309 = vst [vmem:[#allocation30_spill] sm:$0xff] %v13740_v40 }
 0x34e   : > { %v13742_v26 = vpop.f32.mrf.mxu0  ;;  %v9792_v41 = vpop.f32.mrf.mxu1 }
 0x34f   : > { %14310 = vst [vmem:[#allocation24_spill] sm:$0xff] %v13742_v26  ;;  %v13744_v35 = vadd.f32 %v9792_v41, %v9791_v15 }
 0x350   : > { %v13746_v37 = vpop.f32.mrf.mxu0  ;;  %v9874_v3 = vpop.f32.mrf.mxu1 }
 0x351   : > { %14311 = vst [vmem:[#allocation23_spill] sm:$0xff] %v13744_v35 }
 0x352   : > { %v13748_v48 = vpop.f32.mrf.mxu0  ;;  %v9875_v53 = vpop.f32.mrf.mxu1 }
 0x353   : > { %v9876_v45 = vadd.f32 %v9875_v53, %v9874_v3 }
 0x354   : > { %v13750_v13 = vpop.f32.mrf.mxu0  ;;  %v13752_v31 = vpop.f32.mrf.mxu1 }
 0x356   : > { %v13754_v19 = vpop.f32.mrf.mxu0  ;;  %v13756_v62 = vpop.f32.mrf.mxu1 }
 0x357   : > { %v9879_v3 = vadd.f32 %v13756_v62, %v13752_v31 }
 0x358   : > { %v13758_v54 = vpop.f32.mrf.mxu0  ;;  %v9880_v43 = vpop.f32.mrf.mxu1 }
 0x35a   : > { %v9945_v44 = vpop.f32.mrf.mxu0  ;;  %v9881_v55 = vpop.f32.mrf.mxu1 }
 0x35b   : > { %v9946_v53 = vadd.f32 %v9945_v44, %v13758_v54 }
 0x35c   : > { %v13760_v38 = vpop.f32.mrf.mxu0  ;;  %v9883_v28 = vpop.f32.mrf.mxu1 }
 0x35e   : > { %v13762_v4 = vpop.f32.mrf.mxu0  ;;  %v9884_v27 = vpop.f32.mrf.mxu1 }
 0x35f   : > { %v9949_v31 = vadd.f32 %v13762_v4, %v13760_v38 }
 0x360   : > { %v13764_v58 = vpop.f32.mrf.mxu0  ;;  %v9886_v51 = vpop.f32.mrf.mxu1 }
 0x362   : > { %v13766_v9 = vpop.f32.mrf.mxu0  ;;  %v9887_v1 = vpop.f32.mrf.mxu1 }
 0x364   : > { %v13768_v47 = vpop.f32.mrf.mxu0  ;;  %v13770_v59 = vpop.f32.mrf.mxu1 }
 0x366   : > { %v13772_v33 = vpop.f32.mrf.mxu0  ;;  %v13774_v39 = vpop.f32.mrf.mxu1 }
 0x368   : > { %v13776_v12 = vpop.f32.mrf.mxu0  ;;  %v9892_v2 = vpop.f32.mrf.mxu1 }
 0x36a   : > { %v13778_v36 = vpop.f32.mrf.mxu0  ;;  %v9893_v50 = vpop.f32.mrf.mxu1 }
 0x36c   : > { %v13780_v16 = vpop.f32.mrf.mxu0  ;;  %v9895_v23 = vpop.f32.mrf.mxu1 }
 0x36e   : > { %v13782_v24 = vpop.f32.mrf.mxu0  ;;  %v9896_v10 = vpop.f32.mrf.mxu1 }
 0x36f   : > { %v9897_v44 = vadd.f32 %v9896_v10, %v9895_v23  ;;  %v9952_v10 = vadd.f32 %v13766_v9, %v13764_v58  ;;  %v8795_v58 = vld [vmem:[%s13840_s17 + $0x30] sm:$0xff] }
 0x370   : > { %v13784_v32 = vpop.f32.mrf.mxu0  ;;  %v13786_v20 = vpop.f32.mrf.mxu1 }
 0x371   : > { %14312 = vst [vmem:[#allocation26_spill] sm:$0xff] %v13784_v32 }
 0x372   : > { %v13788_v0 = vpop.f32.mrf.mxu0  ;;  %v13790_v21 = vpop.f32.mrf.mxu1 }
 0x373   : > { %14313 = vst [vmem:[#allocation29_spill] sm:$0xff] %v13788_v0  ;;  %v9882_v0 = vadd.f32 %v9881_v55, %v9880_v43  ;;  %v8533_v43 = vadd.f32 %v9876_v45, %v13693_v56  ;;  %v9894_v55 = vadd.f32 %v9893_v50, %v9892_v2  ;;  %v8791_v56 = vld [vmem:[%s13840_s17 + $0x10] sm:$0xff]  ;;  %v8536_v45 = vadd.f32 %v9879_v3, %v13696_v5 }
 0x374   : > { %v13792_v46 = vpop.f32.mrf.mxu0  ;;  %v13794_v22 = vpop.f32.mrf.mxu1 }
 0x375   : > { %14314 = vst [vmem:[#allocation27_spill] sm:$0xff] %v13792_v46 }
 0x376   : > { %v13796_v34 = vpop.f32.mrf.mxu0  ;;  %v13798_v17 = vpop.f32.mrf.mxu1 }
 0x377   : > { %14315 = vst [vmem:[#allocation17_spill] sm:$0xff] %v13796_v34 }
 0x378   : > { %v13800_v52 = vpop.f32.mrf.mxu1  ;;  %v13802_v15 = vpop.f32.mrf.mxu0 }
 0x37a   : > { %v13804_v41 = vpop.f32.mrf.mxu1  ;;  %v13810_v29 = vpop.f32.mrf.mxu0 }
 0x37b   : > { %14316 = vst [vmem:[#allocation31_spill] sm:$0xff] %v13810_v29 }
 0x37c   : > { %v13808_v7 = vpop.f32.mrf.mxu1  ;;  %v13818_v34 = vpop.f32.mrf.mxu0 }
 0x37d   : > { %14318 = vst [vmem:[#allocation35_spill] sm:$0xff] %v13818_v34  ;;  %v9885_v34 = vadd.f32 %v9884_v27, %v9883_v28  ;;  %v9940_v28 = vadd.f32 %v13748_v48, %v13746_v37  ;;  %v8789_v48 = vld [vmem:[%s13840_s17] sm:$0xff] }
 0x37e   : > { %v13812_v26 = vpop.f32.mrf.mxu1  ;;  %v13824_v35 = vpop.f32.mrf.mxu0 }
 0x37f   : > { %v8544_v27 = vadd.f32 %v9885_v34, %v13702_v6  ;;  %v8630_v54 = vadd.f32 %v9940_v28, %v8533_v43  ;;  %v9943_v6 = vadd.f32 %v13754_v19, %v13750_v13  ;;  %v9958_v13 = vadd.f32 %v13778_v36, %v13776_v12 }
 0x380   : > { %v13816_v46 = vpop.f32.mrf.mxu1  ;;  %v13830_v30 = vpop.f32.mrf.mxu0  ;;  %v9900_v28 = vadd.f32 %v13790_v21, %v13786_v20  ;;  %v8395_v21 = vadd.f32 %v13736_v25, %v13690_v57  ;;  %v14327_v25 = vld [vmem:[#allocation29_spill] sm:$0xff] }
 0x381   : > { %14317 = vst [vmem:[#allocation28_spill] sm:$0xff] %v13816_v46  ;;  %14322 = vst [vmem:[#allocation19_spill] sm:$0xff] %v13830_v30  ;;  %v8641_v4 = vadd.f32 %v9949_v31, %v8544_v27  ;;  %v8633_v23 = vadd.f32 %v9943_v6, %v8536_v45  ;;  %v9909_v27 = vadd.f32 %v13812_v26, %v13808_v7  ;;  %v8796_v7 = vld [vmem:[%s13840_s17 + $0x38] sm:$0xff] }
 0x382   : > { %v13820_v40 = vpop.f32.mrf.mxu1  ;;  %v13846_v30 = vpop.f32.mrf.mxu0  ;;  %v8565_v31 = vadd.f32 %v9900_v28, %v13717_v49 }
 0x383   : > { %14319 = vst [vmem:[#allocation36_spill] sm:$0xff] %v13820_v40  ;;  %v8541_v40 = vadd.f32 %v9882_v0, %v13700_v18 }
 0x384   : > { %v13822_v63 = vpop.f32.mrf.mxu1  ;;  %v13865_v37 = vpop.f32.mrf.mxu0 }
 0x385   : > { %14320 = vst [vmem:[#allocation20_spill] sm:$0xff] %v13822_v63  ;;  %v8638_v0 = vadd.f32 %v9946_v53, %v8541_v40  ;;  %v8557_v40 = vadd.f32 %v9894_v55, %v13711_v61  ;;  %v8792_v61 = vld [vmem:[%s13840_s17 + $0x18] sm:$0xff]  ;;  %v9961_v55 = vadd.f32 %v13782_v24, %v13780_v16 }
 0x386   : > { %v13826_v8 = vpop.f32.mrf.mxu1  ;;  %v13877_v34 = vpop.f32.mrf.mxu0 }
 0x387   : > { %14321 = vst [vmem:[#allocation32_spill] sm:$0xff] %v13826_v8  ;;  %v9888_v8 = vadd.f32 %v9887_v1, %v9886_v51  ;;  %v9891_v1 = vadd.f32 %v13774_v39, %v13770_v59  ;;  %v8654_v43 = vadd.f32 %v9958_v13, %v8557_v40  ;;  %v8560_v59 = vadd.f32 %v9897_v44, %v13714_v42  ;;  %v14324_v40 = vld [vmem:[#allocation25_spill] sm:$0xff]  ;;  %v14326_v44 = vld [vmem:[#allocation26_spill] sm:$0xff] }
 0x388   : > { %v13828_v32 = vpop.f32.mrf.mxu1  ;;  %v9906_v39 = vadd.f32 %v13804_v41, %v13800_v52  ;;  %v9955_v41 = vadd.f32 %v13772_v33, %v13768_v47  ;;  %v9903_v47 = vadd.f32 %v13798_v17, %v13794_v22  ;;  %v14328_v22 = vld [vmem:[#allocation14_spill] sm:$0xff] }
 0x389   : > { %v8549_v51 = vadd.f32 %v9888_v8, %v13705_v60  ;;  %v8790_v8 = vld [vmem:[%s13840_s17 + $0x8] sm:$0xff]  ;;  %v8552_v3 = vadd.f32 %v9891_v1, %v13708_v11  ;;  %v9980_v11 = vpop.f32.mrf.mxu0  ;;  %v8657_v20 = vadd.f32 %v9961_v55, %v8560_v59  ;;  %v8576_v17 = vadd.f32 %v9909_v27, %v14328_v22 }
 0x38a   : > { %v13832_v46 = vpop.f32.mrf.mxu1  ;;  %v8573_v45 = vadd.f32 %v9906_v39, %v13723_v14  ;;  %v8799_v39 = vld [vmem:[%s13840_s17 + $0x50] sm:$0xff] }
 0x38b   : > { %v8646_v9 = vadd.f32 %v9952_v10, %v8549_v51  ;;  %v8649_v26 = vadd.f32 %v9955_v41, %v8552_v3  ;;  %v8794_v51 = vld [vmem:[%s13840_s17 + $0x28] sm:$0xff]  ;;  %v9918_v49 = vadd.f32 %v13832_v46, %v13828_v32  ;;  %v14334_v3 = vld [vmem:[#allocation30_spill] sm:$0xff] }
 0x38c   : > { %v13835_v29 = vpop.f32.mrf.mxu1 }
 0x38e   : > { %v13848_v18 = vpop.f32.mrf.mxu1 }
 0x38f   : > { %v9921_v27 = vadd.f32 %v13848_v18, %v13835_v29  ;;  %v14341_v18 = vld [vmem:[#allocation19_spill] sm:$0xff] }
 0x390   : > { %v10060_v63 = vpop.f32.mrf.mxu1 }
 0x391   : > { %v8735_v62 = vadd.f32 %v10060_v63, %v8638_v0 }
 0x392   : > { %v8726_v5 = vpop.f32.mrf.mxu1 }
 0x393   : > { %v8807_v63 = vadd.f32 %v8791_v56, %v8735_v62  ;;  %v8727_v38 = vadd.f32 %v8726_v5, %v8630_v54  ;;  %v8793_v56 = vld [vmem:[%s13840_s17 + $0x20] sm:$0xff]  ;;  %v14323_v62 = vld [vmem:[#allocation31_spill] sm:$0xff] }
 0x394   : > { %v10061_v19 = vpop.f32.mrf.mxu1  ;;  %v9970_v14 = vadd.f32 %v14323_v62, %v13802_v15  ;;  %v14325_v5 = vld [vmem:[#allocation18_spill] sm:$0xff] }
 0x395   : > { %8823 = vst [vmem:[%s13860_s21 + $0x10] sm:$0xff] %v8807_v63  ;;  %v8805_v2 = vadd.f32 %v8789_v48, %v8727_v38  ;;  %v8738_v50 = vadd.f32 %v10061_v19, %v8641_v4  ;;  %v9854_v48 = vadd.f32 %v14325_v5, %v14324_v40  ;;  %v9964_v63 = vadd.f32 %v14327_v25, %v14326_v44  ;;  %v9981_v38 = vpop.f32.mrf.mxu0  ;;  %v14329_v19 = vld [vmem:[#allocation23_spill] sm:$0xff] }
 0x396   : > { %v8729_v60 = vpop.f32.mrf.mxu1  ;;  %v8670_v13 = vadd.f32 %v9970_v14, %v8573_v45  ;;  %v14338_v45 = vld [vmem:[#allocation5_spill] sm:$0xff]  ;;  %v9976_v14 = vadd.f32 %v13846_v30, %v14341_v18  ;;  %v8798_v40 = vld [vmem:[%s13840_s17 + $0x48] sm:$0xff] }
 0x397   : > { %8821 = vst [vmem:[%s13860_s21] sm:$0xff] %v8805_v2  ;;  %v8808_v12 = vadd.f32 %v8792_v61, %v8738_v50  ;;  %v8730_v36 = vadd.f32 %v8729_v60, %v8633_v23  ;;  %v8398_v61 = vadd.f32 %v14329_v19, %v13690_v57  ;;  %v14330_v2 = vld [vmem:[#allocation16_spill] sm:$0xff]  ;;  %v14331_v23 = vld [vmem:[#allocation35_spill] sm:$0xff]  ;;  %v8492_v32 = vadd.f32 %v9854_v48, %v8395_v21  ;;  %v9983_v28 = vpop.f32.mrf.mxu0  ;;  %v8800_v21 = vld [vmem:[%s13840_s17 + $0x58] sm:$0xff] }
 0x398   : > { %v10064_v53 = vpop.f32.mrf.mxu1  ;;  %v8568_v50 = vadd.f32 %v9903_v47, %v14330_v2  ;;  %v9973_v10 = vadd.f32 %v13824_v35, %v14331_v23  ;;  %v14332_v60 = vld [vmem:[#allocation28_spill] sm:$0xff] }
 0x399   : > { %8824 = vst [vmem:[%s13860_s21 + $0x18] sm:$0xff] %v8808_v12  ;;  %v8806_v42 = vadd.f32 %v8790_v8, %v8730_v36  ;;  %v8751_v52 = vadd.f32 %v10064_v53, %v8654_v43  ;;  %v14333_v8 = vld [vmem:[#allocation36_spill] sm:$0xff]  ;;  %v8662_v36 = vadd.f32 %v9964_v63, %v8565_v31  ;;  %v8589_v41 = vadd.f32 %v9918_v49, %v8492_v32 }
 0x39a   : > { %v8742_v0 = vpop.f32.mrf.mxu1  ;;  %v9912_v43 = vadd.f32 %v14333_v8, %v14332_v60  ;;  %v14335_v53 = vld [vmem:[#allocation24_spill] sm:$0xff]  ;;  %v9982_v31 = vadd.f32 %v9981_v38, %v9980_v11 }
 0x39b   : > { %8822 = vst [vmem:[%s13860_s21 + $0x8] sm:$0xff] %v8806_v42  ;;  %v8811_v16 = vadd.f32 %v8795_v58, %v8751_v52  ;;  %v8743_v24 = vadd.f32 %v8742_v0, %v8646_v9  ;;  %v9857_v57 = vadd.f32 %v14335_v53, %v14334_v3  ;;  %v14336_v58 = vld [vmem:[#allocation27_spill] sm:$0xff]  ;;  %v14337_v9 = vld [vmem:[#allocation17_spill] sm:$0xff]  ;;  %v8797_v42 = vld [vmem:[%s13840_s17 + $0x40] sm:$0xff]  ;;  %v8673_v52 = vadd.f32 %v9973_v10, %v8576_v17 }
 0x39c   : > { %v10065_v33 = vpop.f32.mrf.mxu1  ;;  %v9967_v55 = vadd.f32 %v14337_v9, %v14336_v58  ;;  %v8686_v25 = vadd.f32 %v9982_v31, %v8589_v41  ;;  %v8803_v11 = vld [vmem:[%s13840_s17 + $0x70] sm:$0xff]  ;;  %v14342_v17 = vld [vmem:[#allocation22_spill] sm:$0xff] }
 0x39d   : > { %8827 = vst [vmem:[%s13860_s21 + $0x30] sm:$0xff] %v8811_v16  ;;  %v8809_v54 = vadd.f32 %v8793_v56, %v8743_v24  ;;  %v8754_v6 = vadd.f32 %v10065_v33, %v8657_v20  ;;  %v8581_v16 = vadd.f32 %v9912_v43, %v14338_v45  ;;  %v8495_v24 = vadd.f32 %v9857_v57, %v8398_v61  ;;  %v14339_v33 = vld [vmem:[#allocation20_spill] sm:$0xff]  ;;  %v8802_v43 = vld [vmem:[%s13840_s17 + $0x68] sm:$0xff] }
 0x39e   : > { %v8745_v4 = vpop.f32.mrf.mxu1  ;;  %v8665_v47 = vadd.f32 %v9967_v55, %v8568_v50  ;;  %v8804_v50 = vld [vmem:[%s13840_s17 + $0x78] sm:$0xff] }
 0x39f   : > { %8825 = vst [vmem:[%s13860_s21 + $0x20] sm:$0xff] %v8809_v54  ;;  %v8812_v15 = vadd.f32 %v8796_v7, %v8754_v6  ;;  %v8746_v1 = vadd.f32 %v8745_v4, %v8649_v26  ;;  %v14340_v7 = vld [vmem:[#allocation32_spill] sm:$0xff]  ;;  %v9984_v54 = vpop.f32.mrf.mxu0  ;;  %v8592_v5 = vadd.f32 %v9921_v27, %v8495_v24  ;;  %v8678_v22 = vadd.f32 %v9976_v14, %v8581_v16 }
 0x3a0   : > { %v10068_v59 = vpop.f32.mrf.mxu1  ;;  %v9915_v26 = vadd.f32 %v14340_v7, %v14339_v33  ;;  %v9985_v4 = vadd.f32 %v9984_v54, %v9983_v28 }
 0x3a1   : > { %8828 = vst [vmem:[%s13860_s21 + $0x38] sm:$0xff] %v8812_v15  ;;  %v8810_v46 = vadd.f32 %v8794_v51, %v8746_v1  ;;  %v8767_v12 = vadd.f32 %v10068_v59, %v8670_v13  ;;  %v8801_v15 = vld [vmem:[%s13840_s17 + $0x60] sm:$0xff]  ;;  %v9979_v1 = vadd.f32 %v13877_v34, %v13865_v37 }
 0x3a2   : > { %v8758_v35 = vpop.f32.mrf.mxu1  ;;  %v8584_v38 = vadd.f32 %v9915_v26, %v14342_v17  ;;  %v8689_v61 = vadd.f32 %v9985_v4, %v8592_v5 }
 0x3a3   : > { %8826 = vst [vmem:[%s13860_s21 + $0x28] sm:$0xff] %v8810_v46  ;;  %v8815_v0 = vadd.f32 %v8799_v39, %v8767_v12  ;;  %v8759_v56 = vadd.f32 %v8758_v35, %v8662_v36 }
 0x3a4   : > { %v10069_v20 = vpop.f32.mrf.mxu1  ;;  %v8681_v60 = vadd.f32 %v9979_v1, %v8584_v38 }
 0x3a5   : > { %8831 = vst [vmem:[%s13860_s21 + $0x50] sm:$0xff] %v8815_v0  ;;  %v8813_v62 = vadd.f32 %v8797_v42, %v8759_v56  ;;  %v8770_v29 = vadd.f32 %v10069_v20, %v8673_v52 }
 0x3a6   : > { %v8761_v6 = vpop.f32.mrf.mxu1 }
 0x3a7   : > { %8829 = vst [vmem:[%s13860_s21 + $0x40] sm:$0xff] %v8813_v62  ;;  %v8816_v48 = vadd.f32 %v8800_v21, %v8770_v29  ;;  %v8762_v44 = vadd.f32 %v8761_v6, %v8665_v47 }
 0x3a8   : > { %v10072_v63 = vpop.f32.mrf.mxu1 }
 0x3a9   : > { %8832 = vst [vmem:[%s13860_s21 + $0x58] sm:$0xff] %v8816_v48  ;;  %v8814_v30 = vadd.f32 %v8798_v40, %v8762_v44  ;;  %v8783_v51 = vadd.f32 %v10072_v63, %v8686_v25 }
 0x3aa   : > { %v8774_v49 = vpop.f32.mrf.mxu1 }
 0x3ab   : > { %8830 = vst [vmem:[%s13860_s21 + $0x48] sm:$0xff] %v8814_v30  ;;  %v8819_v13 = vadd.f32 %v8803_v11, %v8783_v51  ;;  %v8775_v19 = vadd.f32 %v8774_v49, %v8678_v22 }
 0x3ac   : > { %v10073_v2 = vpop.f32.mrf.mxu1 }
 0x3ad   : > { %8835 = vst [vmem:[%s13860_s21 + $0x70] sm:$0xff] %v8819_v13  ;;  %v8817_v23 = vadd.f32 %v8801_v15, %v8775_v19  ;;  %v8786_v10 = vadd.f32 %v10073_v2, %v8689_v61 }
 0x3ae   : > { %v8777_v8 = vpop.f32.mrf.mxu1 }
 0x3af   : > { %8833 = vst [vmem:[%s13860_s21 + $0x60] sm:$0xff] %v8817_v23  ;;  %v8820_v59 = vadd.f32 %v8804_v50, %v8786_v10  ;;  %v8778_v39 = vadd.f32 %v8777_v8, %v8681_v60 }
 0x3b1   : > { %8836 = vst [vmem:[%s13860_s21 + $0x78] sm:$0xff] %v8820_v59  ;;  %v8818_v32 = vadd.f32 %v8802_v43, %v8778_v39 }
 0x3b3   : > { %8834 = vst [vmem:[%s13860_s21 + $0x68] sm:$0xff] %v8818_v32 }
 0x3b4 PF: > { %s16_s25 = sadd.s32 1, %s10325_s25   ;;  %s14343_s21 = smov %s10317_s23 }
 0x3b5   : > { %p13_p8 = scmp.ge.s32.totalorder %s16_s25, 6   ;;  %s14344_s22 = smov %s10321_s24 }
 0x3b6   : > { %s14345_s23 = smov %s14348_s26  ;;  %s14346_s24 = smov %s14352_s27 }
 0x3b7   :  { %15 = sbr.rel (!%p13_p8) target bundleno = 3 (0x3), region = 77 }

</bundles_post_ra>
